<compile_context>
chip_gen: v6e
topology: v6e:2x2x1
jax: 0.10.0
libtpu: 0.0.40
codegen_flags: <defaults>
</compile_context>

<pallas_src>
import math

import jax
import jax.numpy as jnp
import numpy as np
from jax import lax
from jax.experimental import pallas as pl
from jax.experimental.pallas import tpu as pltpu


# Set to jnp.bfloat16 to shorten chained MXU latency (perf-review item); kept
# float32 so the tight validation against the f32 reference holds exactly.
MXU_DTYPE = jnp.float32


# ---------------------------------------------------------------------------
# Kernel
# ---------------------------------------------------------------------------
def deepar_kernel(x_ref, w_ref, head_ref, out_ref, l0_ref):
    """Whole DeepAR forward for one small batch, fully unrolled (T static).

    x_ref    : (T*B, 1)      time-major flattened input (row t*B+b <-> (t, b))
    w_ref    : (8H+10, 3H)   packed GRU weights / biases (see prep_params)
    head_ref : (2H+1, 2P)    packed head weights + bias
    out_ref  : (B, 2P)       [mu | softplus(pre_sigma)]
    l0_ref   : (T*B, 2H)     VMEM scratch staging layer-0 outputs [fwd | bwd]
    """
    B, twoP = out_ref.shape
    P = twoP // 2
    TB = x_ref.shape[0]
    T = TB // B
    H = w_ref.shape[1] // 3
    VEC = 8 * H
    f32 = jnp.float32

    # ---- unpack the packed parameter slab (static row slices) ---------------
    w0f_hh = w_ref[0 * H:1 * H, :]        # (H, 3H)
    w0b_hh = w_ref[1 * H:2 * H, :]        # (H, 3H)
    w1f_in = w_ref[2 * H:4 * H, :]        # (2H, 3H)
    w1f_hh = w_ref[4 * H:5 * H, :]        # (H, 3H)
    w1b_in = w_ref[5 * H:7 * H, :]        # (2H, 3H)
    # rows [7H, 8H) hold w1b_hh: unused because the layer-1 backward direction
    # only runs its first step from a zero hidden state (h @ W_hh == 0).
    w0f_in = w_ref[VEC + 0:VEC + 1, :]    # (1, 3H)
    w0b_in = w_ref[VEC + 1:VEC + 2, :]
    b0f_i = w_ref[VEC + 2:VEC + 3, :]     # fused input-side biases (r,z incl. b_hh)
    b0b_i = w_ref[VEC + 3:VEC + 4, :]
    b0f_h = w_ref[VEC + 4:VEC + 5, :]     # [0 | 0 | b_hn]
    b0b_h = w_ref[VEC + 5:VEC + 6, :]
    b1f_i = w_ref[VEC + 6:VEC + 7, :]
    b1b_i = w_ref[VEC + 7:VEC + 8, :]
    b1f_h = w_ref[VEC + 8:VEC + 9, :]
    b1b_h = w_ref[VEC + 9:VEC + 10, :]

    def cell(h, gi, w_hh, b_h):
        """Gate-fused PyTorch GRU cell (gate order r, z, n).

        gi  : (B, 3H) input projections incl. b_ih (all gates) + b_hh (r, z).
        b_h : (1, 3H) = [0 | 0 | b_hn]  (hidden-side bias, n gate only).
        One (B,H)@(H,3H) MXU push per cell; gates split via static lane slices.
        """
        gh = jnp.dot(h.astype(MXU_DTYPE), w_hh.astype(MXU_DTYPE),
                     preferred_element_type=f32) + b_h
        r = jax.nn.sigmoid(gi[:, 0 * H:1 * H] + gh[:, 0 * H:1 * H])
        z = jax.nn.sigmoid(gi[:, 1 * H:2 * H] + gh[:, 1 * H:2 * H])
        n = jnp.tanh(gi[:, 2 * H:3 * H] + r * gh[:, 2 * H:3 * H])
        return (1.0 - z) * n + z * h

    # ---- layer-0 input projections, lane/sublane dense -----------------------
    # input_size == 1 -> rank-1 broadcast multiplies (VPU work, off the chain);
    # (T*B, 3H) = (16, 96) per direction == 2 vregs each.
    x_all = x_ref[...]                                  # (T*B, 1)
    gi0f = x_all * w0f_in + b0f_i                       # (T*B, 3H)
    gi0b = x_all * w0b_in + b0b_i

    hz = jnp.zeros((B, H), f32)

    # ---- layer 0: interleaved fwd / bwd recurrences, fully unrolled ----------
    # Outputs are staged into the (T*B, 2H) VMEM slab [fwd | bwd] so layer 1 /
    # the heads can consume them with batched, lane-dense matmuls.
    # TODO(synk): on v6e/v7x (256-wide MXU) the fwd/bwd cells could be fused
    # into one block-diagonal (B,2H)@(2H,6H) matmul per step, and on v7x the
    # fused W_hh could stay MXU-resident via pltpu.matmul_push_rhs/acc/pop with
    # MRB in-place accumulation; skipped to keep one portable kernel.
    hf = hz
    hb = hz
    for i in range(T):                                  # static unroll
        tb = T - 1 - i
        hf = cell(hf, gi0f[i * B:(i + 1) * B, :], w0f_hh, b0f_h)
        hb = cell(hb, gi0b[tb * B:(tb + 1) * B, :], w0b_hh, b0b_h)
        l0_ref[i * B:(i + 1) * B, 0:H] = hf
        l0_ref[tb * B:(tb + 1) * B, H:2 * H] = hb

    # ---- layer-1 input projections: ONE batched matmul for all timesteps -----
    l0_all = l0_ref[...]                                # (T*B, 2H)
    gi1f = jnp.dot(l0_all.astype(MXU_DTYPE), w1f_in.astype(MXU_DTYPE),
                   preferred_element_type=f32) + b1f_i  # (T*B, 3H)

    # ---- layer 1, forward direction ------------------------------------------
    h1 = hz
    for t in range(T):
        h1 = cell(h1, gi1f[t * B:(t + 1) * B, :], w1f_hh, b1f_h)
    h1f = h1                                            # output[:, -1, :H]

    # ---- layer 1, backward direction: only its first step (t = T-1) ----------
    # h starts at zero, so gh == b1b_h and the hidden matmul is skipped.
    last = l0_all[(T - 1) * B:T * B, :]                 # (B, 2H)
    gi1b = jnp.dot(last.astype(MXU_DTYPE), w1b_in.astype(MXU_DTYPE),
                   preferred_element_type=f32) + b1b_i  # (B, 3H)
    rb = jax.nn.sigmoid(gi1b[:, 0 * H:1 * H])
    zb = jax.nn.sigmoid(gi1b[:, 1 * H:2 * H])
    nb = jnp.tanh(gi1b[:, 2 * H:3 * H] + rb * b1b_h[:, 2 * H:3 * H])
    h1b = (1.0 - zb) * nb                               # (+ zb * 0)

    # ---- fused heads: [mu | pre_sigma] ----------------------------------------
    # h1b is available early, so its matmul + bias is off the h1f critical path.
    wh_f = head_ref[0:H, :]                             # (H, 2P)
    wh_b = head_ref[H:2 * H, :]                         # (H, 2P)
    bh = head_ref[2 * H:2 * H + 1, :]                   # (1, 2P)
    heads = (jnp.dot(h1f.astype(MXU_DTYPE), wh_f.astype(MXU_DTYPE),
                     preferred_element_type=f32)
             + jnp.dot(h1b.astype(MXU_DTYPE), wh_b.astype(MXU_DTYPE),
                       preferred_element_type=f32)
             + bh)                                      # (B, 2P)

    # numerically stable softplus on the sigma half (PyTorch threshold=20):
    # max(x,0) + log(1 + exp(-|x|))  == log1p(exp(x)); no inf intermediates.
    sp = jnp.maximum(heads, 0.0) + jnp.log(1.0 + jnp.exp(-jnp.abs(heads)))
    sp = jnp.where(heads > 20.0, heads, sp)
    col = lax.broadcasted_iota(jnp.int32, heads.shape, dimension=1)
    out_ref[...] = jnp.where(col >= P, sp, heads)


# ---------------------------------------------------------------------------
# Wrapper: PyTorch-layout params -> two packed kernel slabs (done ONCE)
# ---------------------------------------------------------------------------
def _fuse_biases(b_ih, b_hh, H):
    """Return (b_i, b_h): b_i = [b_ih_r+b_hh_r | b_ih_z+b_hh_z | b_ih_n],
    b_h = [0 | 0 | b_hh_n] (n-gate hidden bias is applied after r-gating)."""
    b_i = jnp.concatenate([b_ih[:H] + b_hh[:H],
                           b_ih[H:2 * H] + b_hh[H:2 * H],
                           b_ih[2 * H:]])[None, :].astype(jnp.float32)
    b_h = jnp.concatenate([jnp.zeros((2 * H,), jnp.float32),
                           b_hh[2 * H:]])[None, :].astype(jnp.float32)
    return b_i, b_h


def prep_params(params, H):
    """Pack PyTorch-layout GRU/Linear params into two contiguous f32 slabs."""
    f32 = jnp.float32

    def tr(name):  # (3H, in) -> (in, 3H), gate columns stay in [r | z | n] order
        return params[name].T.astype(f32)

    vecs = {}
    for layer in (0, 1):
        for rev, d in (("", "f"), ("_reverse", "b")):
            suf = f"l{layer}{rev}"
            b_i, b_h = _fuse_biases(params[f"bias_ih_{suf}"],
                                    params[f"bias_hh_{suf}"], H)
            vecs[f"b{layer}{d}_i"] = b_i
            vecs[f"b{layer}{d}_h"] = b_h

    w_rows = [
        tr("weight_hh_l0"),              # rows [0H, 1H)  w0f_hh
        tr("weight_hh_l0_reverse"),      # rows [1H, 2H)  w0b_hh
        tr("weight_ih_l1"),              # rows [2H, 4H)  w1f_in
        tr("weight_hh_l1"),              # rows [4H, 5H)  w1f_hh
        tr("weight_ih_l1_reverse"),      # rows [5H, 7H)  w1b_in
        tr("weight_hh_l1_reverse"),      # rows [7H, 8H)  w1b_hh (unused in kernel)
        # 1-row vectors, rows 8H + k:
        tr("weight_ih_l0"),              # +0 w0f_in
        tr("weight_ih_l0_reverse"),      # +1 w0b_in
        vecs["b0f_i"],                   # +2
        vecs["b0b_i"],                   # +3
        vecs["b0f_h"],                   # +4
        vecs["b0b_h"],                   # +5
        vecs["b1f_i"],                   # +6
        vecs["b1b_i"],                   # +7
        vecs["b1f_h"],                   # +8
        vecs["b1b_h"],                   # +9
    ]
    w_slab = jnp.concatenate(w_rows, axis=0)                 # (8H+10, 3H)

    # heads: columns [0:P] = mu, [P:2P] = pre_sigma; split into fwd/bwd halves
    w_mu = params["mu_weight"].astype(f32)
    w_ps = params["presigma_weight"].astype(f32)
    wh_f = jnp.concatenate([w_mu[:, :H].T, w_ps[:, :H].T], axis=1)   # (H, 2P)
    wh_b = jnp.concatenate([w_mu[:, H:].T, w_ps[:, H:].T], axis=1)   # (H, 2P)
    bh = jnp.concatenate([params["mu_bias"], params["presigma_bias"]]
                         ).astype(f32)[None, :]                      # (1, 2P)
    head_slab = jnp.concatenate([wh_f, wh_b, bh], axis=0)            # (2H+1, 2P)
    return w_slab, head_slab


@jax.jit
def deepar_forward(x, w_slab, head_slab):
    """x: (B, T, 1) batch-first. Returns (mu, sigma), each (B, P)."""
    B, T, _ = x.shape
    H = w_slab.shape[1] // 3
    P = head_slab.shape[1] // 2

    # time-major, flattened: row t*B + b  <->  (t, b)
    x_flat = jnp.transpose(x, (1, 0, 2)).reshape(T * B, 1).astype(jnp.float32)

    vmem = pl.BlockSpec(memory_space=pltpu.MemorySpace.VMEM)
    out = pl.pallas_call(
        deepar_kernel,
        out_shape=jax.ShapeDtypeStruct((B, 2 * P), jnp.float32),
        in_specs=[vmem, vmem, vmem],
        out_specs=vmem,
        scratch_shapes=[pltpu.VMEM((T * B, 2 * H), jnp.float32)],
    )(x_flat, w_slab, head_slab)
    # TODO(synk): for large B add a batch grid with
    # compiler_params=pltpu.CompilerParams(dimension_semantics=("parallel",))
    # to use both TensorCores (v7x megacore); irrelevant at B=2.
    return out[:, :P], out[:, P:]


# ---------------------------------------------------------------------------
# Deterministic init (PyTorch layout / init ranges) and pure-JAX reference
# ---------------------------------------------------------------------------
def init_params(key, H, P):
    k_gru = 1.0 / math.sqrt(H)
    k_lin = 1.0 / math.sqrt(2 * H)
    shapes = {}
    for layer, in_f in ((0, 1), (1, 2 * H)):
        for suf in ("", "_reverse"):
            name = f"l{layer}{suf}"
            shapes[f"weight_ih_{name}"] = ((3 * H, in_f), k_gru)
            shapes[f"weight_hh_{name}"] = ((3 * H, H), k_gru)
            shapes[f"bias_ih_{name}"] = ((3 * H,), k_gru)
            shapes[f"bias_hh_{name}"] = ((3 * H,), k_gru)
    shapes["mu_weight"] = ((P, 2 * H), k_lin)
    shapes["mu_bias"] = ((P,), k_lin)
    shapes["presigma_weight"] = ((P, 2 * H), k_lin)
    shapes["presigma_bias"] = ((P,), k_lin)

    names = sorted(shapes)
    keys = jax.random.split(key, len(names))
    return {n: jax.random.uniform(k, shapes[n][0], jnp.float32,
                                  minval=-shapes[n][1], maxval=shapes[n][1])
            for n, k in zip(names, keys)}


def deepar_ref(x, params):
    """Full bidirectional 2-layer GRU + heads in pure JAX (validation)."""
    x_tm = jnp.transpose(x, (1, 0, 2)).astype(jnp.float32)           # (T, B, in)
    T, B, _ = x_tm.shape
    H = params["weight_hh_l0"].shape[1]

    def cell(xt, h, w_ih, w_hh, b_ih, b_hh):
        gi = xt @ w_ih.T + b_ih
        gh = h @ w_hh.T + b_hh
        r = jax.nn.sigmoid(gi[:, :H] + gh[:, :H])
        z = jax.nn.sigmoid(gi[:, H:2 * H] + gh[:, H:2 * H])
        n = jnp.tanh(gi[:, 2 * H:] + r * gh[:, 2 * H:])
        return (1.0 - z) * n + z * h

    def bi_layer(seq, layer):
        h = jnp.zeros((B, H), jnp.float32)
        fwd = []
        for t in range(T):
            h = cell(seq[t], h,
                     params[f"weight_ih_l{layer}"], params[f"weight_hh_l{layer}"],
                     params[f"bias_ih_l{layer}"], params[f"bias_hh_l{layer}"])
            fwd.append(h)
        h = jnp.zeros((B, H), jnp.float32)
        bwd = [None] * T
        for t in range(T - 1, -1, -1):
            h = cell(seq[t], h,
                     params[f"weight_ih_l{layer}_reverse"],
                     params[f"weight_hh_l{layer}_reverse"],
                     params[f"bias_ih_l{layer}_reverse"],
                     params[f"bias_hh_l{layer}_reverse"])
            bwd[t] = h
        return [jnp.concatenate([fwd[t], bwd[t]], axis=-1) for t in range(T)]

    out0 = bi_layer([x_tm[t] for t in range(T)], 0)
    out1 = bi_layer(out0, 1)
    last = out1[-1]                                                   # (B, 2H)
    mu = last @ params["mu_weight"].T + params["mu_bias"]
    ps = last @ params["presigma_weight"].T + params["presigma_bias"]
    sigma = jnp.where(ps > 20.0, ps, jnp.log1p(jnp.exp(ps)))
    return mu, sigma


if __name__ == "__main__":
    B, T, H, P = 2, 8, 32, 1   # batch, input_window_size, num_neurons, predicted_step

    key = jax.random.PRNGKey(0)
    kx, kp = jax.random.split(key)
    x = jax.random.normal(kx, (B, T, 1), dtype=jnp.float32)
    params = init_params(kp, H, P)

    # parameter prep hoisted out of the (jitted) per-call path
    w_slab, head_slab = prep_params(params, H)

    mu, sigma = deepar_forward(x, w_slab, head_slab)
    mu, sigma = jax.block_until_ready(mu), jax.block_until_ready(sigma)

    mu_ref, sigma_ref = deepar_ref(x, params)
    np.testing.assert_allclose(np.asarray(mu), np.asarray(mu_ref), rtol=1e-4, atol=1e-5)
    np.testing.assert_allclose(np.asarray(sigma), np.asarray(sigma_ref), rtol=1e-4, atol=1e-5)

    print("KERNEL_OK")
</pallas_src>

<mosaic_0001>
module attributes {stable_mosaic.version = 11 : i64} {
  func.func @deepar_kernel(%arg0: memref<16x1xf32, #tpu.memory_space<vmem>>, %arg1: memref<266x96xf32, #tpu.memory_space<vmem>>, %arg2: memref<65x2xf32, #tpu.memory_space<vmem>>, %arg3: memref<2x2xf32, #tpu.memory_space<vmem>>, %arg4: memref<16x64xf32, #tpu.memory_space<vmem>>) attributes {dimension_semantics = [], scalar_prefetch = 0 : i64, scratch_operands = 1 : i64, tpu.core_type = #tpu.core_type<tc>} {
    %c0 = arith.constant 0 : index
    %c0_0 = arith.constant 0 : index
    %0 = vector.load %arg1[%c0, %c0_0] : memref<266x96xf32, #tpu.memory_space<vmem>>, vector<32x96xf32>
    %c32 = arith.constant 32 : index
    %c0_1 = arith.constant 0 : index
    %1 = vector.load %arg1[%c32, %c0_1] : memref<266x96xf32, #tpu.memory_space<vmem>>, vector<32x96xf32>
    %c64 = arith.constant 64 : index
    %c0_2 = arith.constant 0 : index
    %2 = vector.load %arg1[%c64, %c0_2] : memref<266x96xf32, #tpu.memory_space<vmem>>, vector<64x96xf32>
    %c128 = arith.constant 128 : index
    %c0_3 = arith.constant 0 : index
    %3 = vector.load %arg1[%c128, %c0_3] : memref<266x96xf32, #tpu.memory_space<vmem>>, vector<32x96xf32>
    %c160 = arith.constant 160 : index
    %c0_4 = arith.constant 0 : index
    %4 = vector.load %arg1[%c160, %c0_4] : memref<266x96xf32, #tpu.memory_space<vmem>>, vector<64x96xf32>
    %c256 = arith.constant 256 : index
    %c0_5 = arith.constant 0 : index
    %5 = vector.load %arg1[%c256, %c0_5] : memref<266x96xf32, #tpu.memory_space<vmem>>, vector<1x96xf32>
    %c257 = arith.constant 257 : index
    %c0_6 = arith.constant 0 : index
    %6 = vector.load %arg1[%c257, %c0_6] : memref<266x96xf32, #tpu.memory_space<vmem>>, vector<1x96xf32>
    %c258 = arith.constant 258 : index
    %c0_7 = arith.constant 0 : index
    %7 = vector.load %arg1[%c258, %c0_7] : memref<266x96xf32, #tpu.memory_space<vmem>>, vector<1x96xf32>
    %c259 = arith.constant 259 : index
    %c0_8 = arith.constant 0 : index
    %8 = vector.load %arg1[%c259, %c0_8] : memref<266x96xf32, #tpu.memory_space<vmem>>, vector<1x96xf32>
    %c260 = arith.constant 260 : index
    %c0_9 = arith.constant 0 : index
    %9 = vector.load %arg1[%c260, %c0_9] : memref<266x96xf32, #tpu.memory_space<vmem>>, vector<1x96xf32>
    %c261 = arith.constant 261 : index
    %c0_10 = arith.constant 0 : index
    %10 = vector.load %arg1[%c261, %c0_10] : memref<266x96xf32, #tpu.memory_space<vmem>>, vector<1x96xf32>
    %c262 = arith.constant 262 : index
    %c0_11 = arith.constant 0 : index
    %11 = vector.load %arg1[%c262, %c0_11] : memref<266x96xf32, #tpu.memory_space<vmem>>, vector<1x96xf32>
    %c263 = arith.constant 263 : index
    %c0_12 = arith.constant 0 : index
    %12 = vector.load %arg1[%c263, %c0_12] : memref<266x96xf32, #tpu.memory_space<vmem>>, vector<1x96xf32>
    %c264 = arith.constant 264 : index
    %c0_13 = arith.constant 0 : index
    %13 = vector.load %arg1[%c264, %c0_13] : memref<266x96xf32, #tpu.memory_space<vmem>>, vector<1x96xf32>
    %c265 = arith.constant 265 : index
    %c0_14 = arith.constant 0 : index
    %14 = vector.load %arg1[%c265, %c0_14] : memref<266x96xf32, #tpu.memory_space<vmem>>, vector<1x96xf32>
    %c0_15 = arith.constant 0 : index
    %c0_16 = arith.constant 0 : index
    %15 = vector.load %arg0[%c0_15, %c0_16] : memref<16x1xf32, #tpu.memory_space<vmem>>, vector<16x1xf32>
    %16 = vector.broadcast %15 : vector<16x1xf32> to vector<16x96xf32>
    %17 = vector.broadcast %5 : vector<1x96xf32> to vector<16x96xf32>
    %18 = arith.mulf %16, %17 : vector<16x96xf32>
    %19 = vector.broadcast %7 : vector<1x96xf32> to vector<16x96xf32>
    %20 = arith.addf %18, %19 : vector<16x96xf32>
    %21 = vector.broadcast %15 : vector<16x1xf32> to vector<16x96xf32>
    %22 = vector.broadcast %6 : vector<1x96xf32> to vector<16x96xf32>
    %23 = arith.mulf %21, %22 : vector<16x96xf32>
    %24 = vector.broadcast %8 : vector<1x96xf32> to vector<16x96xf32>
    %25 = arith.addf %23, %24 : vector<16x96xf32>
    %cst = arith.constant 0.000000e+00 : f32
    %26 = vector.broadcast %cst : f32 to vector<2x32xf32>
    %27 = vector.extract_strided_slice %20 {offsets = [0, 0], sizes = [2, 96], strides = [1, 1]} : vector<16x96xf32> to vector<2x96xf32>
    %cst_17 = arith.constant dense<0.000000e+00> : vector<2x96xf32>
    %28 = tpu.matmul %26, %0, %cst_17 {dimension_numbers = #tpu.dot_dimension_numbers<[1], [0], [0], [1], [0, 0, 1, 1], [], []>} : vector<2x32xf32>, vector<32x96xf32>, vector<2x96xf32> -> vector<2x96xf32>
    %29 = vector.broadcast %9 : vector<1x96xf32> to vector<2x96xf32>
    %30 = arith.addf %28, %29 : vector<2x96xf32>
    %31 = vector.extract_strided_slice %27 {offsets = [0, 0], sizes = [2, 32], strides = [1, 1]} : vector<2x96xf32> to vector<2x32xf32>
    %32 = vector.extract_strided_slice %30 {offsets = [0, 0], sizes = [2, 32], strides = [1, 1]} : vector<2x96xf32> to vector<2x32xf32>
    %33 = arith.addf %31, %32 : vector<2x32xf32>
    %34 = arith.negf %33 : vector<2x32xf32>
    %35 = math.exp %34 : vector<2x32xf32>
    %cst_18 = arith.constant 1.000000e+00 : f32
    %36 = vector.broadcast %cst_18 : f32 to vector<2x32xf32>
    %37 = arith.addf %36, %35 : vector<2x32xf32>
    %38 = arith.divf %36, %37 : vector<2x32xf32>
    %39 = vector.extract_strided_slice %27 {offsets = [0, 32], sizes = [2, 32], strides = [1, 1]} : vector<2x96xf32> to vector<2x32xf32>
    %40 = vector.extract_strided_slice %30 {offsets = [0, 32], sizes = [2, 32], strides = [1, 1]} : vector<2x96xf32> to vector<2x32xf32>
    %41 = arith.addf %39, %40 : vector<2x32xf32>
    %42 = arith.negf %41 : vector<2x32xf32>
    %43 = math.exp %42 : vector<2x32xf32>
    %cst_19 = arith.constant 1.000000e+00 : f32
    %44 = vector.broadcast %cst_19 : f32 to vector<2x32xf32>
    %45 = arith.addf %44, %43 : vector<2x32xf32>
    %46 = arith.divf %44, %45 : vector<2x32xf32>
    %47 = vector.extract_strided_slice %27 {offsets = [0, 64], sizes = [2, 32], strides = [1, 1]} : vector<2x96xf32> to vector<2x32xf32>
    %48 = vector.extract_strided_slice %30 {offsets = [0, 64], sizes = [2, 32], strides = [1, 1]} : vector<2x96xf32> to vector<2x32xf32>
    %49 = arith.mulf %38, %48 : vector<2x32xf32>
    %50 = arith.addf %47, %49 : vector<2x32xf32>
    %51 = math.tanh %50 : vector<2x32xf32>
    %cst_20 = arith.constant 1.000000e+00 : f32
    %52 = vector.broadcast %cst_20 : f32 to vector<2x32xf32>
    %53 = arith.subf %52, %46 : vector<2x32xf32>
    %54 = arith.mulf %53, %51 : vector<2x32xf32>
    %55 = arith.mulf %46, %26 : vector<2x32xf32>
    %56 = arith.addf %54, %55 : vector<2x32xf32>
    %57 = vector.extract_strided_slice %25 {offsets = [14, 0], sizes = [2, 96], strides = [1, 1]} : vector<16x96xf32> to vector<2x96xf32>
    %cst_21 = arith.constant dense<0.000000e+00> : vector<2x96xf32>
    %58 = tpu.matmul %26, %1, %cst_21 {dimension_numbers = #tpu.dot_dimension_numbers<[1], [0], [0], [1], [0, 0, 1, 1], [], []>} : vector<2x32xf32>, vector<32x96xf32>, vector<2x96xf32> -> vector<2x96xf32>
    %59 = vector.broadcast %10 : vector<1x96xf32> to vector<2x96xf32>
    %60 = arith.addf %58, %59 : vector<2x96xf32>
    %61 = vector.extract_strided_slice %57 {offsets = [0, 0], sizes = [2, 32], strides = [1, 1]} : vector<2x96xf32> to vector<2x32xf32>
    %62 = vector.extract_strided_slice %60 {offsets = [0, 0], sizes = [2, 32], strides = [1, 1]} : vector<2x96xf32> to vector<2x32xf32>
    %63 = arith.addf %61, %62 : vector<2x32xf32>
    %64 = arith.negf %63 : vector<2x32xf32>
    %65 = math.exp %64 : vector<2x32xf32>
    %cst_22 = arith.constant 1.000000e+00 : f32
    %66 = vector.broadcast %cst_22 : f32 to vector<2x32xf32>
    %67 = arith.addf %66, %65 : vector<2x32xf32>
    %68 = arith.divf %66, %67 : vector<2x32xf32>
    %69 = vector.extract_strided_slice %57 {offsets = [0, 32], sizes = [2, 32], strides = [1, 1]} : vector<2x96xf32> to vector<2x32xf32>
    %70 = vector.extract_strided_slice %60 {offsets = [0, 32], sizes = [2, 32], strides = [1, 1]} : vector<2x96xf32> to vector<2x32xf32>
    %71 = arith.addf %69, %70 : vector<2x32xf32>
    %72 = arith.negf %71 : vector<2x32xf32>
    %73 = math.exp %72 : vector<2x32xf32>
    %cst_23 = arith.constant 1.000000e+00 : f32
    %74 = vector.broadcast %cst_23 : f32 to vector<2x32xf32>
    %75 = arith.addf %74, %73 : vector<2x32xf32>
    %76 = arith.divf %74, %75 : vector<2x32xf32>
    %77 = vector.extract_strided_slice %57 {offsets = [0, 64], sizes = [2, 32], strides = [1, 1]} : vector<2x96xf32> to vector<2x32xf32>
    %78 = vector.extract_strided_slice %60 {offsets = [0, 64], sizes = [2, 32], strides = [1, 1]} : vector<2x96xf32> to vector<2x32xf32>
    %79 = arith.mulf %68, %78 : vector<2x32xf32>
    %80 = arith.addf %77, %79 : vector<2x32xf32>
    %81 = math.tanh %80 : vector<2x32xf32>
    %cst_24 = arith.constant 1.000000e+00 : f32
    %82 = vector.broadcast %cst_24 : f32 to vector<2x32xf32>
    %83 = arith.subf %82, %76 : vector<2x32xf32>
    %84 = arith.mulf %83, %81 : vector<2x32xf32>
    %85 = arith.mulf %76, %26 : vector<2x32xf32>
    %86 = arith.addf %84, %85 : vector<2x32xf32>
    %c0_25 = arith.constant 0 : index
    %c0_26 = arith.constant 0 : index
    %87 = vector.load %arg4[%c0_25, %c0_26] : memref<16x64xf32, #tpu.memory_space<vmem>>, vector<2x32xf32>
    tpu.vector_store %arg4[%c0_25, %c0_26], %56 {strides = array<i32>} : memref<16x64xf32, #tpu.memory_space<vmem>>, vector<2x32xf32>,
    %c14 = arith.constant 14 : index
    %c32_27 = arith.constant 32 : index
    %88 = vector.load %arg4[%c14, %c32_27] : memref<16x64xf32, #tpu.memory_space<vmem>>, vector<2x32xf32>
    tpu.vector_store %arg4[%c14, %c32_27], %86 {strides = array<i32>} : memref<16x64xf32, #tpu.memory_space<vmem>>, vector<2x32xf32>,
    %89 = vector.extract_strided_slice %20 {offsets = [2, 0], sizes = [2, 96], strides = [1, 1]} : vector<16x96xf32> to vector<2x96xf32>
    %cst_28 = arith.constant dense<0.000000e+00> : vector<2x96xf32>
    %90 = tpu.matmul %56, %0, %cst_28 {dimension_numbers = #tpu.dot_dimension_numbers<[1], [0], [0], [1], [0, 0, 1, 1], [], []>} : vector<2x32xf32>, vector<32x96xf32>, vector<2x96xf32> -> vector<2x96xf32>
    %91 = vector.broadcast %9 : vector<1x96xf32> to vector<2x96xf32>
    %92 = arith.addf %90, %91 : vector<2x96xf32>
    %93 = vector.extract_strided_slice %89 {offsets = [0, 0], sizes = [2, 32], strides = [1, 1]} : vector<2x96xf32> to vector<2x32xf32>
    %94 = vector.extract_strided_slice %92 {offsets = [0, 0], sizes = [2, 32], strides = [1, 1]} : vector<2x96xf32> to vector<2x32xf32>
    %95 = arith.addf %93, %94 : vector<2x32xf32>
    %96 = arith.negf %95 : vector<2x32xf32>
    %97 = math.exp %96 : vector<2x32xf32>
    %cst_29 = arith.constant 1.000000e+00 : f32
    %98 = vector.broadcast %cst_29 : f32 to vector<2x32xf32>
    %99 = arith.addf %98, %97 : vector<2x32xf32>
    %100 = arith.divf %98, %99 : vector<2x32xf32>
    %101 = vector.extract_strided_slice %89 {offsets = [0, 32], sizes = [2, 32], strides = [1, 1]} : vector<2x96xf32> to vector<2x32xf32>
    %102 = vector.extract_strided_slice %92 {offsets = [0, 32], sizes = [2, 32], strides = [1, 1]} : vector<2x96xf32> to vector<2x32xf32>
    %103 = arith.addf %101, %102 : vector<2x32xf32>
    %104 = arith.negf %103 : vector<2x32xf32>
    %105 = math.exp %104 : vector<2x32xf32>
    %cst_30 = arith.constant 1.000000e+00 : f32
    %106 = vector.broadcast %cst_30 : f32 to vector<2x32xf32>
    %107 = arith.addf %106, %105 : vector<2x32xf32>
    %108 = arith.divf %106, %107 : vector<2x32xf32>
    %109 = vector.extract_strided_slice %89 {offsets = [0, 64], sizes = [2, 32], strides = [1, 1]} : vector<2x96xf32> to vector<2x32xf32>
    %110 = vector.extract_strided_slice %92 {offsets = [0, 64], sizes = [2, 32], strides = [1, 1]} : vector<2x96xf32> to vector<2x32xf32>
    %111 = arith.mulf %100, %110 : vector<2x32xf32>
    %112 = arith.addf %109, %111 : vector<2x32xf32>
    %113 = math.tanh %112 : vector<2x32xf32>
    %cst_31 = arith.constant 1.000000e+00 : f32
    %114 = vector.broadcast %cst_31 : f32 to vector<2x32xf32>
    %115 = arith.subf %114, %108 : vector<2x32xf32>
    %116 = arith.mulf %115, %113 : vector<2x32xf32>
    %117 = arith.mulf %108, %56 : vector<2x32xf32>
    %118 = arith.addf %116, %117 : vector<2x32xf32>
    %119 = vector.extract_strided_slice %25 {offsets = [12, 0], sizes = [2, 96], strides = [1, 1]} : vector<16x96xf32> to vector<2x96xf32>
    %cst_32 = arith.constant dense<0.000000e+00> : vector<2x96xf32>
    %120 = tpu.matmul %86, %1, %cst_32 {dimension_numbers = #tpu.dot_dimension_numbers<[1], [0], [0], [1], [0, 0, 1, 1], [], []>} : vector<2x32xf32>, vector<32x96xf32>, vector<2x96xf32> -> vector<2x96xf32>
    %121 = vector.broadcast %10 : vector<1x96xf32> to vector<2x96xf32>
    %122 = arith.addf %120, %121 : vector<2x96xf32>
    %123 = vector.extract_strided_slice %119 {offsets = [0, 0], sizes = [2, 32], strides = [1, 1]} : vector<2x96xf32> to vector<2x32xf32>
    %124 = vector.extract_strided_slice %122 {offsets = [0, 0], sizes = [2, 32], strides = [1, 1]} : vector<2x96xf32> to vector<2x32xf32>
    %125 = arith.addf %123, %124 : vector<2x32xf32>
    %126 = arith.negf %125 : vector<2x32xf32>
    %127 = math.exp %126 : vector<2x32xf32>
    %cst_33 = arith.constant 1.000000e+00 : f32
    %128 = vector.broadcast %cst_33 : f32 to vector<2x32xf32>
    %129 = arith.addf %128, %127 : vector<2x32xf32>
    %130 = arith.divf %128, %129 : vector<2x32xf32>
    %131 = vector.extract_strided_slice %119 {offsets = [0, 32], sizes = [2, 32], strides = [1, 1]} : vector<2x96xf32> to vector<2x32xf32>
    %132 = vector.extract_strided_slice %122 {offsets = [0, 32], sizes = [2, 32], strides = [1, 1]} : vector<2x96xf32> to vector<2x32xf32>
    %133 = arith.addf %131, %132 : vector<2x32xf32>
    %134 = arith.negf %133 : vector<2x32xf32>
    %135 = math.exp %134 : vector<2x32xf32>
    %cst_34 = arith.constant 1.000000e+00 : f32
    %136 = vector.broadcast %cst_34 : f32 to vector<2x32xf32>
    %137 = arith.addf %136, %135 : vector<2x32xf32>
    %138 = arith.divf %136, %137 : vector<2x32xf32>
    %139 = vector.extract_strided_slice %119 {offsets = [0, 64], sizes = [2, 32], strides = [1, 1]} : vector<2x96xf32> to vector<2x32xf32>
    %140 = vector.extract_strided_slice %122 {offsets = [0, 64], sizes = [2, 32], strides = [1, 1]} : vector<2x96xf32> to vector<2x32xf32>
    %141 = arith.mulf %130, %140 : vector<2x32xf32>
    %142 = arith.addf %139, %141 : vector<2x32xf32>
    %143 = math.tanh %142 : vector<2x32xf32>
    %cst_35 = arith.constant 1.000000e+00 : f32
    %144 = vector.broadcast %cst_35 : f32 to vector<2x32xf32>
    %145 = arith.subf %144, %138 : vector<2x32xf32>
    %146 = arith.mulf %145, %143 : vector<2x32xf32>
    %147 = arith.mulf %138, %86 : vector<2x32xf32>
    %148 = arith.addf %146, %147 : vector<2x32xf32>
    %c2 = arith.constant 2 : index
    %c0_36 = arith.constant 0 : index
    %149 = vector.load %arg4[%c2, %c0_36] : memref<16x64xf32, #tpu.memory_space<vmem>>, vector<2x32xf32>
    tpu.vector_store %arg4[%c2, %c0_36], %118 {strides = array<i32>} : memref<16x64xf32, #tpu.memory_space<vmem>>, vector<2x32xf32>,
    %c12 = arith.constant 12 : index
    %c32_37 = arith.constant 32 : index
    %150 = vector.load %arg4[%c12, %c32_37] : memref<16x64xf32, #tpu.memory_space<vmem>>, vector<2x32xf32>
    tpu.vector_store %arg4[%c12, %c32_37], %148 {strides = array<i32>} : memref<16x64xf32, #tpu.memory_space<vmem>>, vector<2x32xf32>,
    %151 = vector.extract_strided_slice %20 {offsets = [4, 0], sizes = [2, 96], strides = [1, 1]} : vector<16x96xf32> to vector<2x96xf32>
    %cst_38 = arith.constant dense<0.000000e+00> : vector<2x96xf32>
    %152 = tpu.matmul %118, %0, %cst_38 {dimension_numbers = #tpu.dot_dimension_numbers<[1], [0], [0], [1], [0, 0, 1, 1], [], []>} : vector<2x32xf32>, vector<32x96xf32>, vector<2x96xf32> -> vector<2x96xf32>
    %153 = vector.broadcast %9 : vector<1x96xf32> to vector<2x96xf32>
    %154 = arith.addf %152, %153 : vector<2x96xf32>
    %155 = vector.extract_strided_slice %151 {offsets = [0, 0], sizes = [2, 32], strides = [1, 1]} : vector<2x96xf32> to vector<2x32xf32>
    %156 = vector.extract_strided_slice %154 {offsets = [0, 0], sizes = [2, 32], strides = [1, 1]} : vector<2x96xf32> to vector<2x32xf32>
    %157 = arith.addf %155, %156 : vector<2x32xf32>
    %158 = arith.negf %157 : vector<2x32xf32>
    %159 = math.exp %158 : vector<2x32xf32>
    %cst_39 = arith.constant 1.000000e+00 : f32
    %160 = vector.broadcast %cst_39 : f32 to vector<2x32xf32>
    %161 = arith.addf %160, %159 : vector<2x32xf32>
    %162 = arith.divf %160, %161 : vector<2x32xf32>
    %163 = vector.extract_strided_slice %151 {offsets = [0, 32], sizes = [2, 32], strides = [1, 1]} : vector<2x96xf32> to vector<2x32xf32>
    %164 = vector.extract_strided_slice %154 {offsets = [0, 32], sizes = [2, 32], strides = [1, 1]} : vector<2x96xf32> to vector<2x32xf32>
    %165 = arith.addf %163, %164 : vector<2x32xf32>
    %166 = arith.negf %165 : vector<2x32xf32>
    %167 = math.exp %166 : vector<2x32xf32>
    %cst_40 = arith.constant 1.000000e+00 : f32
    %168 = vector.broadcast %cst_40 : f32 to vector<2x32xf32>
    %169 = arith.addf %168, %167 : vector<2x32xf32>
    %170 = arith.divf %168, %169 : vector<2x32xf32>
    %171 = vector.extract_strided_slice %151 {offsets = [0, 64], sizes = [2, 32], strides = [1, 1]} : vector<2x96xf32> to vector<2x32xf32>
    %172 = vector.extract_strided_slice %154 {offsets = [0, 64], sizes = [2, 32], strides = [1, 1]} : vector<2x96xf32> to vector<2x32xf32>
    %173 = arith.mulf %162, %172 : vector<2x32xf32>
    %174 = arith.addf %171, %173 : vector<2x32xf32>
    %175 = math.tanh %174 : vector<2x32xf32>
    %cst_41 = arith.constant 1.000000e+00 : f32
    %176 = vector.broadcast %cst_41 : f32 to vector<2x32xf32>
    %177 = arith.subf %176, %170 : vector<2x32xf32>
    %178 = arith.mulf %177, %175 : vector<2x32xf32>
    %179 = arith.mulf %170, %118 : vector<2x32xf32>
    %180 = arith.addf %178, %179 : vector<2x32xf32>
    %181 = vector.extract_strided_slice %25 {offsets = [10, 0], sizes = [2, 96], strides = [1, 1]} : vector<16x96xf32> to vector<2x96xf32>
    %cst_42 = arith.constant dense<0.000000e+00> : vector<2x96xf32>
    %182 = tpu.matmul %148, %1, %cst_42 {dimension_numbers = #tpu.dot_dimension_numbers<[1], [0], [0], [1], [0, 0, 1, 1], [], []>} : vector<2x32xf32>, vector<32x96xf32>, vector<2x96xf32> -> vector<2x96xf32>
    %183 = vector.broadcast %10 : vector<1x96xf32> to vector<2x96xf32>
    %184 = arith.addf %182, %183 : vector<2x96xf32>
    %185 = vector.extract_strided_slice %181 {offsets = [0, 0], sizes = [2, 32], strides = [1, 1]} : vector<2x96xf32> to vector<2x32xf32>
    %186 = vector.extract_strided_slice %184 {offsets = [0, 0], sizes = [2, 32], strides = [1, 1]} : vector<2x96xf32> to vector<2x32xf32>
    %187 = arith.addf %185, %186 : vector<2x32xf32>
    %188 = arith.negf %187 : vector<2x32xf32>
    %189 = math.exp %188 : vector<2x32xf32>
    %cst_43 = arith.constant 1.000000e+00 : f32
    %190 = vector.broadcast %cst_43 : f32 to vector<2x32xf32>
    %191 = arith.addf %190, %189 : vector<2x32xf32>
    %192 = arith.divf %190, %191 : vector<2x32xf32>
    %193 = vector.extract_strided_slice %181 {offsets = [0, 32], sizes = [2, 32], strides = [1, 1]} : vector<2x96xf32> to vector<2x32xf32>
    %194 = vector.extract_strided_slice %184 {offsets = [0, 32], sizes = [2, 32], strides = [1, 1]} : vector<2x96xf32> to vector<2x32xf32>
    %195 = arith.addf %193, %194 : vector<2x32xf32>
    %196 = arith.negf %195 : vector<2x32xf32>
    %197 = math.exp %196 : vector<2x32xf32>
    %cst_44 = arith.constant 1.000000e+00 : f32
    %198 = vector.broadcast %cst_44 : f32 to vector<2x32xf32>
    %199 = arith.addf %198, %197 : vector<2x32xf32>
    %200 = arith.divf %198, %199 : vector<2x32xf32>
    %201 = vector.extract_strided_slice %181 {offsets = [0, 64], sizes = [2, 32], strides = [1, 1]} : vector<2x96xf32> to vector<2x32xf32>
    %202 = vector.extract_strided_slice %184 {offsets = [0, 64], sizes = [2, 32], strides = [1, 1]} : vector<2x96xf32> to vector<2x32xf32>
    %203 = arith.mulf %192, %202 : vector<2x32xf32>
    %204 = arith.addf %201, %203 : vector<2x32xf32>
    %205 = math.tanh %204 : vector<2x32xf32>
    %cst_45 = arith.constant 1.000000e+00 : f32
    %206 = vector.broadcast %cst_45 : f32 to vector<2x32xf32>
    %207 = arith.subf %206, %200 : vector<2x32xf32>
    %208 = arith.mulf %207, %205 : vector<2x32xf32>
    %209 = arith.mulf %200, %148 : vector<2x32xf32>
    %210 = arith.addf %208, %209 : vector<2x32xf32>
    %c4 = arith.constant 4 : index
    %c0_46 = arith.constant 0 : index
    %211 = vector.load %arg4[%c4, %c0_46] : memref<16x64xf32, #tpu.memory_space<vmem>>, vector<2x32xf32>
    tpu.vector_store %arg4[%c4, %c0_46], %180 {strides = array<i32>} : memref<16x64xf32, #tpu.memory_space<vmem>>, vector<2x32xf32>,
    %c10 = arith.constant 10 : index
    %c32_47 = arith.constant 32 : index
    %212 = vector.load %arg4[%c10, %c32_47] : memref<16x64xf32, #tpu.memory_space<vmem>>, vector<2x32xf32>
    tpu.vector_store %arg4[%c10, %c32_47], %210 {strides = array<i32>} : memref<16x64xf32, #tpu.memory_space<vmem>>, vector<2x32xf32>,
    %213 = vector.extract_strided_slice %20 {offsets = [6, 0], sizes = [2, 96], strides = [1, 1]} : vector<16x96xf32> to vector<2x96xf32>
    %cst_48 = arith.constant dense<0.000000e+00> : vector<2x96xf32>
    %214 = tpu.matmul %180, %0, %cst_48 {dimension_numbers = #tpu.dot_dimension_numbers<[1], [0], [0], [1], [0, 0, 1, 1], [], []>} : vector<2x32xf32>, vector<32x96xf32>, vector<2x96xf32> -> vector<2x96xf32>
    %215 = vector.broadcast %9 : vector<1x96xf32> to vector<2x96xf32>
    %216 = arith.addf %214, %215 : vector<2x96xf32>
    %217 = vector.extract_strided_slice %213 {offsets = [0, 0], sizes = [2, 32], strides = [1, 1]} : vector<2x96xf32> to vector<2x32xf32>
    %218 = vector.extract_strided_slice %216 {offsets = [0, 0], sizes = [2, 32], strides = [1, 1]} : vector<2x96xf32> to vector<2x32xf32>
    %219 = arith.addf %217, %218 : vector<2x32xf32>
    %220 = arith.negf %219 : vector<2x32xf32>
    %221 = math.exp %220 : vector<2x32xf32>
    %cst_49 = arith.constant 1.000000e+00 : f32
    %222 = vector.broadcast %cst_49 : f32 to vector<2x32xf32>
    %223 = arith.addf %222, %221 : vector<2x32xf32>
    %224 = arith.divf %222, %223 : vector<2x32xf32>
    %225 = vector.extract_strided_slice %213 {offsets = [0, 32], sizes = [2, 32], strides = [1, 1]} : vector<2x96xf32> to vector<2x32xf32>
    %226 = vector.extract_strided_slice %216 {offsets = [0, 32], sizes = [2, 32], strides = [1, 1]} : vector<2x96xf32> to vector<2x32xf32>
    %227 = arith.addf %225, %226 : vector<2x32xf32>
    %228 = arith.negf %227 : vector<2x32xf32>
    %229 = math.exp %228 : vector<2x32xf32>
    %cst_50 = arith.constant 1.000000e+00 : f32
    %230 = vector.broadcast %cst_50 : f32 to vector<2x32xf32>
    %231 = arith.addf %230, %229 : vector<2x32xf32>
    %232 = arith.divf %230, %231 : vector<2x32xf32>
    %233 = vector.extract_strided_slice %213 {offsets = [0, 64], sizes = [2, 32], strides = [1, 1]} : vector<2x96xf32> to vector<2x32xf32>
    %234 = vector.extract_strided_slice %216 {offsets = [0, 64], sizes = [2, 32], strides = [1, 1]} : vector<2x96xf32> to vector<2x32xf32>
    %235 = arith.mulf %224, %234 : vector<2x32xf32>
    %236 = arith.addf %233, %235 : vector<2x32xf32>
    %237 = math.tanh %236 : vector<2x32xf32>
    %cst_51 = arith.constant 1.000000e+00 : f32
    %238 = vector.broadcast %cst_51 : f32 to vector<2x32xf32>
    %239 = arith.subf %238, %232 : vector<2x32xf32>
    %240 = arith.mulf %239, %237 : vector<2x32xf32>
    %241 = arith.mulf %232, %180 : vector<2x32xf32>
    %242 = arith.addf %240, %241 : vector<2x32xf32>
    %243 = vector.extract_strided_slice %25 {offsets = [8, 0], sizes = [2, 96], strides = [1, 1]} : vector<16x96xf32> to vector<2x96xf32>
    %cst_52 = arith.constant dense<0.000000e+00> : vector<2x96xf32>
    %244 = tpu.matmul %210, %1, %cst_52 {dimension_numbers = #tpu.dot_dimension_numbers<[1], [0], [0], [1], [0, 0, 1, 1], [], []>} : vector<2x32xf32>, vector<32x96xf32>, vector<2x96xf32> -> vector<2x96xf32>
    %245 = vector.broadcast %10 : vector<1x96xf32> to vector<2x96xf32>
    %246 = arith.addf %244, %245 : vector<2x96xf32>
    %247 = vector.extract_strided_slice %243 {offsets = [0, 0], sizes = [2, 32], strides = [1, 1]} : vector<2x96xf32> to vector<2x32xf32>
    %248 = vector.extract_strided_slice %246 {offsets = [0, 0], sizes = [2, 32], strides = [1, 1]} : vector<2x96xf32> to vector<2x32xf32>
    %249 = arith.addf %247, %248 : vector<2x32xf32>
    %250 = arith.negf %249 : vector<2x32xf32>
    %251 = math.exp %250 : vector<2x32xf32>
    %cst_53 = arith.constant 1.000000e+00 : f32
    %252 = vector.broadcast %cst_53 : f32 to vector<2x32xf32>
    %253 = arith.addf %252, %251 : vector<2x32xf32>
    %254 = arith.divf %252, %253 : vector<2x32xf32>
    %255 = vector.extract_strided_slice %243 {offsets = [0, 32], sizes = [2, 32], strides = [1, 1]} : vector<2x96xf32> to vector<2x32xf32>
    %256 = vector.extract_strided_slice %246 {offsets = [0, 32], sizes = [2, 32], strides = [1, 1]} : vector<2x96xf32> to vector<2x32xf32>
    %257 = arith.addf %255, %256 : vector<2x32xf32>
    %258 = arith.negf %257 : vector<2x32xf32>
    %259 = math.exp %258 : vector<2x32xf32>
    %cst_54 = arith.constant 1.000000e+00 : f32
    %260 = vector.broadcast %cst_54 : f32 to vector<2x32xf32>
    %261 = arith.addf %260, %259 : vector<2x32xf32>
    %262 = arith.divf %260, %261 : vector<2x32xf32>
    %263 = vector.extract_strided_slice %243 {offsets = [0, 64], sizes = [2, 32], strides = [1, 1]} : vector<2x96xf32> to vector<2x32xf32>
    %264 = vector.extract_strided_slice %246 {offsets = [0, 64], sizes = [2, 32], strides = [1, 1]} : vector<2x96xf32> to vector<2x32xf32>
    %265 = arith.mulf %254, %264 : vector<2x32xf32>
    %266 = arith.addf %263, %265 : vector<2x32xf32>
    %267 = math.tanh %266 : vector<2x32xf32>
    %cst_55 = arith.constant 1.000000e+00 : f32
    %268 = vector.broadcast %cst_55 : f32 to vector<2x32xf32>
    %269 = arith.subf %268, %262 : vector<2x32xf32>
    %270 = arith.mulf %269, %267 : vector<2x32xf32>
    %271 = arith.mulf %262, %210 : vector<2x32xf32>
    %272 = arith.addf %270, %271 : vector<2x32xf32>
    %c6 = arith.constant 6 : index
    %c0_56 = arith.constant 0 : index
    %273 = vector.load %arg4[%c6, %c0_56] : memref<16x64xf32, #tpu.memory_space<vmem>>, vector<2x32xf32>
    tpu.vector_store %arg4[%c6, %c0_56], %242 {strides = array<i32>} : memref<16x64xf32, #tpu.memory_space<vmem>>, vector<2x32xf32>,
    %c8 = arith.constant 8 : index
    %c32_57 = arith.constant 32 : index
    %274 = vector.load %arg4[%c8, %c32_57] : memref<16x64xf32, #tpu.memory_space<vmem>>, vector<2x32xf32>
    tpu.vector_store %arg4[%c8, %c32_57], %272 {strides = array<i32>} : memref<16x64xf32, #tpu.memory_space<vmem>>, vector<2x32xf32>,
    %275 = vector.extract_strided_slice %20 {offsets = [8, 0], sizes = [2, 96], strides = [1, 1]} : vector<16x96xf32> to vector<2x96xf32>
    %cst_58 = arith.constant dense<0.000000e+00> : vector<2x96xf32>
    %276 = tpu.matmul %242, %0, %cst_58 {dimension_numbers = #tpu.dot_dimension_numbers<[1], [0], [0], [1], [0, 0, 1, 1], [], []>} : vector<2x32xf32>, vector<32x96xf32>, vector<2x96xf32> -> vector<2x96xf32>
    %277 = vector.broadcast %9 : vector<1x96xf32> to vector<2x96xf32>
    %278 = arith.addf %276, %277 : vector<2x96xf32>
    %279 = vector.extract_strided_slice %275 {offsets = [0, 0], sizes = [2, 32], strides = [1, 1]} : vector<2x96xf32> to vector<2x32xf32>
    %280 = vector.extract_strided_slice %278 {offsets = [0, 0], sizes = [2, 32], strides = [1, 1]} : vector<2x96xf32> to vector<2x32xf32>
    %281 = arith.addf %279, %280 : vector<2x32xf32>
    %282 = arith.negf %281 : vector<2x32xf32>
    %283 = math.exp %282 : vector<2x32xf32>
    %cst_59 = arith.constant 1.000000e+00 : f32
    %284 = vector.broadcast %cst_59 : f32 to vector<2x32xf32>
    %285 = arith.addf %284, %283 : vector<2x32xf32>
    %286 = arith.divf %284, %285 : vector<2x32xf32>
    %287 = vector.extract_strided_slice %275 {offsets = [0, 32], sizes = [2, 32], strides = [1, 1]} : vector<2x96xf32> to vector<2x32xf32>
    %288 = vector.extract_strided_slice %278 {offsets = [0, 32], sizes = [2, 32], strides = [1, 1]} : vector<2x96xf32> to vector<2x32xf32>
    %289 = arith.addf %287, %288 : vector<2x32xf32>
    %290 = arith.negf %289 : vector<2x32xf32>
    %291 = math.exp %290 : vector<2x32xf32>
    %cst_60 = arith.constant 1.000000e+00 : f32
    %292 = vector.broadcast %cst_60 : f32 to vector<2x32xf32>
    %293 = arith.addf %292, %291 : vector<2x32xf32>
    %294 = arith.divf %292, %293 : vector<2x32xf32>
    %295 = vector.extract_strided_slice %275 {offsets = [0, 64], sizes = [2, 32], strides = [1, 1]} : vector<2x96xf32> to vector<2x32xf32>
    %296 = vector.extract_strided_slice %278 {offsets = [0, 64], sizes = [2, 32], strides = [1, 1]} : vector<2x96xf32> to vector<2x32xf32>
    %297 = arith.mulf %286, %296 : vector<2x32xf32>
    %298 = arith.addf %295, %297 : vector<2x32xf32>
    %299 = math.tanh %298 : vector<2x32xf32>
    %cst_61 = arith.constant 1.000000e+00 : f32
    %300 = vector.broadcast %cst_61 : f32 to vector<2x32xf32>
    %301 = arith.subf %300, %294 : vector<2x32xf32>
    %302 = arith.mulf %301, %299 : vector<2x32xf32>
    %303 = arith.mulf %294, %242 : vector<2x32xf32>
    %304 = arith.addf %302, %303 : vector<2x32xf32>
    %305 = vector.extract_strided_slice %25 {offsets = [6, 0], sizes = [2, 96], strides = [1, 1]} : vector<16x96xf32> to vector<2x96xf32>
    %cst_62 = arith.constant dense<0.000000e+00> : vector<2x96xf32>
    %306 = tpu.matmul %272, %1, %cst_62 {dimension_numbers = #tpu.dot_dimension_numbers<[1], [0], [0], [1], [0, 0, 1, 1], [], []>} : vector<2x32xf32>, vector<32x96xf32>, vector<2x96xf32> -> vector<2x96xf32>
    %307 = vector.broadcast %10 : vector<1x96xf32> to vector<2x96xf32>
    %308 = arith.addf %306, %307 : vector<2x96xf32>
    %309 = vector.extract_strided_slice %305 {offsets = [0, 0], sizes = [2, 32], strides = [1, 1]} : vector<2x96xf32> to vector<2x32xf32>
    %310 = vector.extract_strided_slice %308 {offsets = [0, 0], sizes = [2, 32], strides = [1, 1]} : vector<2x96xf32> to vector<2x32xf32>
    %311 = arith.addf %309, %310 : vector<2x32xf32>
    %312 = arith.negf %311 : vector<2x32xf32>
    %313 = math.exp %312 : vector<2x32xf32>
    %cst_63 = arith.constant 1.000000e+00 : f32
    %314 = vector.broadcast %cst_63 : f32 to vector<2x32xf32>
    %315 = arith.addf %314, %313 : vector<2x32xf32>
    %316 = arith.divf %314, %315 : vector<2x32xf32>
    %317 = vector.extract_strided_slice %305 {offsets = [0, 32], sizes = [2, 32], strides = [1, 1]} : vector<2x96xf32> to vector<2x32xf32>
    %318 = vector.extract_strided_slice %308 {offsets = [0, 32], sizes = [2, 32], strides = [1, 1]} : vector<2x96xf32> to vector<2x32xf32>
    %319 = arith.addf %317, %318 : vector<2x32xf32>
    %320 = arith.negf %319 : vector<2x32xf32>
    %321 = math.exp %320 : vector<2x32xf32>
    %cst_64 = arith.constant 1.000000e+00 : f32
    %322 = vector.broadcast %cst_64 : f32 to vector<2x32xf32>
    %323 = arith.addf %322, %321 : vector<2x32xf32>
    %324 = arith.divf %322, %323 : vector<2x32xf32>
    %325 = vector.extract_strided_slice %305 {offsets = [0, 64], sizes = [2, 32], strides = [1, 1]} : vector<2x96xf32> to vector<2x32xf32>
    %326 = vector.extract_strided_slice %308 {offsets = [0, 64], sizes = [2, 32], strides = [1, 1]} : vector<2x96xf32> to vector<2x32xf32>
    %327 = arith.mulf %316, %326 : vector<2x32xf32>
    %328 = arith.addf %325, %327 : vector<2x32xf32>
    %329 = math.tanh %328 : vector<2x32xf32>
    %cst_65 = arith.constant 1.000000e+00 : f32
    %330 = vector.broadcast %cst_65 : f32 to vector<2x32xf32>
    %331 = arith.subf %330, %324 : vector<2x32xf32>
    %332 = arith.mulf %331, %329 : vector<2x32xf32>
    %333 = arith.mulf %324, %272 : vector<2x32xf32>
    %334 = arith.addf %332, %333 : vector<2x32xf32>
    %c8_66 = arith.constant 8 : index
    %c0_67 = arith.constant 0 : index
    %335 = vector.load %arg4[%c8_66, %c0_67] : memref<16x64xf32, #tpu.memory_space<vmem>>, vector<2x32xf32>
    tpu.vector_store %arg4[%c8_66, %c0_67], %304 {strides = array<i32>} : memref<16x64xf32, #tpu.memory_space<vmem>>, vector<2x32xf32>,
    %c6_68 = arith.constant 6 : index
    %c32_69 = arith.constant 32 : index
    %336 = vector.load %arg4[%c6_68, %c32_69] : memref<16x64xf32, #tpu.memory_space<vmem>>, vector<2x32xf32>
    tpu.vector_store %arg4[%c6_68, %c32_69], %334 {strides = array<i32>} : memref<16x64xf32, #tpu.memory_space<vmem>>, vector<2x32xf32>,
    %337 = vector.extract_strided_slice %20 {offsets = [10, 0], sizes = [2, 96], strides = [1, 1]} : vector<16x96xf32> to vector<2x96xf32>
    %cst_70 = arith.constant dense<0.000000e+00> : vector<2x96xf32>
    %338 = tpu.matmul %304, %0, %cst_70 {dimension_numbers = #tpu.dot_dimension_numbers<[1], [0], [0], [1], [0, 0, 1, 1], [], []>} : vector<2x32xf32>, vector<32x96xf32>, vector<2x96xf32> -> vector<2x96xf32>
    %339 = vector.broadcast %9 : vector<1x96xf32> to vector<2x96xf32>
    %340 = arith.addf %338, %339 : vector<2x96xf32>
    %341 = vector.extract_strided_slice %337 {offsets = [0, 0], sizes = [2, 32], strides = [1, 1]} : vector<2x96xf32> to vector<2x32xf32>
    %342 = vector.extract_strided_slice %340 {offsets = [0, 0], sizes = [2, 32], strides = [1, 1]} : vector<2x96xf32> to vector<2x32xf32>
    %343 = arith.addf %341, %342 : vector<2x32xf32>
    %344 = arith.negf %343 : vector<2x32xf32>
    %345 = math.exp %344 : vector<2x32xf32>
    %cst_71 = arith.constant 1.000000e+00 : f32
    %346 = vector.broadcast %cst_71 : f32 to vector<2x32xf32>
    %347 = arith.addf %346, %345 : vector<2x32xf32>
    %348 = arith.divf %346, %347 : vector<2x32xf32>
    %349 = vector.extract_strided_slice %337 {offsets = [0, 32], sizes = [2, 32], strides = [1, 1]} : vector<2x96xf32> to vector<2x32xf32>
    %350 = vector.extract_strided_slice %340 {offsets = [0, 32], sizes = [2, 32], strides = [1, 1]} : vector<2x96xf32> to vector<2x32xf32>
    %351 = arith.addf %349, %350 : vector<2x32xf32>
    %352 = arith.negf %351 : vector<2x32xf32>
    %353 = math.exp %352 : vector<2x32xf32>
    %cst_72 = arith.constant 1.000000e+00 : f32
    %354 = vector.broadcast %cst_72 : f32 to vector<2x32xf32>
    %355 = arith.addf %354, %353 : vector<2x32xf32>
    %356 = arith.divf %354, %355 : vector<2x32xf32>
    %357 = vector.extract_strided_slice %337 {offsets = [0, 64], sizes = [2, 32], strides = [1, 1]} : vector<2x96xf32> to vector<2x32xf32>
    %358 = vector.extract_strided_slice %340 {offsets = [0, 64], sizes = [2, 32], strides = [1, 1]} : vector<2x96xf32> to vector<2x32xf32>
    %359 = arith.mulf %348, %358 : vector<2x32xf32>
    %360 = arith.addf %357, %359 : vector<2x32xf32>
    %361 = math.tanh %360 : vector<2x32xf32>
    %cst_73 = arith.constant 1.000000e+00 : f32
    %362 = vector.broadcast %cst_73 : f32 to vector<2x32xf32>
    %363 = arith.subf %362, %356 : vector<2x32xf32>
    %364 = arith.mulf %363, %361 : vector<2x32xf32>
    %365 = arith.mulf %356, %304 : vector<2x32xf32>
    %366 = arith.addf %364, %365 : vector<2x32xf32>
    %367 = vector.extract_strided_slice %25 {offsets = [4, 0], sizes = [2, 96], strides = [1, 1]} : vector<16x96xf32> to vector<2x96xf32>
    %cst_74 = arith.constant dense<0.000000e+00> : vector<2x96xf32>
    %368 = tpu.matmul %334, %1, %cst_74 {dimension_numbers = #tpu.dot_dimension_numbers<[1], [0], [0], [1], [0, 0, 1, 1], [], []>} : vector<2x32xf32>, vector<32x96xf32>, vector<2x96xf32> -> vector<2x96xf32>
    %369 = vector.broadcast %10 : vector<1x96xf32> to vector<2x96xf32>
    %370 = arith.addf %368, %369 : vector<2x96xf32>
    %371 = vector.extract_strided_slice %367 {offsets = [0, 0], sizes = [2, 32], strides = [1, 1]} : vector<2x96xf32> to vector<2x32xf32>
    %372 = vector.extract_strided_slice %370 {offsets = [0, 0], sizes = [2, 32], strides = [1, 1]} : vector<2x96xf32> to vector<2x32xf32>
    %373 = arith.addf %371, %372 : vector<2x32xf32>
    %374 = arith.negf %373 : vector<2x32xf32>
    %375 = math.exp %374 : vector<2x32xf32>
    %cst_75 = arith.constant 1.000000e+00 : f32
    %376 = vector.broadcast %cst_75 : f32 to vector<2x32xf32>
    %377 = arith.addf %376, %375 : vector<2x32xf32>
    %378 = arith.divf %376, %377 : vector<2x32xf32>
    %379 = vector.extract_strided_slice %367 {offsets = [0, 32], sizes = [2, 32], strides = [1, 1]} : vector<2x96xf32> to vector<2x32xf32>
    %380 = vector.extract_strided_slice %370 {offsets = [0, 32], sizes = [2, 32], strides = [1, 1]} : vector<2x96xf32> to vector<2x32xf32>
    %381 = arith.addf %379, %380 : vector<2x32xf32>
    %382 = arith.negf %381 : vector<2x32xf32>
    %383 = math.exp %382 : vector<2x32xf32>
    %cst_76 = arith.constant 1.000000e+00 : f32
    %384 = vector.broadcast %cst_76 : f32 to vector<2x32xf32>
    %385 = arith.addf %384, %383 : vector<2x32xf32>
    %386 = arith.divf %384, %385 : vector<2x32xf32>
    %387 = vector.extract_strided_slice %367 {offsets = [0, 64], sizes = [2, 32], strides = [1, 1]} : vector<2x96xf32> to vector<2x32xf32>
    %388 = vector.extract_strided_slice %370 {offsets = [0, 64], sizes = [2, 32], strides = [1, 1]} : vector<2x96xf32> to vector<2x32xf32>
    %389 = arith.mulf %378, %388 : vector<2x32xf32>
    %390 = arith.addf %387, %389 : vector<2x32xf32>
    %391 = math.tanh %390 : vector<2x32xf32>
    %cst_77 = arith.constant 1.000000e+00 : f32
    %392 = vector.broadcast %cst_77 : f32 to vector<2x32xf32>
    %393 = arith.subf %392, %386 : vector<2x32xf32>
    %394 = arith.mulf %393, %391 : vector<2x32xf32>
    %395 = arith.mulf %386, %334 : vector<2x32xf32>
    %396 = arith.addf %394, %395 : vector<2x32xf32>
    %c10_78 = arith.constant 10 : index
    %c0_79 = arith.constant 0 : index
    %397 = vector.load %arg4[%c10_78, %c0_79] : memref<16x64xf32, #tpu.memory_space<vmem>>, vector<2x32xf32>
    tpu.vector_store %arg4[%c10_78, %c0_79], %366 {strides = array<i32>} : memref<16x64xf32, #tpu.memory_space<vmem>>, vector<2x32xf32>,
    %c4_80 = arith.constant 4 : index
    %c32_81 = arith.constant 32 : index
    %398 = vector.load %arg4[%c4_80, %c32_81] : memref<16x64xf32, #tpu.memory_space<vmem>>, vector<2x32xf32>
    tpu.vector_store %arg4[%c4_80, %c32_81], %396 {strides = array<i32>} : memref<16x64xf32, #tpu.memory_space<vmem>>, vector<2x32xf32>,
    %399 = vector.extract_strided_slice %20 {offsets = [12, 0], sizes = [2, 96], strides = [1, 1]} : vector<16x96xf32> to vector<2x96xf32>
    %cst_82 = arith.constant dense<0.000000e+00> : vector<2x96xf32>
    %400 = tpu.matmul %366, %0, %cst_82 {dimension_numbers = #tpu.dot_dimension_numbers<[1], [0], [0], [1], [0, 0, 1, 1], [], []>} : vector<2x32xf32>, vector<32x96xf32>, vector<2x96xf32> -> vector<2x96xf32>
    %401 = vector.broadcast %9 : vector<1x96xf32> to vector<2x96xf32>
    %402 = arith.addf %400, %401 : vector<2x96xf32>
    %403 = vector.extract_strided_slice %399 {offsets = [0, 0], sizes = [2, 32], strides = [1, 1]} : vector<2x96xf32> to vector<2x32xf32>
    %404 = vector.extract_strided_slice %402 {offsets = [0, 0], sizes = [2, 32], strides = [1, 1]} : vector<2x96xf32> to vector<2x32xf32>
    %405 = arith.addf %403, %404 : vector<2x32xf32>
    %406 = arith.negf %405 : vector<2x32xf32>
    %407 = math.exp %406 : vector<2x32xf32>
    %cst_83 = arith.constant 1.000000e+00 : f32
    %408 = vector.broadcast %cst_83 : f32 to vector<2x32xf32>
    %409 = arith.addf %408, %407 : vector<2x32xf32>
    %410 = arith.divf %408, %409 : vector<2x32xf32>
    %411 = vector.extract_strided_slice %399 {offsets = [0, 32], sizes = [2, 32], strides = [1, 1]} : vector<2x96xf32> to vector<2x32xf32>
    %412 = vector.extract_strided_slice %402 {offsets = [0, 32], sizes = [2, 32], strides = [1, 1]} : vector<2x96xf32> to vector<2x32xf32>
    %413 = arith.addf %411, %412 : vector<2x32xf32>
    %414 = arith.negf %413 : vector<2x32xf32>
    %415 = math.exp %414 : vector<2x32xf32>
    %cst_84 = arith.constant 1.000000e+00 : f32
    %416 = vector.broadcast %cst_84 : f32 to vector<2x32xf32>
    %417 = arith.addf %416, %415 : vector<2x32xf32>
    %418 = arith.divf %416, %417 : vector<2x32xf32>
    %419 = vector.extract_strided_slice %399 {offsets = [0, 64], sizes = [2, 32], strides = [1, 1]} : vector<2x96xf32> to vector<2x32xf32>
    %420 = vector.extract_strided_slice %402 {offsets = [0, 64], sizes = [2, 32], strides = [1, 1]} : vector<2x96xf32> to vector<2x32xf32>
    %421 = arith.mulf %410, %420 : vector<2x32xf32>
    %422 = arith.addf %419, %421 : vector<2x32xf32>
    %423 = math.tanh %422 : vector<2x32xf32>
    %cst_85 = arith.constant 1.000000e+00 : f32
    %424 = vector.broadcast %cst_85 : f32 to vector<2x32xf32>
    %425 = arith.subf %424, %418 : vector<2x32xf32>
    %426 = arith.mulf %425, %423 : vector<2x32xf32>
    %427 = arith.mulf %418, %366 : vector<2x32xf32>
    %428 = arith.addf %426, %427 : vector<2x32xf32>
    %429 = vector.extract_strided_slice %25 {offsets = [2, 0], sizes = [2, 96], strides = [1, 1]} : vector<16x96xf32> to vector<2x96xf32>
    %cst_86 = arith.constant dense<0.000000e+00> : vector<2x96xf32>
    %430 = tpu.matmul %396, %1, %cst_86 {dimension_numbers = #tpu.dot_dimension_numbers<[1], [0], [0], [1], [0, 0, 1, 1], [], []>} : vector<2x32xf32>, vector<32x96xf32>, vector<2x96xf32> -> vector<2x96xf32>
    %431 = vector.broadcast %10 : vector<1x96xf32> to vector<2x96xf32>
    %432 = arith.addf %430, %431 : vector<2x96xf32>
    %433 = vector.extract_strided_slice %429 {offsets = [0, 0], sizes = [2, 32], strides = [1, 1]} : vector<2x96xf32> to vector<2x32xf32>
    %434 = vector.extract_strided_slice %432 {offsets = [0, 0], sizes = [2, 32], strides = [1, 1]} : vector<2x96xf32> to vector<2x32xf32>
    %435 = arith.addf %433, %434 : vector<2x32xf32>
    %436 = arith.negf %435 : vector<2x32xf32>
    %437 = math.exp %436 : vector<2x32xf32>
    %cst_87 = arith.constant 1.000000e+00 : f32
    %438 = vector.broadcast %cst_87 : f32 to vector<2x32xf32>
    %439 = arith.addf %438, %437 : vector<2x32xf32>
    %440 = arith.divf %438, %439 : vector<2x32xf32>
    %441 = vector.extract_strided_slice %429 {offsets = [0, 32], sizes = [2, 32], strides = [1, 1]} : vector<2x96xf32> to vector<2x32xf32>
    %442 = vector.extract_strided_slice %432 {offsets = [0, 32], sizes = [2, 32], strides = [1, 1]} : vector<2x96xf32> to vector<2x32xf32>
    %443 = arith.addf %441, %442 : vector<2x32xf32>
    %444 = arith.negf %443 : vector<2x32xf32>
    %445 = math.exp %444 : vector<2x32xf32>
    %cst_88 = arith.constant 1.000000e+00 : f32
    %446 = vector.broadcast %cst_88 : f32 to vector<2x32xf32>
    %447 = arith.addf %446, %445 : vector<2x32xf32>
    %448 = arith.divf %446, %447 : vector<2x32xf32>
    %449 = vector.extract_strided_slice %429 {offsets = [0, 64], sizes = [2, 32], strides = [1, 1]} : vector<2x96xf32> to vector<2x32xf32>
    %450 = vector.extract_strided_slice %432 {offsets = [0, 64], sizes = [2, 32], strides = [1, 1]} : vector<2x96xf32> to vector<2x32xf32>
    %451 = arith.mulf %440, %450 : vector<2x32xf32>
    %452 = arith.addf %449, %451 : vector<2x32xf32>
    %453 = math.tanh %452 : vector<2x32xf32>
    %cst_89 = arith.constant 1.000000e+00 : f32
    %454 = vector.broadcast %cst_89 : f32 to vector<2x32xf32>
    %455 = arith.subf %454, %448 : vector<2x32xf32>
    %456 = arith.mulf %455, %453 : vector<2x32xf32>
    %457 = arith.mulf %448, %396 : vector<2x32xf32>
    %458 = arith.addf %456, %457 : vector<2x32xf32>
    %c12_90 = arith.constant 12 : index
    %c0_91 = arith.constant 0 : index
    %459 = vector.load %arg4[%c12_90, %c0_91] : memref<16x64xf32, #tpu.memory_space<vmem>>, vector<2x32xf32>
    tpu.vector_store %arg4[%c12_90, %c0_91], %428 {strides = array<i32>} : memref<16x64xf32, #tpu.memory_space<vmem>>, vector<2x32xf32>,
    %c2_92 = arith.constant 2 : index
    %c32_93 = arith.constant 32 : index
    %460 = vector.load %arg4[%c2_92, %c32_93] : memref<16x64xf32, #tpu.memory_space<vmem>>, vector<2x32xf32>
    tpu.vector_store %arg4[%c2_92, %c32_93], %458 {strides = array<i32>} : memref<16x64xf32, #tpu.memory_space<vmem>>, vector<2x32xf32>,
    %461 = vector.extract_strided_slice %20 {offsets = [14, 0], sizes = [2, 96], strides = [1, 1]} : vector<16x96xf32> to vector<2x96xf32>
    %cst_94 = arith.constant dense<0.000000e+00> : vector<2x96xf32>
    %462 = tpu.matmul %428, %0, %cst_94 {dimension_numbers = #tpu.dot_dimension_numbers<[1], [0], [0], [1], [0, 0, 1, 1], [], []>} : vector<2x32xf32>, vector<32x96xf32>, vector<2x96xf32> -> vector<2x96xf32>
    %463 = vector.broadcast %9 : vector<1x96xf32> to vector<2x96xf32>
    %464 = arith.addf %462, %463 : vector<2x96xf32>
    %465 = vector.extract_strided_slice %461 {offsets = [0, 0], sizes = [2, 32], strides = [1, 1]} : vector<2x96xf32> to vector<2x32xf32>
    %466 = vector.extract_strided_slice %464 {offsets = [0, 0], sizes = [2, 32], strides = [1, 1]} : vector<2x96xf32> to vector<2x32xf32>
    %467 = arith.addf %465, %466 : vector<2x32xf32>
    %468 = arith.negf %467 : vector<2x32xf32>
    %469 = math.exp %468 : vector<2x32xf32>
    %cst_95 = arith.constant 1.000000e+00 : f32
    %470 = vector.broadcast %cst_95 : f32 to vector<2x32xf32>
    %471 = arith.addf %470, %469 : vector<2x32xf32>
    %472 = arith.divf %470, %471 : vector<2x32xf32>
    %473 = vector.extract_strided_slice %461 {offsets = [0, 32], sizes = [2, 32], strides = [1, 1]} : vector<2x96xf32> to vector<2x32xf32>
    %474 = vector.extract_strided_slice %464 {offsets = [0, 32], sizes = [2, 32], strides = [1, 1]} : vector<2x96xf32> to vector<2x32xf32>
    %475 = arith.addf %473, %474 : vector<2x32xf32>
    %476 = arith.negf %475 : vector<2x32xf32>
    %477 = math.exp %476 : vector<2x32xf32>
    %cst_96 = arith.constant 1.000000e+00 : f32
    %478 = vector.broadcast %cst_96 : f32 to vector<2x32xf32>
    %479 = arith.addf %478, %477 : vector<2x32xf32>
    %480 = arith.divf %478, %479 : vector<2x32xf32>
    %481 = vector.extract_strided_slice %461 {offsets = [0, 64], sizes = [2, 32], strides = [1, 1]} : vector<2x96xf32> to vector<2x32xf32>
    %482 = vector.extract_strided_slice %464 {offsets = [0, 64], sizes = [2, 32], strides = [1, 1]} : vector<2x96xf32> to vector<2x32xf32>
    %483 = arith.mulf %472, %482 : vector<2x32xf32>
    %484 = arith.addf %481, %483 : vector<2x32xf32>
    %485 = math.tanh %484 : vector<2x32xf32>
    %cst_97 = arith.constant 1.000000e+00 : f32
    %486 = vector.broadcast %cst_97 : f32 to vector<2x32xf32>
    %487 = arith.subf %486, %480 : vector<2x32xf32>
    %488 = arith.mulf %487, %485 : vector<2x32xf32>
    %489 = arith.mulf %480, %428 : vector<2x32xf32>
    %490 = arith.addf %488, %489 : vector<2x32xf32>
    %491 = vector.extract_strided_slice %25 {offsets = [0, 0], sizes = [2, 96], strides = [1, 1]} : vector<16x96xf32> to vector<2x96xf32>
    %cst_98 = arith.constant dense<0.000000e+00> : vector<2x96xf32>
    %492 = tpu.matmul %458, %1, %cst_98 {dimension_numbers = #tpu.dot_dimension_numbers<[1], [0], [0], [1], [0, 0, 1, 1], [], []>} : vector<2x32xf32>, vector<32x96xf32>, vector<2x96xf32> -> vector<2x96xf32>
    %493 = vector.broadcast %10 : vector<1x96xf32> to vector<2x96xf32>
    %494 = arith.addf %492, %493 : vector<2x96xf32>
    %495 = vector.extract_strided_slice %491 {offsets = [0, 0], sizes = [2, 32], strides = [1, 1]} : vector<2x96xf32> to vector<2x32xf32>
    %496 = vector.extract_strided_slice %494 {offsets = [0, 0], sizes = [2, 32], strides = [1, 1]} : vector<2x96xf32> to vector<2x32xf32>
    %497 = arith.addf %495, %496 : vector<2x32xf32>
    %498 = arith.negf %497 : vector<2x32xf32>
    %499 = math.exp %498 : vector<2x32xf32>
    %cst_99 = arith.constant 1.000000e+00 : f32
    %500 = vector.broadcast %cst_99 : f32 to vector<2x32xf32>
    %501 = arith.addf %500, %499 : vector<2x32xf32>
    %502 = arith.divf %500, %501 : vector<2x32xf32>
    %503 = vector.extract_strided_slice %491 {offsets = [0, 32], sizes = [2, 32], strides = [1, 1]} : vector<2x96xf32> to vector<2x32xf32>
    %504 = vector.extract_strided_slice %494 {offsets = [0, 32], sizes = [2, 32], strides = [1, 1]} : vector<2x96xf32> to vector<2x32xf32>
    %505 = arith.addf %503, %504 : vector<2x32xf32>
    %506 = arith.negf %505 : vector<2x32xf32>
    %507 = math.exp %506 : vector<2x32xf32>
    %cst_100 = arith.constant 1.000000e+00 : f32
    %508 = vector.broadcast %cst_100 : f32 to vector<2x32xf32>
    %509 = arith.addf %508, %507 : vector<2x32xf32>
    %510 = arith.divf %508, %509 : vector<2x32xf32>
    %511 = vector.extract_strided_slice %491 {offsets = [0, 64], sizes = [2, 32], strides = [1, 1]} : vector<2x96xf32> to vector<2x32xf32>
    %512 = vector.extract_strided_slice %494 {offsets = [0, 64], sizes = [2, 32], strides = [1, 1]} : vector<2x96xf32> to vector<2x32xf32>
    %513 = arith.mulf %502, %512 : vector<2x32xf32>
    %514 = arith.addf %511, %513 : vector<2x32xf32>
    %515 = math.tanh %514 : vector<2x32xf32>
    %cst_101 = arith.constant 1.000000e+00 : f32
    %516 = vector.broadcast %cst_101 : f32 to vector<2x32xf32>
    %517 = arith.subf %516, %510 : vector<2x32xf32>
    %518 = arith.mulf %517, %515 : vector<2x32xf32>
    %519 = arith.mulf %510, %458 : vector<2x32xf32>
    %520 = arith.addf %518, %519 : vector<2x32xf32>
    %c14_102 = arith.constant 14 : index
    %c0_103 = arith.constant 0 : index
    %521 = vector.load %arg4[%c14_102, %c0_103] : memref<16x64xf32, #tpu.memory_space<vmem>>, vector<2x32xf32>
    tpu.vector_store %arg4[%c14_102, %c0_103], %490 {strides = array<i32>} : memref<16x64xf32, #tpu.memory_space<vmem>>, vector<2x32xf32>,
    %c0_104 = arith.constant 0 : index
    %c32_105 = arith.constant 32 : index
    %522 = vector.load %arg4[%c0_104, %c32_105] : memref<16x64xf32, #tpu.memory_space<vmem>>, vector<2x32xf32>
    tpu.vector_store %arg4[%c0_104, %c32_105], %520 {strides = array<i32>} : memref<16x64xf32, #tpu.memory_space<vmem>>, vector<2x32xf32>,
    %c0_106 = arith.constant 0 : index
    %c0_107 = arith.constant 0 : index
    %523 = vector.load %arg4[%c0_106, %c0_107] : memref<16x64xf32, #tpu.memory_space<vmem>>, vector<16x64xf32>
    %cst_108 = arith.constant dense<0.000000e+00> : vector<16x96xf32>
    %524 = tpu.matmul %523, %2, %cst_108 {dimension_numbers = #tpu.dot_dimension_numbers<[1], [0], [0], [1], [0, 0, 1, 1], [], []>} : vector<16x64xf32>, vector<64x96xf32>, vector<16x96xf32> -> vector<16x96xf32>
    %525 = vector.broadcast %11 : vector<1x96xf32> to vector<16x96xf32>
    %526 = arith.addf %524, %525 : vector<16x96xf32>
    %527 = vector.extract_strided_slice %526 {offsets = [0, 0], sizes = [2, 96], strides = [1, 1]} : vector<16x96xf32> to vector<2x96xf32>
    %cst_109 = arith.constant dense<0.000000e+00> : vector<2x96xf32>
    %528 = tpu.matmul %26, %3, %cst_109 {dimension_numbers = #tpu.dot_dimension_numbers<[1], [0], [0], [1], [0, 0, 1, 1], [], []>} : vector<2x32xf32>, vector<32x96xf32>, vector<2x96xf32> -> vector<2x96xf32>
    %529 = vector.broadcast %13 : vector<1x96xf32> to vector<2x96xf32>
    %530 = arith.addf %528, %529 : vector<2x96xf32>
    %531 = vector.extract_strided_slice %527 {offsets = [0, 0], sizes = [2, 32], strides = [1, 1]} : vector<2x96xf32> to vector<2x32xf32>
    %532 = vector.extract_strided_slice %530 {offsets = [0, 0], sizes = [2, 32], strides = [1, 1]} : vector<2x96xf32> to vector<2x32xf32>
    %533 = arith.addf %531, %532 : vector<2x32xf32>
    %534 = arith.negf %533 : vector<2x32xf32>
    %535 = math.exp %534 : vector<2x32xf32>
    %cst_110 = arith.constant 1.000000e+00 : f32
    %536 = vector.broadcast %cst_110 : f32 to vector<2x32xf32>
    %537 = arith.addf %536, %535 : vector<2x32xf32>
    %538 = arith.divf %536, %537 : vector<2x32xf32>
    %539 = vector.extract_strided_slice %527 {offsets = [0, 32], sizes = [2, 32], strides = [1, 1]} : vector<2x96xf32> to vector<2x32xf32>
    %540 = vector.extract_strided_slice %530 {offsets = [0, 32], sizes = [2, 32], strides = [1, 1]} : vector<2x96xf32> to vector<2x32xf32>
    %541 = arith.addf %539, %540 : vector<2x32xf32>
    %542 = arith.negf %541 : vector<2x32xf32>
    %543 = math.exp %542 : vector<2x32xf32>
    %cst_111 = arith.constant 1.000000e+00 : f32
    %544 = vector.broadcast %cst_111 : f32 to vector<2x32xf32>
    %545 = arith.addf %544, %543 : vector<2x32xf32>
    %546 = arith.divf %544, %545 : vector<2x32xf32>
    %547 = vector.extract_strided_slice %527 {offsets = [0, 64], sizes = [2, 32], strides = [1, 1]} : vector<2x96xf32> to vector<2x32xf32>
    %548 = vector.extract_strided_slice %530 {offsets = [0, 64], sizes = [2, 32], strides = [1, 1]} : vector<2x96xf32> to vector<2x32xf32>
    %549 = arith.mulf %538, %548 : vector<2x32xf32>
    %550 = arith.addf %547, %549 : vector<2x32xf32>
    %551 = math.tanh %550 : vector<2x32xf32>
    %cst_112 = arith.constant 1.000000e+00 : f32
    %552 = vector.broadcast %cst_112 : f32 to vector<2x32xf32>
    %553 = arith.subf %552, %546 : vector<2x32xf32>
    %554 = arith.mulf %553, %551 : vector<2x32xf32>
    %555 = arith.mulf %546, %26 : vector<2x32xf32>
    %556 = arith.addf %554, %555 : vector<2x32xf32>
    %557 = vector.extract_strided_slice %526 {offsets = [2, 0], sizes = [2, 96], strides = [1, 1]} : vector<16x96xf32> to vector<2x96xf32>
    %cst_113 = arith.constant dense<0.000000e+00> : vector<2x96xf32>
    %558 = tpu.matmul %556, %3, %cst_113 {dimension_numbers = #tpu.dot_dimension_numbers<[1], [0], [0], [1], [0, 0, 1, 1], [], []>} : vector<2x32xf32>, vector<32x96xf32>, vector<2x96xf32> -> vector<2x96xf32>
    %559 = vector.broadcast %13 : vector<1x96xf32> to vector<2x96xf32>
    %560 = arith.addf %558, %559 : vector<2x96xf32>
    %561 = vector.extract_strided_slice %557 {offsets = [0, 0], sizes = [2, 32], strides = [1, 1]} : vector<2x96xf32> to vector<2x32xf32>
    %562 = vector.extract_strided_slice %560 {offsets = [0, 0], sizes = [2, 32], strides = [1, 1]} : vector<2x96xf32> to vector<2x32xf32>
    %563 = arith.addf %561, %562 : vector<2x32xf32>
    %564 = arith.negf %563 : vector<2x32xf32>
    %565 = math.exp %564 : vector<2x32xf32>
    %cst_114 = arith.constant 1.000000e+00 : f32
    %566 = vector.broadcast %cst_114 : f32 to vector<2x32xf32>
    %567 = arith.addf %566, %565 : vector<2x32xf32>
    %568 = arith.divf %566, %567 : vector<2x32xf32>
    %569 = vector.extract_strided_slice %557 {offsets = [0, 32], sizes = [2, 32], strides = [1, 1]} : vector<2x96xf32> to vector<2x32xf32>
    %570 = vector.extract_strided_slice %560 {offsets = [0, 32], sizes = [2, 32], strides = [1, 1]} : vector<2x96xf32> to vector<2x32xf32>
    %571 = arith.addf %569, %570 : vector<2x32xf32>
    %572 = arith.negf %571 : vector<2x32xf32>
    %573 = math.exp %572 : vector<2x32xf32>
    %cst_115 = arith.constant 1.000000e+00 : f32
    %574 = vector.broadcast %cst_115 : f32 to vector<2x32xf32>
    %575 = arith.addf %574, %573 : vector<2x32xf32>
    %576 = arith.divf %574, %575 : vector<2x32xf32>
    %577 = vector.extract_strided_slice %557 {offsets = [0, 64], sizes = [2, 32], strides = [1, 1]} : vector<2x96xf32> to vector<2x32xf32>
    %578 = vector.extract_strided_slice %560 {offsets = [0, 64], sizes = [2, 32], strides = [1, 1]} : vector<2x96xf32> to vector<2x32xf32>
    %579 = arith.mulf %568, %578 : vector<2x32xf32>
    %580 = arith.addf %577, %579 : vector<2x32xf32>
    %581 = math.tanh %580 : vector<2x32xf32>
    %cst_116 = arith.constant 1.000000e+00 : f32
    %582 = vector.broadcast %cst_116 : f32 to vector<2x32xf32>
    %583 = arith.subf %582, %576 : vector<2x32xf32>
    %584 = arith.mulf %583, %581 : vector<2x32xf32>
    %585 = arith.mulf %576, %556 : vector<2x32xf32>
    %586 = arith.addf %584, %585 : vector<2x32xf32>
    %587 = vector.extract_strided_slice %526 {offsets = [4, 0], sizes = [2, 96], strides = [1, 1]} : vector<16x96xf32> to vector<2x96xf32>
    %cst_117 = arith.constant dense<0.000000e+00> : vector<2x96xf32>
    %588 = tpu.matmul %586, %3, %cst_117 {dimension_numbers = #tpu.dot_dimension_numbers<[1], [0], [0], [1], [0, 0, 1, 1], [], []>} : vector<2x32xf32>, vector<32x96xf32>, vector<2x96xf32> -> vector<2x96xf32>
    %589 = vector.broadcast %13 : vector<1x96xf32> to vector<2x96xf32>
    %590 = arith.addf %588, %589 : vector<2x96xf32>
    %591 = vector.extract_strided_slice %587 {offsets = [0, 0], sizes = [2, 32], strides = [1, 1]} : vector<2x96xf32> to vector<2x32xf32>
    %592 = vector.extract_strided_slice %590 {offsets = [0, 0], sizes = [2, 32], strides = [1, 1]} : vector<2x96xf32> to vector<2x32xf32>
    %593 = arith.addf %591, %592 : vector<2x32xf32>
    %594 = arith.negf %593 : vector<2x32xf32>
    %595 = math.exp %594 : vector<2x32xf32>
    %cst_118 = arith.constant 1.000000e+00 : f32
    %596 = vector.broadcast %cst_118 : f32 to vector<2x32xf32>
    %597 = arith.addf %596, %595 : vector<2x32xf32>
    %598 = arith.divf %596, %597 : vector<2x32xf32>
    %599 = vector.extract_strided_slice %587 {offsets = [0, 32], sizes = [2, 32], strides = [1, 1]} : vector<2x96xf32> to vector<2x32xf32>
    %600 = vector.extract_strided_slice %590 {offsets = [0, 32], sizes = [2, 32], strides = [1, 1]} : vector<2x96xf32> to vector<2x32xf32>
    %601 = arith.addf %599, %600 : vector<2x32xf32>
    %602 = arith.negf %601 : vector<2x32xf32>
    %603 = math.exp %602 : vector<2x32xf32>
    %cst_119 = arith.constant 1.000000e+00 : f32
    %604 = vector.broadcast %cst_119 : f32 to vector<2x32xf32>
    %605 = arith.addf %604, %603 : vector<2x32xf32>
    %606 = arith.divf %604, %605 : vector<2x32xf32>
    %607 = vector.extract_strided_slice %587 {offsets = [0, 64], sizes = [2, 32], strides = [1, 1]} : vector<2x96xf32> to vector<2x32xf32>
    %608 = vector.extract_strided_slice %590 {offsets = [0, 64], sizes = [2, 32], strides = [1, 1]} : vector<2x96xf32> to vector<2x32xf32>
    %609 = arith.mulf %598, %608 : vector<2x32xf32>
    %610 = arith.addf %607, %609 : vector<2x32xf32>
    %611 = math.tanh %610 : vector<2x32xf32>
    %cst_120 = arith.constant 1.000000e+00 : f32
    %612 = vector.broadcast %cst_120 : f32 to vector<2x32xf32>
    %613 = arith.subf %612, %606 : vector<2x32xf32>
    %614 = arith.mulf %613, %611 : vector<2x32xf32>
    %615 = arith.mulf %606, %586 : vector<2x32xf32>
    %616 = arith.addf %614, %615 : vector<2x32xf32>
    %617 = vector.extract_strided_slice %526 {offsets = [6, 0], sizes = [2, 96], strides = [1, 1]} : vector<16x96xf32> to vector<2x96xf32>
    %cst_121 = arith.constant dense<0.000000e+00> : vector<2x96xf32>
    %618 = tpu.matmul %616, %3, %cst_121 {dimension_numbers = #tpu.dot_dimension_numbers<[1], [0], [0], [1], [0, 0, 1, 1], [], []>} : vector<2x32xf32>, vector<32x96xf32>, vector<2x96xf32> -> vector<2x96xf32>
    %619 = vector.broadcast %13 : vector<1x96xf32> to vector<2x96xf32>
    %620 = arith.addf %618, %619 : vector<2x96xf32>
    %621 = vector.extract_strided_slice %617 {offsets = [0, 0], sizes = [2, 32], strides = [1, 1]} : vector<2x96xf32> to vector<2x32xf32>
    %622 = vector.extract_strided_slice %620 {offsets = [0, 0], sizes = [2, 32], strides = [1, 1]} : vector<2x96xf32> to vector<2x32xf32>
    %623 = arith.addf %621, %622 : vector<2x32xf32>
    %624 = arith.negf %623 : vector<2x32xf32>
    %625 = math.exp %624 : vector<2x32xf32>
    %cst_122 = arith.constant 1.000000e+00 : f32
    %626 = vector.broadcast %cst_122 : f32 to vector<2x32xf32>
    %627 = arith.addf %626, %625 : vector<2x32xf32>
    %628 = arith.divf %626, %627 : vector<2x32xf32>
    %629 = vector.extract_strided_slice %617 {offsets = [0, 32], sizes = [2, 32], strides = [1, 1]} : vector<2x96xf32> to vector<2x32xf32>
    %630 = vector.extract_strided_slice %620 {offsets = [0, 32], sizes = [2, 32], strides = [1, 1]} : vector<2x96xf32> to vector<2x32xf32>
    %631 = arith.addf %629, %630 : vector<2x32xf32>
    %632 = arith.negf %631 : vector<2x32xf32>
    %633 = math.exp %632 : vector<2x32xf32>
    %cst_123 = arith.constant 1.000000e+00 : f32
    %634 = vector.broadcast %cst_123 : f32 to vector<2x32xf32>
    %635 = arith.addf %634, %633 : vector<2x32xf32>
    %636 = arith.divf %634, %635 : vector<2x32xf32>
    %637 = vector.extract_strided_slice %617 {offsets = [0, 64], sizes = [2, 32], strides = [1, 1]} : vector<2x96xf32> to vector<2x32xf32>
    %638 = vector.extract_strided_slice %620 {offsets = [0, 64], sizes = [2, 32], strides = [1, 1]} : vector<2x96xf32> to vector<2x32xf32>
    %639 = arith.mulf %628, %638 : vector<2x32xf32>
    %640 = arith.addf %637, %639 : vector<2x32xf32>
    %641 = math.tanh %640 : vector<2x32xf32>
    %cst_124 = arith.constant 1.000000e+00 : f32
    %642 = vector.broadcast %cst_124 : f32 to vector<2x32xf32>
    %643 = arith.subf %642, %636 : vector<2x32xf32>
    %644 = arith.mulf %643, %641 : vector<2x32xf32>
    %645 = arith.mulf %636, %616 : vector<2x32xf32>
    %646 = arith.addf %644, %645 : vector<2x32xf32>
    %647 = vector.extract_strided_slice %526 {offsets = [8, 0], sizes = [2, 96], strides = [1, 1]} : vector<16x96xf32> to vector<2x96xf32>
    %cst_125 = arith.constant dense<0.000000e+00> : vector<2x96xf32>
    %648 = tpu.matmul %646, %3, %cst_125 {dimension_numbers = #tpu.dot_dimension_numbers<[1], [0], [0], [1], [0, 0, 1, 1], [], []>} : vector<2x32xf32>, vector<32x96xf32>, vector<2x96xf32> -> vector<2x96xf32>
    %649 = vector.broadcast %13 : vector<1x96xf32> to vector<2x96xf32>
    %650 = arith.addf %648, %649 : vector<2x96xf32>
    %651 = vector.extract_strided_slice %647 {offsets = [0, 0], sizes = [2, 32], strides = [1, 1]} : vector<2x96xf32> to vector<2x32xf32>
    %652 = vector.extract_strided_slice %650 {offsets = [0, 0], sizes = [2, 32], strides = [1, 1]} : vector<2x96xf32> to vector<2x32xf32>
    %653 = arith.addf %651, %652 : vector<2x32xf32>
    %654 = arith.negf %653 : vector<2x32xf32>
    %655 = math.exp %654 : vector<2x32xf32>
    %cst_126 = arith.constant 1.000000e+00 : f32
    %656 = vector.broadcast %cst_126 : f32 to vector<2x32xf32>
    %657 = arith.addf %656, %655 : vector<2x32xf32>
    %658 = arith.divf %656, %657 : vector<2x32xf32>
    %659 = vector.extract_strided_slice %647 {offsets = [0, 32], sizes = [2, 32], strides = [1, 1]} : vector<2x96xf32> to vector<2x32xf32>
    %660 = vector.extract_strided_slice %650 {offsets = [0, 32], sizes = [2, 32], strides = [1, 1]} : vector<2x96xf32> to vector<2x32xf32>
    %661 = arith.addf %659, %660 : vector<2x32xf32>
    %662 = arith.negf %661 : vector<2x32xf32>
    %663 = math.exp %662 : vector<2x32xf32>
    %cst_127 = arith.constant 1.000000e+00 : f32
    %664 = vector.broadcast %cst_127 : f32 to vector<2x32xf32>
    %665 = arith.addf %664, %663 : vector<2x32xf32>
    %666 = arith.divf %664, %665 : vector<2x32xf32>
    %667 = vector.extract_strided_slice %647 {offsets = [0, 64], sizes = [2, 32], strides = [1, 1]} : vector<2x96xf32> to vector<2x32xf32>
    %668 = vector.extract_strided_slice %650 {offsets = [0, 64], sizes = [2, 32], strides = [1, 1]} : vector<2x96xf32> to vector<2x32xf32>
    %669 = arith.mulf %658, %668 : vector<2x32xf32>
    %670 = arith.addf %667, %669 : vector<2x32xf32>
    %671 = math.tanh %670 : vector<2x32xf32>
    %cst_128 = arith.constant 1.000000e+00 : f32
    %672 = vector.broadcast %cst_128 : f32 to vector<2x32xf32>
    %673 = arith.subf %672, %666 : vector<2x32xf32>
    %674 = arith.mulf %673, %671 : vector<2x32xf32>
    %675 = arith.mulf %666, %646 : vector<2x32xf32>
    %676 = arith.addf %674, %675 : vector<2x32xf32>
    %677 = vector.extract_strided_slice %526 {offsets = [10, 0], sizes = [2, 96], strides = [1, 1]} : vector<16x96xf32> to vector<2x96xf32>
    %cst_129 = arith.constant dense<0.000000e+00> : vector<2x96xf32>
    %678 = tpu.matmul %676, %3, %cst_129 {dimension_numbers = #tpu.dot_dimension_numbers<[1], [0], [0], [1], [0, 0, 1, 1], [], []>} : vector<2x32xf32>, vector<32x96xf32>, vector<2x96xf32> -> vector<2x96xf32>
    %679 = vector.broadcast %13 : vector<1x96xf32> to vector<2x96xf32>
    %680 = arith.addf %678, %679 : vector<2x96xf32>
    %681 = vector.extract_strided_slice %677 {offsets = [0, 0], sizes = [2, 32], strides = [1, 1]} : vector<2x96xf32> to vector<2x32xf32>
    %682 = vector.extract_strided_slice %680 {offsets = [0, 0], sizes = [2, 32], strides = [1, 1]} : vector<2x96xf32> to vector<2x32xf32>
    %683 = arith.addf %681, %682 : vector<2x32xf32>
    %684 = arith.negf %683 : vector<2x32xf32>
    %685 = math.exp %684 : vector<2x32xf32>
    %cst_130 = arith.constant 1.000000e+00 : f32
    %686 = vector.broadcast %cst_130 : f32 to vector<2x32xf32>
    %687 = arith.addf %686, %685 : vector<2x32xf32>
    %688 = arith.divf %686, %687 : vector<2x32xf32>
    %689 = vector.extract_strided_slice %677 {offsets = [0, 32], sizes = [2, 32], strides = [1, 1]} : vector<2x96xf32> to vector<2x32xf32>
    %690 = vector.extract_strided_slice %680 {offsets = [0, 32], sizes = [2, 32], strides = [1, 1]} : vector<2x96xf32> to vector<2x32xf32>
    %691 = arith.addf %689, %690 : vector<2x32xf32>
    %692 = arith.negf %691 : vector<2x32xf32>
    %693 = math.exp %692 : vector<2x32xf32>
    %cst_131 = arith.constant 1.000000e+00 : f32
    %694 = vector.broadcast %cst_131 : f32 to vector<2x32xf32>
    %695 = arith.addf %694, %693 : vector<2x32xf32>
    %696 = arith.divf %694, %695 : vector<2x32xf32>
    %697 = vector.extract_strided_slice %677 {offsets = [0, 64], sizes = [2, 32], strides = [1, 1]} : vector<2x96xf32> to vector<2x32xf32>
    %698 = vector.extract_strided_slice %680 {offsets = [0, 64], sizes = [2, 32], strides = [1, 1]} : vector<2x96xf32> to vector<2x32xf32>
    %699 = arith.mulf %688, %698 : vector<2x32xf32>
    %700 = arith.addf %697, %699 : vector<2x32xf32>
    %701 = math.tanh %700 : vector<2x32xf32>
    %cst_132 = arith.constant 1.000000e+00 : f32
    %702 = vector.broadcast %cst_132 : f32 to vector<2x32xf32>
    %703 = arith.subf %702, %696 : vector<2x32xf32>
    %704 = arith.mulf %703, %701 : vector<2x32xf32>
    %705 = arith.mulf %696, %676 : vector<2x32xf32>
    %706 = arith.addf %704, %705 : vector<2x32xf32>
    %707 = vector.extract_strided_slice %526 {offsets = [12, 0], sizes = [2, 96], strides = [1, 1]} : vector<16x96xf32> to vector<2x96xf32>
    %cst_133 = arith.constant dense<0.000000e+00> : vector<2x96xf32>
    %708 = tpu.matmul %706, %3, %cst_133 {dimension_numbers = #tpu.dot_dimension_numbers<[1], [0], [0], [1], [0, 0, 1, 1], [], []>} : vector<2x32xf32>, vector<32x96xf32>, vector<2x96xf32> -> vector<2x96xf32>
    %709 = vector.broadcast %13 : vector<1x96xf32> to vector<2x96xf32>
    %710 = arith.addf %708, %709 : vector<2x96xf32>
    %711 = vector.extract_strided_slice %707 {offsets = [0, 0], sizes = [2, 32], strides = [1, 1]} : vector<2x96xf32> to vector<2x32xf32>
    %712 = vector.extract_strided_slice %710 {offsets = [0, 0], sizes = [2, 32], strides = [1, 1]} : vector<2x96xf32> to vector<2x32xf32>
    %713 = arith.addf %711, %712 : vector<2x32xf32>
    %714 = arith.negf %713 : vector<2x32xf32>
    %715 = math.exp %714 : vector<2x32xf32>
    %cst_134 = arith.constant 1.000000e+00 : f32
    %716 = vector.broadcast %cst_134 : f32 to vector<2x32xf32>
    %717 = arith.addf %716, %715 : vector<2x32xf32>
    %718 = arith.divf %716, %717 : vector<2x32xf32>
    %719 = vector.extract_strided_slice %707 {offsets = [0, 32], sizes = [2, 32], strides = [1, 1]} : vector<2x96xf32> to vector<2x32xf32>
    %720 = vector.extract_strided_slice %710 {offsets = [0, 32], sizes = [2, 32], strides = [1, 1]} : vector<2x96xf32> to vector<2x32xf32>
    %721 = arith.addf %719, %720 : vector<2x32xf32>
    %722 = arith.negf %721 : vector<2x32xf32>
    %723 = math.exp %722 : vector<2x32xf32>
    %cst_135 = arith.constant 1.000000e+00 : f32
    %724 = vector.broadcast %cst_135 : f32 to vector<2x32xf32>
    %725 = arith.addf %724, %723 : vector<2x32xf32>
    %726 = arith.divf %724, %725 : vector<2x32xf32>
    %727 = vector.extract_strided_slice %707 {offsets = [0, 64], sizes = [2, 32], strides = [1, 1]} : vector<2x96xf32> to vector<2x32xf32>
    %728 = vector.extract_strided_slice %710 {offsets = [0, 64], sizes = [2, 32], strides = [1, 1]} : vector<2x96xf32> to vector<2x32xf32>
    %729 = arith.mulf %718, %728 : vector<2x32xf32>
    %730 = arith.addf %727, %729 : vector<2x32xf32>
    %731 = math.tanh %730 : vector<2x32xf32>
    %cst_136 = arith.constant 1.000000e+00 : f32
    %732 = vector.broadcast %cst_136 : f32 to vector<2x32xf32>
    %733 = arith.subf %732, %726 : vector<2x32xf32>
    %734 = arith.mulf %733, %731 : vector<2x32xf32>
    %735 = arith.mulf %726, %706 : vector<2x32xf32>
    %736 = arith.addf %734, %735 : vector<2x32xf32>
    %737 = vector.extract_strided_slice %526 {offsets = [14, 0], sizes = [2, 96], strides = [1, 1]} : vector<16x96xf32> to vector<2x96xf32>
    %cst_137 = arith.constant dense<0.000000e+00> : vector<2x96xf32>
    %738 = tpu.matmul %736, %3, %cst_137 {dimension_numbers = #tpu.dot_dimension_numbers<[1], [0], [0], [1], [0, 0, 1, 1], [], []>} : vector<2x32xf32>, vector<32x96xf32>, vector<2x96xf32> -> vector<2x96xf32>
    %739 = vector.broadcast %13 : vector<1x96xf32> to vector<2x96xf32>
    %740 = arith.addf %738, %739 : vector<2x96xf32>
    %741 = vector.extract_strided_slice %737 {offsets = [0, 0], sizes = [2, 32], strides = [1, 1]} : vector<2x96xf32> to vector<2x32xf32>
    %742 = vector.extract_strided_slice %740 {offsets = [0, 0], sizes = [2, 32], strides = [1, 1]} : vector<2x96xf32> to vector<2x32xf32>
    %743 = arith.addf %741, %742 : vector<2x32xf32>
    %744 = arith.negf %743 : vector<2x32xf32>
    %745 = math.exp %744 : vector<2x32xf32>
    %cst_138 = arith.constant 1.000000e+00 : f32
    %746 = vector.broadcast %cst_138 : f32 to vector<2x32xf32>
    %747 = arith.addf %746, %745 : vector<2x32xf32>
    %748 = arith.divf %746, %747 : vector<2x32xf32>
    %749 = vector.extract_strided_slice %737 {offsets = [0, 32], sizes = [2, 32], strides = [1, 1]} : vector<2x96xf32> to vector<2x32xf32>
    %750 = vector.extract_strided_slice %740 {offsets = [0, 32], sizes = [2, 32], strides = [1, 1]} : vector<2x96xf32> to vector<2x32xf32>
    %751 = arith.addf %749, %750 : vector<2x32xf32>
    %752 = arith.negf %751 : vector<2x32xf32>
    %753 = math.exp %752 : vector<2x32xf32>
    %cst_139 = arith.constant 1.000000e+00 : f32
    %754 = vector.broadcast %cst_139 : f32 to vector<2x32xf32>
    %755 = arith.addf %754, %753 : vector<2x32xf32>
    %756 = arith.divf %754, %755 : vector<2x32xf32>
    %757 = vector.extract_strided_slice %737 {offsets = [0, 64], sizes = [2, 32], strides = [1, 1]} : vector<2x96xf32> to vector<2x32xf32>
    %758 = vector.extract_strided_slice %740 {offsets = [0, 64], sizes = [2, 32], strides = [1, 1]} : vector<2x96xf32> to vector<2x32xf32>
    %759 = arith.mulf %748, %758 : vector<2x32xf32>
    %760 = arith.addf %757, %759 : vector<2x32xf32>
    %761 = math.tanh %760 : vector<2x32xf32>
    %cst_140 = arith.constant 1.000000e+00 : f32
    %762 = vector.broadcast %cst_140 : f32 to vector<2x32xf32>
    %763 = arith.subf %762, %756 : vector<2x32xf32>
    %764 = arith.mulf %763, %761 : vector<2x32xf32>
    %765 = arith.mulf %756, %736 : vector<2x32xf32>
    %766 = arith.addf %764, %765 : vector<2x32xf32>
    %767 = vector.extract_strided_slice %523 {offsets = [14, 0], sizes = [2, 64], strides = [1, 1]} : vector<16x64xf32> to vector<2x64xf32>
    %cst_141 = arith.constant dense<0.000000e+00> : vector<2x96xf32>
    %768 = tpu.matmul %767, %4, %cst_141 {dimension_numbers = #tpu.dot_dimension_numbers<[1], [0], [0], [1], [0, 0, 1, 1], [], []>} : vector<2x64xf32>, vector<64x96xf32>, vector<2x96xf32> -> vector<2x96xf32>
    %769 = vector.broadcast %12 : vector<1x96xf32> to vector<2x96xf32>
    %770 = arith.addf %768, %769 : vector<2x96xf32>
    %771 = vector.extract_strided_slice %770 {offsets = [0, 0], sizes = [2, 32], strides = [1, 1]} : vector<2x96xf32> to vector<2x32xf32>
    %772 = arith.negf %771 : vector<2x32xf32>
    %773 = math.exp %772 : vector<2x32xf32>
    %cst_142 = arith.constant 1.000000e+00 : f32
    %774 = vector.broadcast %cst_142 : f32 to vector<2x32xf32>
    %775 = arith.addf %774, %773 : vector<2x32xf32>
    %776 = arith.divf %774, %775 : vector<2x32xf32>
    %777 = vector.extract_strided_slice %770 {offsets = [0, 32], sizes = [2, 32], strides = [1, 1]} : vector<2x96xf32> to vector<2x32xf32>
    %778 = arith.negf %777 : vector<2x32xf32>
    %779 = math.exp %778 : vector<2x32xf32>
    %cst_143 = arith.constant 1.000000e+00 : f32
    %780 = vector.broadcast %cst_143 : f32 to vector<2x32xf32>
    %781 = arith.addf %780, %779 : vector<2x32xf32>
    %782 = arith.divf %780, %781 : vector<2x32xf32>
    %783 = vector.extract_strided_slice %770 {offsets = [0, 64], sizes = [2, 32], strides = [1, 1]} : vector<2x96xf32> to vector<2x32xf32>
    %784 = vector.extract_strided_slice %14 {offsets = [0, 64], sizes = [1, 32], strides = [1, 1]} : vector<1x96xf32> to vector<1x32xf32>
    %785 = vector.broadcast %784 : vector<1x32xf32> to vector<2x32xf32>
    %786 = arith.mulf %776, %785 : vector<2x32xf32>
    %787 = arith.addf %783, %786 : vector<2x32xf32>
    %788 = math.tanh %787 : vector<2x32xf32>
    %cst_144 = arith.constant 1.000000e+00 : f32
    %789 = vector.broadcast %cst_144 : f32 to vector<2x32xf32>
    %790 = arith.subf %789, %782 : vector<2x32xf32>
    %791 = arith.mulf %790, %788 : vector<2x32xf32>
    %c0_145 = arith.constant 0 : index
    %c0_146 = arith.constant 0 : index
    %792 = vector.load %arg2[%c0_145, %c0_146] : memref<65x2xf32, #tpu.memory_space<vmem>>, vector<32x2xf32>
    %c32_147 = arith.constant 32 : index
    %c0_148 = arith.constant 0 : index
    %793 = vector.load %arg2[%c32_147, %c0_148] : memref<65x2xf32, #tpu.memory_space<vmem>>, vector<32x2xf32>
    %c64_149 = arith.constant 64 : index
    %c0_150 = arith.constant 0 : index
    %794 = vector.load %arg2[%c64_149, %c0_150] : memref<65x2xf32, #tpu.memory_space<vmem>>, vector<1x2xf32>
    %cst_151 = arith.constant dense<0.000000e+00> : vector<2x2xf32>
    %795 = tpu.matmul %766, %792, %cst_151 {dimension_numbers = #tpu.dot_dimension_numbers<[1], [0], [0], [1], [0, 0, 1, 1], [], []>} : vector<2x32xf32>, vector<32x2xf32>, vector<2x2xf32> -> vector<2x2xf32>
    %cst_152 = arith.constant dense<0.000000e+00> : vector<2x2xf32>
    %796 = tpu.matmul %791, %793, %cst_152 {dimension_numbers = #tpu.dot_dimension_numbers<[1], [0], [0], [1], [0, 0, 1, 1], [], []>} : vector<2x32xf32>, vector<32x2xf32>, vector<2x2xf32> -> vector<2x2xf32>
    %797 = arith.addf %795, %796 : vector<2x2xf32>
    %798 = vector.broadcast %794 : vector<1x2xf32> to vector<2x2xf32>
    %799 = arith.addf %797, %798 : vector<2x2xf32>
    %cst_153 = arith.constant 0.000000e+00 : f32
    %800 = vector.broadcast %cst_153 : f32 to vector<2x2xf32>
    %801 = arith.maximumf %799, %800 : vector<2x2xf32>
    %802 = math.absf %799 : vector<2x2xf32>
    %cst_154 = arith.constant 0.000000e+00 : f32
    %803 = vector.broadcast %cst_154 : f32 to vector<2x2xf32>
    %804 = arith.subf %803, %802 : vector<2x2xf32>
    %805 = math.exp %804 : vector<2x2xf32>
    %cst_155 = arith.constant 1.000000e+00 : f32
    %806 = vector.broadcast %cst_155 : f32 to vector<2x2xf32>
    %807 = arith.addf %806, %805 : vector<2x2xf32>
    %808 = math.log %807 : vector<2x2xf32>
    %809 = arith.addf %801, %808 : vector<2x2xf32>
    %cst_156 = arith.constant 2.000000e+01 : f32
    %810 = vector.broadcast %cst_156 : f32 to vector<2x2xf32>
    %811 = arith.cmpf ogt, %799, %810 : vector<2x2xf32>
    %812 = arith.select %811, %799, %809 : vector<2x2xi1>, vector<2x2xf32>
    %813 = tpu.iota {dimensions = array<i32: 1>} : vector<2x2xi32>
    %c1_i32 = arith.constant 1 : i32
    %814 = vector.broadcast %c1_i32 : i32 to vector<2x2xi32>
    %815 = arith.cmpi sge, %813, %814 : vector<2x2xi32>
    %816 = arith.select %815, %812, %799 : vector<2x2xi1>, vector<2x2xf32>
    %c0_157 = arith.constant 0 : index
    %c0_158 = arith.constant 0 : index
    %817 = vector.load %arg3[%c0_157, %c0_158] : memref<2x2xf32, #tpu.memory_space<vmem>>, vector<2x2xf32>
    tpu.vector_store %arg3[%c0_157, %c0_158], %816 {strides = array<i32>} : memref<2x2xf32, #tpu.memory_space<vmem>>, vector<2x2xf32>,
    return
  }
}

</mosaic_0001>

<bundles_post_ra>
// kernel: deepar_forward.1
= control target key start
LH: loop header
LB: loop body
LE: loop exit
PB: predicated region body
PF: predicated region fallthrough
CT: control target
= control target key end

     0   :  { %8 = vsyncpa [#allocation4], 0  ;;  %s3772_s12 = smov [#allocation3]   ;;  %s4451_s0 = inlined_call_operand.vmem [shape: f32[16,1], index: 0, kind: input, shape index: {}]   ;;  %s4452_s1 = inlined_call_operand.hbm [shape: f32[266,96], index: 1, kind: input, shape index: {}]   ;;  %s4453_s2 = inlined_call_operand.vmem [shape: f32[65,2], index: 2, kind: input, shape index: {}]   ;;  %s4454_s3 = inlined_call_operand.vmem [shape: f32[2,2], index: 3, kind: output, shape index: {}]  }
   0x1   :  { %s16_s13 = sshll.u32 %s3772_s12, 4  ;;  %s17_s13 = int_to_ptr.vmem [resolvable:$true] %s16_s13 }
   0x2   :  { %s3758_s14 = scalar_lea.vmem %s17_s13, 4352  ;;  %p3763_p1 = scmp.lt.s32.totalorder %s17_s13, %s17_s13 }
   0x3   :  { %p3759_p0 = scmp.ne.s32.totalorder %s17_s13, %s3758_s14  ;;  %p3764_p2 = scmp.lt.s32.totalorder %s3758_s14, %s3758_s14 }
   0x5   :  { %p3765_p3 = por %p3764_p2, %p3763_p1 }
   0x7   :  { %p3766_p4 = pnand %p3765_p3, %p3759_p0 }
   0x9   :  { %3769 = shalt.err (!%p3766_p4)
}
   0xa   :  { %s3773_s15 = smov 128   ;;  %s3774_s16 = smov 8  }
   0xb   :  { %22 = dma.hbm_to_vmem [thread:$0]  %s4452_s1, 4352, %s17_s13, [#allocation4], %s3773_s15, %s3773_s15, %s3774_s16  }
   0xc   :  { %3770 = dma.done.wait [#allocation4], 4352  }
   0xd   :  { %3771 = vsyncadd [#allocation4], 4294962944  ;;  %v3775_v0 = vmov 0.0   ;;  %vm3776_vm0 = vmmov 0   ;;  %v3777_v1 = vmov 0   ;;  %v3809_v2 = vld [vmem:[#allocation3 + $0x18] sm:$0xff] }
   0xe   :  { %3252 = vmatprep.subr.mxu0 %v3775_v0  ;;  %3263 = vmatprep.subr.mxu1 %v3775_v0  ;;  %v3811_v3 = vld [vmem:[#allocation3 + $0x38] sm:$0xff]  ;;  %v3813_v4 = vld [vmem:[#allocation3 + $0x10] sm:$0xff]  ;;  %v3821_v6 = vld [vmem:[#allocation3 + $0x8] sm:$0xff]  ;;  %s3779_s22 = smov 96   ;;  %vm314_vm1 = vcmask 523526   ;;  %vm312_vm2 = vcmask 254976  }
   0xf   :  { %3260 = vmatprep.mubr.msk.f32.mxu0 %vm3776_vm0, %v3775_v0  ;;  %3271 = vmatprep.mubr.msk.f32.mxu1 %vm3776_vm0, %v3775_v0  ;;  %v3817_v5 = vld [vmem:[#allocation3 + $0x30] sm:$0xff]  ;;  %v3823_v7 = vld [vmem:[#allocation3 + $0x28] sm:$0xff]  ;;  %v3829_v8 = vld [vmem:[#allocation3] sm:$0xff]  ;;  %vm106_vm3 = vcmask 261120   ;;  %vm530_vm4 = vcmask 521476   ;;  %vm749_vm5 = vcmask 519426  }
  0x10   :  { %3584 = vset.pattern.permute.xlu0 %v3777_v1  ;;  %3585 = vset.pattern.permute.xlu1 %v3777_v1  ;;  %v3831_v9 = vld [vmem:[#allocation3 + $0x20] sm:$0xff]  ;;  %v66_v10 = vld [vmem:[%s4451_s0] sm:$0xff]  ;;  %v67_v11 = vld [vmem:[%s4451_s0 + $0x8] sm:$0xff]  ;;  %s3778_s0 = smov 64   ;;  %vm965_vm6 = vcmask 517376   ;;  %vm747_vm7 = vcmask 259076  }
  0x11   :  { %3253 = vmatpush3.msra.mxu0 %v3809_v2  ;;  %3264 = vmatpush3.msra.mxu1 %v3811_v3  ;;  %v3043_v12 = vld [vmem:[#allocation3 + $0x101] ss:$0 sm:$0xff]  ;;  %v3041_v14 = vld [vmem:[#allocation3 + $0x100] ss:$0 sm:$0xff]  ;;  %v3044_v15 = vld [vmem:[#allocation3 + $0x103] ss:$0 sm:$0xff] }
  0x12   :  { %3254 = vmatprep.subr.mxu0 %v3775_v0  ;;  %3265 = vmatprep.subr.mxu1 %v3775_v0  ;;  %v3042_v19 = vld [vmem:[#allocation3 + $0x102] ss:$0 sm:$0xff]  ;;  %v3873_v22 = vld [vmem:[#allocation3 + $0x104] ss:$0 sm:$0xff]  ;;  %v3875_v23 = vld [vmem:[#allocation3 + $0x105] ss:$0 sm:$0xff] }
  0x13   :  { %3255 = vmatpush3.msra.mxu0 %v3813_v4  ;;  %3266 = vmatpush3.msra.mxu1 %v3817_v5  ;;  %vm528_vm8 = vcmask 257026   ;;  %vm963_vm9 = vcmask 261126   ;;  %vm1831_vm10 = vcmask 523264   ;;  %vm3034_vm13 = vcmask 9216  }
  0x14   :  { %3256 = vmatprep.subr.mxu0 %v3775_v0  ;;  %3267 = vmatprep.subr.mxu1 %v3775_v0 }
  0x15   :  { %3257 = vmatpush3.msra.mxu0 %v3821_v6  ;;  %3268 = vmatpush3.msra.mxu1 %v3823_v7 }
  0x16   :  { %3258 = vmatprep.subr.mxu0 %v3775_v0  ;;  %3269 = vmatprep.subr.mxu1 %v3775_v0 }
  0x17   :  { %3259 = vmatpush3.msra.mxu0 %v3829_v8  ;;  %3270 = vmatpush3.msra.mxu1 %v3831_v9 }
  0x18   :  { %3261 = vmatmul.mubr.f32.vlgmr.msra.gmra.mxu0 %v3775_v0  ;;  %3272 = vmatmul.mubr.f32.vlgmr.msra.gmra.mxu1 %v3775_v0 }
  0x19   :  { %70 = vperm.xlu0 %3584, %v66_v10   ;;  %75 = vperm.xlu1 %3585, %v67_v11  }
  0x1a   :  { %3274 = vmatprep.subr.mxu0 %v3775_v0  ;;  %3285 = vmatprep.subr.mxu1 %v3775_v0 }
  0x1b   :  { %3275 = vmatpush3.msra.mxu0 %v3809_v2  ;;  %3286 = vmatpush3.msra.mxu1 %v3811_v3 }
  0x1c   :  { %3276 = vmatprep.subr.mxu0 %v3775_v0  ;;  %3287 = vmatprep.subr.mxu1 %v3775_v0 }
  0x1d   :  { %3277 = vmatpush3.msra.mxu0 %v3813_v4  ;;  %3282 = vmatprep.mubr.msk.f32.mxu0 %vm3776_vm0, %v3775_v0 }
  0x1e   :  { %3278 = vmatprep.subr.mxu0 %v3775_v0  ;;  %3288 = vmatpush3.msra.mxu1 %v3817_v5 }
  0x1f   :  { %3279 = vmatpush3.msra.mxu0 %v3821_v6  ;;  %3289 = vmatprep.subr.mxu1 %v3775_v0 }
  0x20   :  { %3280 = vmatprep.subr.mxu0 %v3775_v0  ;;  %3290 = vmatpush3.msra.mxu1 %v3823_v7 }
  0x21   :  { %3281 = vmatpush3.msra.mxu0 %v3829_v8  ;;  %3291 = vmatprep.subr.mxu1 %v3775_v0 }
  0x22   :  { %3292 = vmatpush3.msra.mxu1 %v3831_v9  ;;  %3293 = vmatprep.mubr.msk.f32.mxu1 %vm3776_vm0, %v3775_v0 }
  0x23   :  { %3296 = vmatprep.subr.mxu0 %v3775_v0  ;;  %3307 = vmatprep.subr.mxu1 %v3775_v0 }
  0x94   :  { %v71_v13 = vpop.permute.xlu0 %70  ;;  %v76_v16 = vpop.permute.xlu1 %75 }
  0x95   :  { %v94_v17 = vmul.f32 %v3043_v12, %v71_v13  ;;  %v83_v18 = vmul.f32 %v3041_v14, %v76_v16  ;;  %v82_v31 = vmul.f32 %v3041_v14, %v71_v13  ;;  %v95_v32 = vmul.f32 %v3043_v12, %v76_v16 }
  0x97   :  { %v3869_v20 = vadd.f32 %v3044_v15, %v94_v17  ;;  %v3871_v21 = vadd.f32 %v3042_v19, %v83_v18  ;;  %v3881_v33 = vadd.f32 %v3042_v19, %v82_v31  ;;  %v3883_v34 = vadd.f32 %v3044_v15, %v95_v32 }
  0xd8   :  { %v176_v24 = vpop.f32.mrf.mxu0  ;;  %v276_v25 = vpop.f32.mrf.mxu1 }
  0xd9   :  { %v177_v26 = vadd.f32 %v3873_v22, %v176_v24  ;;  %v277_v27 = vadd.f32 %v3875_v23, %v276_v25 }
  0xda   :  { %v3262_v28 = vpop.f32.mrf.mxu0  ;;  %v3273_v29 = vpop.f32.mrf.mxu1 }
  0xdb   :  { %v281_v30 = vrot.slane %v277_v27, 2  ;;  %188 = vrot.lane.b32.xlu0 %v177_v26, %s3778_s0  ;;  %v180_v35 = vadd.f32 %v177_v26, %v3881_v33 }
  0xdd   :  { %290 = vrot.lane.b32.xlu1 %v281_v30, %s3778_s0  ;;  %v283_v36 = vadd.f32 %v281_v30, %v3883_v34  ;;  %v3046_v37 = vmul.f32 -1.442695, %v180_v35 }
  0xdf   :  { %v3048_v38 = vmul.f32 -1.442695, %v283_v36  ;;  %3586 = vpow2.f32 %v3046_v37 }
  0xe1   :  { %3588 = vpow2.f32 %v3048_v38 }
  0xec   :  { %v3587_v39 = vpop.eup %3586 }
  0xed   :  { %v184_v41 = vadd.f32 1.0, %v3587_v39 }
  0xee   :  { %v3589_v40 = vpop.eup %3588 }
  0xef   :  { %v287_v42 = vadd.f32 1.0, %v3589_v40  ;;  %3590 = vrcp.f32 %v184_v41 }
  0xf1   :  { %3592 = vrcp.f32 %v287_v42 }
  0xfc   :  { %v3591_v43 = vpop.eup %3590 }
  0xfd   :  { %v198_v55 = vsub.f32 1.0, %v3591_v43  ;;  %v204_v57 = vmul.f32 0.0, %v3591_v43 }
  0xfe   :  { %v3593_v44 = vpop.eup %3592 }
  0xff   :  { %v300_v59 = vsub.f32 1.0, %v3593_v44  ;;  %v306_v62 = vmul.f32 0.0, %v3593_v44 }
 0x14d   :  { %v189_v45 = vpop.permute.xlu0 %188 }
 0x14e   :  { %v191_v46 = vmul.f32 %v3591_v43, %v189_v45 }
 0x14f   :  { %v291_v47 = vpop.permute.xlu1 %290 }
 0x150   :  { %v293_v48 = vmul.f32 %v3593_v44, %v291_v47  ;;  %193 = vrot.lane.b32.xlu0 %v191_v46, %s3778_s0 }
 0x152   :  { %295 = vrot.lane.b32.xlu1 %v293_v48, %s3778_s0 }
 0x1c2   :  { %v194_v49 = vpop.permute.xlu0 %193 }
 0x1c3   :  { %v196_v50 = vadd.f32 %v194_v49, %v3881_v33 }
 0x1c4   :  { %v296_v51 = vpop.permute.xlu1 %295 }
 0x1c5   :  { %3594 = vtanh.f32 %v196_v50  ;;  %v298_v52 = vadd.f32 %v296_v51, %v3883_v34 }
 0x1c7   :  { %3596 = vtanh.f32 %v298_v52 }
 0x1d2   :  { %v3595_v53 = vpop.eup %3594 }
 0x1d3   :  { %200 = vrot.lane.b32.xlu0 %v3595_v53, %s3779_s22 }
 0x1d4   :  { %v3597_v54 = vpop.eup %3596 }
 0x1d5   :  { %302 = vrot.lane.b32.xlu1 %v3597_v54, %s3779_s22 }
 0x245   :  { %v201_v56 = vpop.permute.xlu0 %200 }
 0x246   :  { %v203_v58 = vmul.f32 %v201_v56, %v198_v55 }
 0x247   :  { %v303_v60 = vpop.permute.xlu1 %302 }
 0x248   :  { %v3893_v61 = vadd.f32 %v204_v57, %v203_v58  ;;  %v305_v63 = vmul.f32 %v303_v60, %v300_v59 }
 0x24a   :  { %v3895_v1 = vadd.f32 %v306_v62, %v305_v63  ;;  %309 = vrot.lane.b32.xlu0 %v3893_v61, %s3779_s22  ;;  %v414_v47 = vrot.slane %v3893_v61, 6 }
 0x24c   :  { %v419_v10 = vrot.slane %v3895_v1, 6  ;;  %315 = vst.msk [vmem:[#allocation2 + $0x8] sm:$0xc0] %vm314_vm1, %v3895_v1  ;;  %v520_v54 = vrot.slane %v3895_v1, 2 }
 0x24e   :  { %420 = vrot.lane.b32.xlu1 %v419_v10, %s3779_s22 }
 0x2bc   :  { %v310_v11 = vpop.permute.xlu0 %309 }
 0x2bd   :  { %313 = vst.msk [vmem:[#allocation2] sm:$0x3] %vm312_vm2, %v310_v11  ;;  %3283 = vmatmul.mubr.msk.f32.vlgmr.msra.gmra.mxu0 %vm106_vm3, %v310_v11 }
 0x2be   :  { %3297 = vmatpush3.msra.mxu0 %v3809_v2  ;;  %3304 = vmatprep.mubr.msk.f32.mxu0 %vm3776_vm0, %v3775_v0 }
 0x2bf   :  { %3298 = vmatprep.subr.mxu0 %v3775_v0 }
 0x2c0   :  { %v421_v12 = vpop.permute.xlu1 %420  ;;  %3299 = vmatpush3.msra.mxu0 %v3813_v4 }
 0x2c1   :  { %3294 = vmatmul.mubr.msk.f32.vlgmr.msra.gmra.mxu1 %vm106_vm3, %v421_v12  ;;  %3300 = vmatprep.subr.mxu0 %v3775_v0 }
 0x2c2   :  { %3301 = vmatpush3.msra.mxu0 %v3821_v6  ;;  %3308 = vmatpush3.msra.mxu1 %v3811_v3 }
 0x2c3   :  { %3302 = vmatprep.subr.mxu0 %v3775_v0  ;;  %3309 = vmatprep.subr.mxu1 %v3775_v0 }
 0x2c4   :  { %3303 = vmatpush3.msra.mxu0 %v3829_v8  ;;  %3310 = vmatpush3.msra.mxu1 %v3817_v5 }
 0x2c5   :  { %3311 = vmatprep.subr.mxu1 %v3775_v0  ;;  %3315 = vmatprep.mubr.msk.f32.mxu1 %vm3776_vm0, %v3775_v0 }
 0x2c6   :  { %3312 = vmatpush3.msra.mxu1 %v3823_v7  ;;  %3318 = vmatprep.subr.mxu0 %v3775_v0 }
 0x2c7   :  { %3313 = vmatprep.subr.mxu1 %v3775_v0 }
 0x2c8   :  { %3314 = vmatpush3.msra.mxu1 %v3831_v9 }
 0x2c9   :  { %3329 = vmatprep.subr.mxu1 %v3775_v0 }
 0x37d   :  { %v384_v13 = vpop.f32.mrf.mxu0 }
 0x37e   :  { %v385_v14 = vadd.f32 %v3873_v22, %v384_v13 }
 0x37f   :  { %v3284_v15 = vpop.f32.mrf.mxu0 }
 0x380   :  { %v389_v16 = vrot.slane %v385_v14, 6 }
 0x381   :  { %v490_v17 = vpop.f32.mrf.mxu1 }
 0x382   :  { %v491_v18 = vadd.f32 %v3875_v23, %v490_v17  ;;  %398 = vrot.lane.b32.xlu0 %v389_v16, %s3778_s0  ;;  %v391_v25 = vadd.f32 %v389_v16, %v3881_v33 }
 0x383   :  { %v3295_v19 = vpop.f32.mrf.mxu1 }
 0x384   :  { %v495_v24 = vrot.slane %v491_v18, 4  ;;  %v3050_v26 = vmul.f32 -1.442695, %v391_v25 }
 0x386   :  { %504 = vrot.lane.b32.xlu1 %v495_v24, %s3778_s0  ;;  %v497_v27 = vadd.f32 %v495_v24, %v3883_v34  ;;  %3598 = vpow2.f32 %v3050_v26 }
 0x388   :  { %v3052_v28 = vmul.f32 -1.442695, %v497_v27 }
 0x38a   :  { %3600 = vpow2.f32 %v3052_v28 }
 0x393   :  { %v3599_v29 = vpop.eup %3598 }
 0x394   :  { %v395_v30 = vadd.f32 1.0, %v3599_v29 }
 0x396   :  { %3602 = vrcp.f32 %v395_v30 }
 0x397   :  { %v3601_v31 = vpop.eup %3600 }
 0x398   :  { %v501_v32 = vadd.f32 1.0, %v3601_v31 }
 0x39a   :  { %3604 = vrcp.f32 %v501_v32 }
 0x3a3   :  { %v3603_v35 = vpop.eup %3602 }
 0x3a4   :  { %v408_v48 = vsub.f32 1.0, %v3603_v35  ;;  %v416_v50 = vmul.f32 %v3603_v35, %v414_v47 }
 0x3a7   :  { %v3605_v38 = vpop.eup %3604 }
 0x3a8   :  { %v514_v53 = vsub.f32 1.0, %v3605_v38  ;;  %v522_v56 = vmul.f32 %v3605_v38, %v520_v54 }
 0x3f4   :  { %v399_v36 = vpop.permute.xlu0 %398 }
 0x3f5   :  { %v401_v37 = vmul.f32 %v3603_v35, %v399_v36 }
 0x3f7   :  { %403 = vrot.lane.b32.xlu0 %v401_v37, %s3778_s0 }
 0x3f8   :  { %v505_v39 = vpop.permute.xlu1 %504 }
 0x3f9   :  { %v507_v40 = vmul.f32 %v3605_v38, %v505_v39 }
 0x3fb   :  { %509 = vrot.lane.b32.xlu1 %v507_v40, %s3778_s0 }
 0x469   :  { %v404_v41 = vpop.permute.xlu0 %403 }
 0x46a   :  { %v406_v42 = vadd.f32 %v404_v41, %v3881_v33 }
 0x46c   :  { %3606 = vtanh.f32 %v406_v42 }
 0x46d   :  { %v510_v43 = vpop.permute.xlu1 %509 }
 0x46e   :  { %v512_v44 = vadd.f32 %v510_v43, %v3883_v34 }
 0x470   :  { %3608 = vtanh.f32 %v512_v44 }
 0x479   :  { %v3607_v45 = vpop.eup %3606 }
 0x47a   :  { %410 = vrot.lane.b32.xlu0 %v3607_v45, %s3779_s22 }
 0x47d   :  { %v3609_v46 = vpop.eup %3608 }
 0x47e   :  { %516 = vrot.lane.b32.xlu1 %v3609_v46, %s3779_s22 }
 0x4ec   :  { %v411_v49 = vpop.permute.xlu0 %410 }
 0x4ed   :  { %v413_v51 = vmul.f32 %v411_v49, %v408_v48 }
 0x4ef   :  { %v3939_v52 = vadd.f32 %v416_v50, %v413_v51 }
 0x4f0   :  { %v517_v55 = vpop.permute.xlu1 %516 }
 0x4f1   :  { %v519_v57 = vmul.f32 %v517_v55, %v514_v53  ;;  %v532_v58 = vrot.slane %v3939_v52, 2  ;;  %v633_v43 = vrot.slane %v3939_v52, 6 }
 0x4f3   :  { %v3943_v59 = vadd.f32 %v522_v56, %v519_v57  ;;  %533 = vrot.lane.b32.xlu0 %v532_v58, %s3779_s22 }
 0x4f5   :  { %531 = vst.msk [vmem:[#allocation2 + $0x8] sm:$0x30] %vm530_vm4, %v3943_v59  ;;  %v638_v60 = vrot.slane %v3943_v59, 4  ;;  %v739_v49 = vrot.slane %v3943_v59, 2 }
 0x4f7   :  { %639 = vrot.lane.b32.xlu1 %v638_v60, %s3779_s22 }
 0x565   :  { %v534_v61 = vpop.permute.xlu0 %533 }
 0x566   :  { %3305 = vmatmul.mubr.msk.f32.vlgmr.msra.gmra.mxu0 %vm106_vm3, %v534_v61 }
 0x567   :  { %3319 = vmatpush3.msra.mxu0 %v3809_v2  ;;  %3326 = vmatprep.mubr.msk.f32.mxu0 %vm3776_vm0, %v3775_v0 }
 0x568   :  { %3320 = vmatprep.subr.mxu0 %v3775_v0 }
 0x569   :  { %v640_v62 = vpop.permute.xlu1 %639  ;;  %3321 = vmatpush3.msra.mxu0 %v3813_v4 }
 0x56a   :  { %3316 = vmatmul.mubr.msk.f32.vlgmr.msra.gmra.mxu1 %vm106_vm3, %v640_v62  ;;  %3322 = vmatprep.subr.mxu0 %v3775_v0 }
 0x56b   :  { %3323 = vmatpush3.msra.mxu0 %v3821_v6  ;;  %3330 = vmatpush3.msra.mxu1 %v3811_v3 }
 0x56c   :  { %3324 = vmatprep.subr.mxu0 %v3775_v0  ;;  %3331 = vmatprep.subr.mxu1 %v3775_v0 }
 0x56d   :  { %3325 = vmatpush3.msra.mxu0 %v3829_v8  ;;  %3332 = vmatpush3.msra.mxu1 %v3817_v5 }
 0x56e   :  { %3333 = vmatprep.subr.mxu1 %v3775_v0  ;;  %3337 = vmatprep.mubr.msk.f32.mxu1 %vm3776_vm0, %v3775_v0 }
 0x56f   :  { %3334 = vmatpush3.msra.mxu1 %v3823_v7  ;;  %3340 = vmatprep.subr.mxu0 %v3775_v0 }
 0x570   :  { %3335 = vmatprep.subr.mxu1 %v3775_v0 }
 0x571   :  { %3336 = vmatpush3.msra.mxu1 %v3831_v9 }
 0x572   :  { %3351 = vmatprep.subr.mxu1 %v3775_v0 }
 0x626   :  { %v603_v63 = vpop.f32.mrf.mxu0 }
 0x627   :  { %v604_v1 = vadd.f32 %v3873_v22, %v603_v63 }
 0x628   :  { %v3306_v10 = vpop.f32.mrf.mxu0 }
 0x629   :  { %v608_v11 = vrot.slane %v604_v1, 4 }
 0x62a   :  { %v709_v12 = vpop.f32.mrf.mxu1 }
 0x62b   :  { %v710_v13 = vadd.f32 %v3875_v23, %v709_v12  ;;  %617 = vrot.lane.b32.xlu0 %v608_v11, %s3778_s0  ;;  %v610_v16 = vadd.f32 %v608_v11, %v3881_v33 }
 0x62c   :  { %v3317_v14 = vpop.f32.mrf.mxu1 }
 0x62d   :  { %v714_v15 = vrot.slane %v710_v13, 6  ;;  %v3054_v17 = vmul.f32 -1.442695, %v610_v16 }
 0x62f   :  { %723 = vrot.lane.b32.xlu1 %v714_v15, %s3778_s0  ;;  %v716_v18 = vadd.f32 %v714_v15, %v3883_v34  ;;  %3610 = vpow2.f32 %v3054_v17 }
 0x631   :  { %v3056_v19 = vmul.f32 -1.442695, %v716_v18 }
 0x633   :  { %3612 = vpow2.f32 %v3056_v19 }
 0x63c   :  { %v3611_v24 = vpop.eup %3610 }
 0x63d   :  { %v614_v25 = vadd.f32 1.0, %v3611_v24 }
 0x63f   :  { %3614 = vrcp.f32 %v614_v25 }
 0x640   :  { %v3613_v26 = vpop.eup %3612 }
 0x641   :  { %v720_v27 = vadd.f32 1.0, %v3613_v26 }
 0x643   :  { %3616 = vrcp.f32 %v720_v27 }
 0x64c   :  { %v3615_v28 = vpop.eup %3614 }
 0x64d   :  { %v627_v42 = vsub.f32 1.0, %v3615_v28  ;;  %v635_v45 = vmul.f32 %v3615_v28, %v633_v43 }
 0x650   :  { %v3617_v31 = vpop.eup %3616 }
 0x651   :  { %v733_v48 = vsub.f32 1.0, %v3617_v31  ;;  %v741_v51 = vmul.f32 %v3617_v31, %v739_v49 }
 0x69d   :  { %v618_v29 = vpop.permute.xlu0 %617 }
 0x69e   :  { %v620_v30 = vmul.f32 %v3615_v28, %v618_v29 }
 0x6a0   :  { %622 = vrot.lane.b32.xlu0 %v620_v30, %s3778_s0 }
 0x6a1   :  { %v724_v32 = vpop.permute.xlu1 %723 }
 0x6a2   :  { %v726_v35 = vmul.f32 %v3617_v31, %v724_v32 }
 0x6a4   :  { %728 = vrot.lane.b32.xlu1 %v726_v35, %s3778_s0 }
 0x712   :  { %v623_v36 = vpop.permute.xlu0 %622 }
 0x713   :  { %v625_v37 = vadd.f32 %v623_v36, %v3881_v33 }
 0x715   :  { %3618 = vtanh.f32 %v625_v37 }
 0x716   :  { %v729_v38 = vpop.permute.xlu1 %728 }
 0x717   :  { %v731_v39 = vadd.f32 %v729_v38, %v3883_v34 }
 0x719   :  { %3620 = vtanh.f32 %v731_v39 }
 0x722   :  { %v3619_v40 = vpop.eup %3618 }
 0x723   :  { %629 = vrot.lane.b32.xlu0 %v3619_v40, %s3779_s22 }
 0x726   :  { %v3621_v41 = vpop.eup %3620 }
 0x727   :  { %735 = vrot.lane.b32.xlu1 %v3621_v41, %s3779_s22 }
 0x795   :  { %v630_v44 = vpop.permute.xlu0 %629 }
 0x796   :  { %v632_v46 = vmul.f32 %v630_v44, %v627_v42 }
 0x798   :  { %v3985_v47 = vadd.f32 %v635_v45, %v632_v46 }
 0x799   :  { %v736_v50 = vpop.permute.xlu1 %735 }
 0x79a   :  { %v738_v53 = vmul.f32 %v736_v50, %v733_v48  ;;  %v751_v54 = vrot.slane %v3985_v47, 4  ;;  %v852_v38 = vrot.slane %v3985_v47, 6 }
 0x79c   :  { %v3989_v55 = vadd.f32 %v741_v51, %v738_v53  ;;  %752 = vrot.lane.b32.xlu0 %v751_v54, %s3779_s22 }
 0x79e   :  { %750 = vst.msk [vmem:[#allocation2 + $0x8] sm:$0xc] %vm749_vm5, %v3989_v55  ;;  %v857_v56 = vrot.slane %v3989_v55, 2 }
 0x7a0   :  { %858 = vrot.lane.b32.xlu1 %v857_v56, %s3779_s22 }
 0x80e   :  { %v753_v57 = vpop.permute.xlu0 %752 }
 0x80f   :  { %3327 = vmatmul.mubr.msk.f32.vlgmr.msra.gmra.mxu0 %vm106_vm3, %v753_v57 }
 0x810   :  { %3341 = vmatpush3.msra.mxu0 %v3809_v2  ;;  %3348 = vmatprep.mubr.msk.f32.mxu0 %vm3776_vm0, %v3775_v0 }
 0x811   :  { %3342 = vmatprep.subr.mxu0 %v3775_v0 }
 0x812   :  { %v859_v58 = vpop.permute.xlu1 %858  ;;  %3343 = vmatpush3.msra.mxu0 %v3813_v4 }
 0x813   :  { %3338 = vmatmul.mubr.msk.f32.vlgmr.msra.gmra.mxu1 %vm106_vm3, %v859_v58  ;;  %3344 = vmatprep.subr.mxu0 %v3775_v0 }
 0x814   :  { %3352 = vmatpush3.msra.mxu1 %v3811_v3  ;;  %3345 = vmatpush3.msra.mxu0 %v3821_v6 }
 0x815   :  { %3353 = vmatprep.subr.mxu1 %v3775_v0  ;;  %3346 = vmatprep.subr.mxu0 %v3775_v0 }
 0x816   :  { %3354 = vmatpush3.msra.mxu1 %v3817_v5  ;;  %3359 = vmatprep.mubr.msk.f32.mxu1 %vm3776_vm0, %v3775_v0 }
 0x817   :  { %3355 = vmatprep.subr.mxu1 %v3775_v0  ;;  %3347 = vmatpush3.msra.mxu0 %v3829_v8 }
 0x818   :  { %3356 = vmatpush3.msra.mxu1 %v3823_v7  ;;  %3362 = vmatprep.subr.mxu0 %v3775_v0 }
 0x819   :  { %3357 = vmatprep.subr.mxu1 %v3775_v0 }
 0x81a   :  { %3358 = vmatpush3.msra.mxu1 %v3831_v9 }
 0x81b   :  { %3373 = vmatprep.subr.mxu1 %v3775_v0 }
 0x8cf   :  { %v822_v59 = vpop.f32.mrf.mxu0 }
 0x8d0   :  { %v823_v60 = vadd.f32 %v3873_v22, %v822_v59 }
 0x8d1   :  { %v3328_v61 = vpop.f32.mrf.mxu0 }
 0x8d2   :  { %v827_v62 = vrot.slane %v823_v60, 2 }
 0x8d3   :  { %v928_v63 = vpop.f32.mrf.mxu1 }
 0x8d4   :  { %v929_v1 = vadd.f32 %v3875_v23, %v928_v63  ;;  %836 = vrot.lane.b32.xlu0 %v827_v62, %s3778_s0  ;;  %v829_v11 = vadd.f32 %v827_v62, %v3881_v33 }
 0x8d5   :  { %v3339_v10 = vpop.f32.mrf.mxu1 }
 0x8d6   :  { %940 = vrot.lane.b32.xlu1 %v929_v1, %s3778_s0  ;;  %v932_v12 = vadd.f32 %v929_v1, %v3883_v34  ;;  %v3058_v13 = vmul.f32 -1.442695, %v829_v11 }
 0x8d8   :  { %v3060_v14 = vmul.f32 -1.442695, %v932_v12  ;;  %3622 = vpow2.f32 %v3058_v13 }
 0x8da   :  { %3624 = vpow2.f32 %v3060_v14 }
 0x8e5   :  { %v3623_v15 = vpop.eup %3622 }
 0x8e6   :  { %v833_v17 = vadd.f32 1.0, %v3623_v15 }
 0x8e7   :  { %v3625_v16 = vpop.eup %3624 }
 0x8e8   :  { %v936_v18 = vadd.f32 1.0, %v3625_v16  ;;  %3626 = vrcp.f32 %v833_v17 }
 0x8ea   :  { %3628 = vrcp.f32 %v936_v18 }
 0x8f5   :  { %v3627_v19 = vpop.eup %3626 }
 0x8f6   :  { %v846_v37 = vsub.f32 1.0, %v3627_v19  ;;  %v854_v40 = vmul.f32 %v3627_v19, %v852_v38 }
 0x8f7   :  { %v3629_v26 = vpop.eup %3628 }
 0x8f8   :  { %v950_v42 = vsub.f32 1.0, %v3629_v26 }
 0x946   :  { %v837_v24 = vpop.permute.xlu0 %836 }
 0x947   :  { %v839_v25 = vmul.f32 %v3627_v19, %v837_v24 }
 0x948   :  { %v941_v27 = vpop.permute.xlu1 %940 }
 0x949   :  { %v943_v28 = vmul.f32 %v3629_v26, %v941_v27  ;;  %841 = vrot.lane.b32.xlu0 %v839_v25, %s3778_s0 }
 0x94b   :  { %945 = vrot.lane.b32.xlu1 %v943_v28, %s3778_s0 }
 0x9bb   :  { %v842_v29 = vpop.permute.xlu0 %841 }
 0x9bc   :  { %v844_v30 = vadd.f32 %v842_v29, %v3881_v33 }
 0x9bd   :  { %v946_v31 = vpop.permute.xlu1 %945 }
 0x9be   :  { %3630 = vtanh.f32 %v844_v30  ;;  %v948_v32 = vadd.f32 %v946_v31, %v3883_v34  ;;  %v957_v34 = vmul.f32 %v3629_v26, %v857_v56 }
 0x9c0   :  { %3632 = vtanh.f32 %v948_v32 }
 0x9cb   :  { %v3631_v35 = vpop.eup %3630 }
 0x9cc   :  { %848 = vrot.lane.b32.xlu0 %v3631_v35, %s3779_s22 }
 0x9cd   :  { %v3633_v36 = vpop.eup %3632 }
 0x9ce   :  { %952 = vrot.lane.b32.xlu1 %v3633_v36, %s3779_s22 }
 0xa3e   :  { %v849_v39 = vpop.permute.xlu0 %848 }
 0xa3f   :  { %v851_v41 = vmul.f32 %v849_v39, %v846_v37 }
 0xa40   :  { %v953_v43 = vpop.permute.xlu1 %952 }
 0xa41   :  { %v4033_v33 = vadd.f32 %v854_v40, %v851_v41  ;;  %v955_v44 = vmul.f32 %v953_v43, %v950_v42 }
 0xa43   :  { %v4037_v45 = vadd.f32 %v957_v34, %v955_v44  ;;  %v967_v46 = vrot.slane %v4033_v33, 6 }
 0xa45   :  { %966 = vst.msk [vmem:[#allocation2 + $0x8] sm:$0x3] %vm965_vm6, %v4037_v45  ;;  %1070 = vrot.lane.b32.xlu1 %v4037_v45, %s3779_s22  ;;  %968 = vrot.lane.b32.xlu0 %v967_v46, %s3779_s22  ;;  %v1170_v32 = vrot.slane %v4037_v45, 2 }
 0xab7   :  { %v1071_v48 = vpop.permute.xlu1 %1070  ;;  %v969_v49 = vpop.permute.xlu0 %968 }
 0xab8   :  { %3349 = vmatmul.mubr.msk.f32.vlgmr.msra.gmra.mxu0 %vm106_vm3, %v969_v49  ;;  %3360 = vmatmul.mubr.msk.f32.vlgmr.msra.gmra.mxu1 %vm106_vm3, %v1071_v48 }
 0xab9   :  { %3363 = vmatpush3.msra.mxu0 %v3809_v2  ;;  %3374 = vmatpush3.msra.mxu1 %v3811_v3 }
 0xaba   :  { %3364 = vmatprep.subr.mxu0 %v3775_v0  ;;  %3375 = vmatprep.subr.mxu1 %v3775_v0 }
 0xabb   :  { %3365 = vmatpush3.msra.mxu0 %v3813_v4  ;;  %3370 = vmatprep.mubr.msk.f32.mxu0 %vm3776_vm0, %v3775_v0 }
 0xabc   :  { %3366 = vmatprep.subr.mxu0 %v3775_v0  ;;  %3376 = vmatpush3.msra.mxu1 %v3817_v5 }
 0xabd   :  { %3367 = vmatpush3.msra.mxu0 %v3821_v6  ;;  %3377 = vmatprep.subr.mxu1 %v3775_v0 }
 0xabe   :  { %3368 = vmatprep.subr.mxu0 %v3775_v0  ;;  %3378 = vmatpush3.msra.mxu1 %v3823_v7 }
 0xabf   :  { %3369 = vmatpush3.msra.mxu0 %v3829_v8  ;;  %3379 = vmatprep.subr.mxu1 %v3775_v0 }
 0xac0   :  { %3380 = vmatpush3.msra.mxu1 %v3831_v9  ;;  %3381 = vmatprep.mubr.msk.f32.mxu1 %vm3776_vm0, %v3775_v0 }
 0xac1   :  { %3384 = vmatprep.subr.mxu0 %v3775_v0  ;;  %3395 = vmatprep.subr.mxu1 %v3775_v0 }
 0xb78   :  { %v1038_v50 = vpop.f32.mrf.mxu0  ;;  %v1140_v51 = vpop.f32.mrf.mxu1 }
 0xb79   :  { %v1039_v53 = vadd.f32 %v3873_v22, %v1038_v50  ;;  %v1141_v54 = vadd.f32 %v3875_v23, %v1140_v51 }
 0xb7a   :  { %v3350_v55 = vpop.f32.mrf.mxu0  ;;  %v3361_v56 = vpop.f32.mrf.mxu1 }
 0xb7b   :  { %v1145_v57 = vrot.slane %v1141_v54, 2  ;;  %1050 = vrot.lane.b32.xlu0 %v1039_v53, %s3778_s0  ;;  %v1042_v58 = vadd.f32 %v1039_v53, %v3871_v21 }
 0xb7d   :  { %1154 = vrot.lane.b32.xlu1 %v1145_v57, %s3778_s0  ;;  %v1147_v59 = vadd.f32 %v1145_v57, %v3869_v20  ;;  %v3062_v60 = vmul.f32 -1.442695, %v1042_v58 }
 0xb7f   :  { %v3064_v61 = vmul.f32 -1.442695, %v1147_v59  ;;  %3634 = vpow2.f32 %v3062_v60 }
 0xb81   :  { %3636 = vpow2.f32 %v3064_v61 }
 0xb8c   :  { %v3635_v62 = vpop.eup %3634 }
 0xb8d   :  { %v1046_v1 = vadd.f32 1.0, %v3635_v62 }
 0xb8e   :  { %v3637_v63 = vpop.eup %3636 }
 0xb8f   :  { %v1151_v10 = vadd.f32 1.0, %v3637_v63  ;;  %3638 = vrcp.f32 %v1046_v1 }
 0xb91   :  { %3640 = vrcp.f32 %v1151_v10 }
 0xb9c   :  { %v3639_v11 = vpop.eup %3638 }
 0xb9d   :  { %v1060_v27 = vsub.f32 1.0, %v3639_v11  ;;  %v1067_v29 = vmul.f32 %v3639_v11, %v967_v46 }
 0xb9e   :  { %v3641_v14 = vpop.eup %3640 }
 0xb9f   :  { %v1164_v31 = vsub.f32 1.0, %v3641_v14  ;;  %v1172_v37 = vmul.f32 %v3641_v14, %v1170_v32  ;;  %v3743_v32 = vld [vmem:[#allocation3 + $0x38] sm:$0xff] }
 0xbed   :  { %v1051_v12 = vpop.permute.xlu0 %1050 }
 0xbee   :  { %v1053_v13 = vmul.f32 %v3639_v11, %v1051_v12 }
 0xbef   :  { %v1155_v15 = vpop.permute.xlu1 %1154 }
 0xbf0   :  { %v1157_v16 = vmul.f32 %v3641_v14, %v1155_v15  ;;  %1055 = vrot.lane.b32.xlu0 %v1053_v13, %s3778_s0 }
 0xbf2   :  { %1159 = vrot.lane.b32.xlu1 %v1157_v16, %s3778_s0 }
 0xc62   :  { %v1056_v17 = vpop.permute.xlu0 %1055 }
 0xc63   :  { %v1058_v18 = vadd.f32 %v1056_v17, %v3871_v21 }
 0xc64   :  { %v1160_v19 = vpop.permute.xlu1 %1159 }
 0xc65   :  { %3642 = vtanh.f32 %v1058_v18  ;;  %v1162_v24 = vadd.f32 %v1160_v19, %v3869_v20 }
 0xc67   :  { %3644 = vtanh.f32 %v1162_v24 }
 0xc72   :  { %v3643_v25 = vpop.eup %3642 }
 0xc73   :  { %1062 = vrot.lane.b32.xlu0 %v3643_v25, %s3779_s22 }
 0xc74   :  { %v3645_v26 = vpop.eup %3644 }
 0xc75   :  { %1166 = vrot.lane.b32.xlu1 %v3645_v26, %s3779_s22 }
 0xce5   :  { %v1063_v28 = vpop.permute.xlu0 %1062 }
 0xce6   :  { %v1065_v30 = vmul.f32 %v1063_v28, %v1060_v27  ;;  %v3740_v28 = vld [vmem:[#allocation3 + $0x18] sm:$0xff] }
 0xce7   :  { %v1167_v35 = vpop.permute.xlu1 %1166 }
 0xce8   :  { %v4084_v36 = vadd.f32 %v1067_v29, %v1065_v30  ;;  %v1169_v38 = vmul.f32 %v1167_v35, %v1164_v31  ;;  %v3741_v30 = vld [vmem:[#allocation3 + $0x10] sm:$0xff]  ;;  %v3742_v31 = vld [vmem:[#allocation3 + $0x8] sm:$0xff]  ;;  %v3744_v35 = vld [vmem:[#allocation3] sm:$0xff] }
 0xcea   :  { %v4086_v39 = vadd.f32 %v1172_v37, %v1169_v38  ;;  %1175 = vrot.lane.b32.xlu0 %v4084_v36, %s3779_s22  ;;  %v1278_v1 = vrot.slane %v4084_v36, 6  ;;  %v3745_v36 = vld [vmem:[#allocation3 + $0x30] sm:$0xff]  ;;  %v3746_v37 = vld [vmem:[#allocation3 + $0x28] sm:$0xff]  ;;  %v3747_v38 = vld [vmem:[#allocation3 + $0x20] sm:$0xff] }
 0xcec   :  { %v1283_v40 = vrot.slane %v4086_v39, 6  ;;  %v1384_v16 = vrot.slane %v4086_v39, 2 }
 0xcee   :  { %1284 = vrot.lane.b32.xlu1 %v1283_v40, %s3779_s22 }
 0xd5c   :  { %v1176_v41 = vpop.permute.xlu0 %1175 }
 0xd5d   :  { %1178 = vst.msk [vmem:[#allocation2 + $0x8] sm:$0x3] %vm312_vm2, %v1176_v41  ;;  %3371 = vmatmul.mubr.msk.f32.vlgmr.msra.gmra.mxu0 %vm106_vm3, %v1176_v41 }
 0xd5e   :  { %3385 = vmatpush3.msra.mxu0 %v3809_v2  ;;  %3392 = vmatprep.mubr.msk.f32.mxu0 %vm3776_vm0, %v3775_v0 }
 0xd5f   :  { %3386 = vmatprep.subr.mxu0 %v3775_v0 }
 0xd60   :  { %v1285_v42 = vpop.permute.xlu1 %1284  ;;  %3387 = vmatpush3.msra.mxu0 %v3813_v4 }
 0xd61   :  { %3382 = vmatmul.mubr.msk.f32.vlgmr.msra.gmra.mxu1 %vm106_vm3, %v1285_v42  ;;  %3388 = vmatprep.subr.mxu0 %v3775_v0 }
 0xd62   :  { %3389 = vmatpush3.msra.mxu0 %v3821_v6  ;;  %3396 = vmatpush3.msra.mxu1 %v3811_v3 }
 0xd63   :  { %3390 = vmatprep.subr.mxu0 %v3775_v0  ;;  %3397 = vmatprep.subr.mxu1 %v3775_v0 }
 0xd64   :  { %3391 = vmatpush3.msra.mxu0 %v3829_v8  ;;  %3398 = vmatpush3.msra.mxu1 %v3817_v5 }
 0xd65   :  { %3399 = vmatprep.subr.mxu1 %v3775_v0  ;;  %3403 = vmatprep.mubr.msk.f32.mxu1 %vm3776_vm0, %v3775_v0 }
 0xd66   :  { %3400 = vmatpush3.msra.mxu1 %v3823_v7  ;;  %3406 = vmatprep.subr.mxu0 %v3775_v0 }
 0xd67   :  { %3401 = vmatprep.subr.mxu1 %v3775_v0 }
 0xd68   :  { %3402 = vmatpush3.msra.mxu1 %v3831_v9 }
 0xd69   :  { %3417 = vmatprep.subr.mxu1 %v3775_v0 }
 0xe1d   :  { %v1248_v2 = vpop.f32.mrf.mxu0 }
 0xe1e   :  { %v1249_v3 = vadd.f32 %v3873_v22, %v1248_v2 }
 0xe1f   :  { %v3372_v4 = vpop.f32.mrf.mxu0 }
 0xe20   :  { %v1253_v5 = vrot.slane %v1249_v3, 6 }
 0xe21   :  { %v1354_v6 = vpop.f32.mrf.mxu1 }
 0xe22   :  { %v1355_v8 = vadd.f32 %v3875_v23, %v1354_v6  ;;  %1262 = vrot.lane.b32.xlu0 %v1253_v5, %s3778_s0  ;;  %v1255_v34 = vadd.f32 %v1253_v5, %v3871_v21 }
 0xe23   :  { %v3383_v43 = vpop.f32.mrf.mxu1 }
 0xe24   :  { %v1359_v7 = vrot.slane %v1355_v8, 4  ;;  %v3066_v44 = vmul.f32 -1.442695, %v1255_v34 }
 0xe26   :  { %1368 = vrot.lane.b32.xlu1 %v1359_v7, %s3778_s0  ;;  %v1361_v9 = vadd.f32 %v1359_v7, %v3869_v20  ;;  %3646 = vpow2.f32 %v3066_v44 }
 0xe28   :  { %v3068_v45 = vmul.f32 -1.442695, %v1361_v9 }
 0xe2a   :  { %3648 = vpow2.f32 %v3068_v45 }
 0xe33   :  { %v3647_v46 = vpop.eup %3646 }
 0xe34   :  { %v1259_v48 = vadd.f32 1.0, %v3647_v46 }
 0xe36   :  { %3650 = vrcp.f32 %v1259_v48 }
 0xe37   :  { %v3649_v49 = vpop.eup %3648 }
 0xe38   :  { %v1365_v50 = vadd.f32 1.0, %v3649_v49 }
 0xe3a   :  { %3652 = vrcp.f32 %v1365_v50 }
 0xe43   :  { %v3651_v51 = vpop.eup %3650 }
 0xe44   :  { %v1272_v10 = vsub.f32 1.0, %v3651_v51  ;;  %v1280_v12 = vmul.f32 %v3651_v51, %v1278_v1 }
 0xe47   :  { %v3653_v55 = vpop.eup %3652 }
 0xe48   :  { %v1378_v15 = vsub.f32 1.0, %v3653_v55  ;;  %v1386_v18 = vmul.f32 %v3653_v55, %v1384_v16 }
 0xe94   :  { %v1263_v53 = vpop.permute.xlu0 %1262 }
 0xe95   :  { %v1265_v54 = vmul.f32 %v3651_v51, %v1263_v53 }
 0xe97   :  { %1267 = vrot.lane.b32.xlu0 %v1265_v54, %s3778_s0 }
 0xe98   :  { %v1369_v56 = vpop.permute.xlu1 %1368 }
 0xe99   :  { %v1371_v57 = vmul.f32 %v3653_v55, %v1369_v56 }
 0xe9b   :  { %1373 = vrot.lane.b32.xlu1 %v1371_v57, %s3778_s0 }
 0xf09   :  { %v1268_v58 = vpop.permute.xlu0 %1267 }
 0xf0a   :  { %v1270_v59 = vadd.f32 %v1268_v58, %v3871_v21 }
 0xf0c   :  { %3654 = vtanh.f32 %v1270_v59 }
 0xf0d   :  { %v1374_v60 = vpop.permute.xlu1 %1373 }
 0xf0e   :  { %v1376_v61 = vadd.f32 %v1374_v60, %v3869_v20 }
 0xf10   :  { %3656 = vtanh.f32 %v1376_v61 }
 0xf19   :  { %v3655_v62 = vpop.eup %3654 }
 0xf1a   :  { %1274 = vrot.lane.b32.xlu0 %v3655_v62, %s3779_s22 }
 0xf1d   :  { %v3657_v63 = vpop.eup %3656 }
 0xf1e   :  { %1380 = vrot.lane.b32.xlu1 %v3657_v63, %s3779_s22 }
 0xf8c   :  { %v1275_v11 = vpop.permute.xlu0 %1274 }
 0xf8d   :  { %v1277_v13 = vmul.f32 %v1275_v11, %v1272_v10 }
 0xf8f   :  { %v4128_v14 = vadd.f32 %v1280_v12, %v1277_v13 }
 0xf90   :  { %v1381_v17 = vpop.permute.xlu1 %1380 }
 0xf91   :  { %v1383_v19 = vmul.f32 %v1381_v17, %v1378_v15  ;;  %v1394_v24 = vrot.slane %v4128_v14, 2  ;;  %v1495_v60 = vrot.slane %v4128_v14, 6 }
 0xf93   :  { %v4132_v25 = vadd.f32 %v1386_v18, %v1383_v19  ;;  %1395 = vrot.lane.b32.xlu0 %v1394_v24, %s3779_s22 }
 0xf95   :  { %v1500_v26 = vrot.slane %v4132_v25, 4  ;;  %v1601_v11 = vrot.slane %v4132_v25, 2 }
 0xf97   :  { %1501 = vrot.lane.b32.xlu1 %v1500_v26, %s3779_s22 }
0x1005   :  { %v1396_v27 = vpop.permute.xlu0 %1395 }
0x1006   :  { %3393 = vmatmul.mubr.msk.f32.vlgmr.msra.gmra.mxu0 %vm106_vm3, %v1396_v27  ;;  %v3748_v27 = vld [vmem:[#allocation3 + $0x104] ss:$0 sm:$0xff] }
0x1007   :  { %3407 = vmatpush3.msra.mxu0 %v3740_v28  ;;  %3414 = vmatprep.mubr.msk.f32.mxu0 %vm3776_vm0, %v3775_v0 }
0x1008   :  { %3408 = vmatprep.subr.mxu0 %v3775_v0 }
0x1009   :  { %v1502_v29 = vpop.permute.xlu1 %1501  ;;  %3409 = vmatpush3.msra.mxu0 %v3741_v30 }
0x100a   :  { %3404 = vmatmul.mubr.msk.f32.vlgmr.msra.gmra.mxu1 %vm106_vm3, %v1502_v29  ;;  %3410 = vmatprep.subr.mxu0 %v3775_v0 }
0x100b   :  { %3411 = vmatpush3.msra.mxu0 %v3742_v31  ;;  %3418 = vmatpush3.msra.mxu1 %v3743_v32  ;;  %v3749_v32 = vld [vmem:[#allocation3 + $0x105] ss:$0 sm:$0xff] }
0x100c   :  { %3412 = vmatprep.subr.mxu0 %v3775_v0  ;;  %3419 = vmatprep.subr.mxu1 %v3775_v0 }
0x100d   :  { %3413 = vmatpush3.msra.mxu0 %v3744_v35  ;;  %3420 = vmatpush3.msra.mxu1 %v3745_v36 }
0x100e   :  { %3421 = vmatprep.subr.mxu1 %v3775_v0  ;;  %3425 = vmatprep.mubr.msk.f32.mxu1 %vm3776_vm0, %v3775_v0 }
0x100f   :  { %3422 = vmatpush3.msra.mxu1 %v3746_v37 }
0x1010   :  { %3423 = vmatprep.subr.mxu1 %v3775_v0 }
0x1011   :  { %3424 = vmatpush3.msra.mxu1 %v3747_v38 }
0x1012   :  { %3447 = vmatprep.subr.mxu1 %v3775_v0 }
0x10c6   :  { %v1465_v40 = vpop.f32.mrf.mxu0 }
0x10c7   :  { %v1466_v41 = vadd.f32 %v3873_v22, %v1465_v40 }
0x10c8   :  { %v3394_v42 = vpop.f32.mrf.mxu0 }
0x10c9   :  { %v1470_v2 = vrot.slane %v1466_v41, 4 }
0x10ca   :  { %v1571_v3 = vpop.f32.mrf.mxu1 }
0x10cb   :  { %v1572_v4 = vadd.f32 %v3875_v23, %v1571_v3  ;;  %1479 = vrot.lane.b32.xlu0 %v1470_v2, %s3778_s0  ;;  %v1472_v8 = vadd.f32 %v1470_v2, %v3871_v21 }
0x10cc   :  { %v3405_v5 = vpop.f32.mrf.mxu1 }
0x10cd   :  { %v1576_v6 = vrot.slane %v1572_v4, 6  ;;  %v3070_v43 = vmul.f32 -1.442695, %v1472_v8 }
0x10cf   :  { %1585 = vrot.lane.b32.xlu1 %v1576_v6, %s3778_s0  ;;  %v1578_v7 = vadd.f32 %v1576_v6, %v3869_v20  ;;  %3658 = vpow2.f32 %v3070_v43 }
0x10d1   :  { %v3072_v34 = vmul.f32 -1.442695, %v1578_v7 }
0x10d3   :  { %3660 = vpow2.f32 %v3072_v34 }
0x10dc   :  { %v3659_v22 = vpop.eup %3658 }
0x10dd   :  { %v1476_v44 = vadd.f32 1.0, %v3659_v22 }
0x10df   :  { %3662 = vrcp.f32 %v1476_v44 }
0x10e0   :  { %v3661_v9 = vpop.eup %3660 }
0x10e1   :  { %v1582_v45 = vadd.f32 1.0, %v3661_v9 }
0x10e3   :  { %3664 = vrcp.f32 %v1582_v45 }
0x10ec   :  { %v3663_v23 = vpop.eup %3662 }
0x10ed   :  { %v1489_v59 = vsub.f32 1.0, %v3663_v23  ;;  %v1497_v62 = vmul.f32 %v3663_v23, %v1495_v60 }
0x10f0   :  { %v3665_v49 = vpop.eup %3664 }
0x10f1   :  { %v1595_v10 = vsub.f32 1.0, %v3665_v49  ;;  %v1603_v13 = vmul.f32 %v3665_v49, %v1601_v11 }
0x113d   :  { %v1480_v46 = vpop.permute.xlu0 %1479 }
0x113e   :  { %v1482_v48 = vmul.f32 %v3663_v23, %v1480_v46 }
0x1140   :  { %1484 = vrot.lane.b32.xlu0 %v1482_v48, %s3778_s0 }
0x1141   :  { %v1586_v50 = vpop.permute.xlu1 %1585 }
0x1142   :  { %v1588_v51 = vmul.f32 %v3665_v49, %v1586_v50  ;;  %v42_v49 = vld [vmem:[#allocation3 + $0x70] sm:$0xff]  ;;  %v39_v50 = vld [vmem:[#allocation3 + $0x58] sm:$0xff] }
0x1144   :  { %1590 = vrot.lane.b32.xlu1 %v1588_v51, %s3778_s0  ;;  %v38_v51 = vld [vmem:[#allocation3 + $0x50] sm:$0xff] }
0x11b2   :  { %v1485_v53 = vpop.permute.xlu0 %1484 }
0x11b3   :  { %v1487_v54 = vadd.f32 %v1485_v53, %v3871_v21  ;;  %v37_v53 = vld [vmem:[#allocation3 + $0x48] sm:$0xff] }
0x11b5   :  { %3666 = vtanh.f32 %v1487_v54  ;;  %v36_v54 = vld [vmem:[#allocation3 + $0x40] sm:$0xff] }
0x11b6   :  { %v1591_v55 = vpop.permute.xlu1 %1590 }
0x11b7   :  { %v1593_v56 = vadd.f32 %v1591_v55, %v3869_v20 }
0x11b9   :  { %3668 = vtanh.f32 %v1593_v56 }
0x11c2   :  { %v3667_v57 = vpop.eup %3666 }
0x11c3   :  { %1491 = vrot.lane.b32.xlu0 %v3667_v57, %s3779_s22 }
0x11c6   :  { %v3669_v58 = vpop.eup %3668 }
0x11c7   :  { %1597 = vrot.lane.b32.xlu1 %v3669_v58, %s3779_s22 }
0x1235   :  { %v1492_v61 = vpop.permute.xlu0 %1491 }
0x1236   :  { %v1494_v63 = vmul.f32 %v1492_v61, %v1489_v59 }
0x1238   :  { %v4163_v1 = vadd.f32 %v1497_v62, %v1494_v63 }
0x1239   :  { %v1598_v12 = vpop.permute.xlu1 %1597 }
0x123a   :  { %v1600_v15 = vmul.f32 %v1598_v12, %v1595_v10  ;;  %v1611_v16 = vrot.slane %v4163_v1, 4  ;;  %v1712_v56 = vrot.slane %v4163_v1, 6 }
0x123c   :  { %v4167_v17 = vadd.f32 %v1603_v13, %v1600_v15  ;;  %1612 = vrot.lane.b32.xlu0 %v1611_v16, %s3779_s22 }
0x123e   :  { %v1717_v18 = vrot.slane %v4167_v17, 2 }
0x1240   :  { %1718 = vrot.lane.b32.xlu1 %v1717_v18, %s3779_s22 }
0x12ae   :  { %v1613_v19 = vpop.permute.xlu0 %1612 }
0x12af   :  { %3415 = vmatmul.mubr.msk.f32.vlgmr.msra.gmra.mxu0 %vm106_vm3, %v1613_v19 }
0x12b2   :  { %v1719_v24 = vpop.permute.xlu1 %1718 }
0x12b3   :  { %3426 = vmatmul.mubr.msk.f32.vlgmr.msra.gmra.mxu1 %vm106_vm3, %v1719_v24 }
0x12b4   :  { %3455 = vmatprep.mubr.msk.f32.mxu1 %vm3776_vm0, %v3775_v0 }
0x136f   :  { %v1682_v26 = vpop.f32.mrf.mxu0 }
0x1370   :  { %v1683_v28 = vadd.f32 %v3748_v27, %v1682_v26 }
0x1371   :  { %v3416_v29 = vpop.f32.mrf.mxu0 }
0x1372   :  { %v1687_v30 = vrot.slane %v1683_v28, 2 }
0x1373   :  { %v1788_v31 = vpop.f32.mrf.mxu1 }
0x1374   :  { %v1789_v35 = vadd.f32 %v3749_v32, %v1788_v31  ;;  %1696 = vrot.lane.b32.xlu0 %v1687_v30, %s3778_s0  ;;  %v1689_v37 = vadd.f32 %v1687_v30, %v3871_v21 }
0x1375   :  { %v3427_v36 = vpop.f32.mrf.mxu1 }
0x1376   :  { %1800 = vrot.lane.b32.xlu1 %v1789_v35, %s3778_s0  ;;  %v1792_v38 = vadd.f32 %v1789_v35, %v3869_v20  ;;  %v3074_v40 = vmul.f32 -1.442695, %v1689_v37 }
0x1378   :  { %v3076_v41 = vmul.f32 -1.442695, %v1792_v38  ;;  %3670 = vpow2.f32 %v3074_v40 }
0x137a   :  { %3672 = vpow2.f32 %v3076_v41 }
0x1385   :  { %v3671_v42 = vpop.eup %3670 }
0x1386   :  { %v1693_v3 = vadd.f32 1.0, %v3671_v42 }
0x1387   :  { %v3673_v2 = vpop.eup %3672 }
0x1388   :  { %v1796_v4 = vadd.f32 1.0, %v3673_v2  ;;  %3674 = vrcp.f32 %v1693_v3 }
0x138a   :  { %3676 = vrcp.f32 %v1796_v4 }
0x1395   :  { %v4182_v5 = vpop.eup %3674 }
0x1396   :  { %v1706_v55 = vsub.f32 1.0, %v4182_v5  ;;  %v1714_v58 = vmul.f32 %v4182_v5, %v1712_v56 }
0x1397   :  { %v4185_v43 = vpop.eup %3676 }
0x1398   :  { %v1810_v60 = vsub.f32 1.0, %v4185_v43  ;;  %v1817_v63 = vmul.f32 %v4185_v43, %v1717_v18  ;;  %v4251_v18 = vld [vmem:[#allocation3 + $0x108] ss:$0 sm:$0xff] }
0x13e6   :  { %v1697_v6 = vpop.permute.xlu0 %1696 }
0x13e7   :  { %v1699_v8 = vmul.f32 %v4182_v5, %v1697_v6 }
0x13e8   :  { %v1801_v7 = vpop.permute.xlu1 %1800 }
0x13e9   :  { %v1803_v34 = vmul.f32 %v4185_v43, %v1801_v7  ;;  %1701 = vrot.lane.b32.xlu0 %v1699_v8, %s3778_s0 }
0x13eb   :  { %1805 = vrot.lane.b32.xlu1 %v1803_v34, %s3778_s0 }
0x13ef   :  { %744 = vrot.lane.b32.xlu1 %v3985_v47, %s3779_s22  ;;  %v43_v47 = vld [vmem:[#allocation3 + $0x78] sm:$0xff] }
0x13f0   :  { %3428 = vmatprep.subr.mxu0 %v43_v47 }
0x13f1   :  { %3429 = vmatpush3.msra.mxu0 %v43_v47 }
0x13f2   :  { %3430 = vmatprep.subr.mxu0 %v42_v49 }
0x13f3   :  { %3431 = vmatpush3.msra.mxu0 %v42_v49 }
0x145b   :  { %v1702_v22 = vpop.permute.xlu0 %1701 }
0x145c   :  { %v1704_v44 = vadd.f32 %v1702_v22, %v3871_v21  ;;  %v4201_v21 = vld [vmem:[#allocation3 + $0x98] sm:$0xff] }
0x145d   :  { %v1806_v9 = vpop.permute.xlu1 %1805  ;;  %3448 = vmatpush3.msra.mxu1 %v4201_v21 }
0x145e   :  { %3678 = vtanh.f32 %v1704_v44  ;;  %v1808_v45 = vadd.f32 %v1806_v9, %v3869_v20  ;;  %v4203_v20 = vld [vmem:[#allocation3 + $0x90] sm:$0xff]  ;;  %3449 = vmatprep.subr.mxu1 %v3775_v0 }
0x145f   :  { %3450 = vmatpush3.msra.mxu1 %v4203_v20 }
0x1460   :  { %3680 = vtanh.f32 %v1808_v45  ;;  %3451 = vmatprep.subr.mxu1 %v3775_v0 }
0x1461   :  { %v745_v23 = vpop.permute.xlu1 %744 }
0x1462   :  { %748 = vst.msk [vmem:[#allocation2] sm:$0x30] %vm747_vm7, %v745_v23 }
0x1463   :  { %1393 = vst.msk [vmem:[#allocation2] sm:$0x30] %vm530_vm4, %v4132_v25  ;;  %v4209_v25 = vld [vmem:[#allocation3 + $0x88] sm:$0xff] }
0x1464   :  { %3452 = vmatpush3.msra.mxu1 %v4209_v25 }
0x1465   :  { %3453 = vmatprep.subr.mxu1 %v3775_v0 }
0x146b   :  { %v3679_v46 = vpop.eup %3678 }
0x146c   :  { %1708 = vrot.lane.b32.xlu0 %v3679_v46, %s3779_s22 }
0x146d   :  { %v3681_v48 = vpop.eup %3680 }
0x146e   :  { %1812 = vrot.lane.b32.xlu1 %v3681_v48, %s3779_s22 }
0x1470   :  { %525 = vrot.lane.b32.xlu0 %v3939_v52, %s3779_s22  ;;  %v4215_v52 = vld [vmem:[#allocation3 + $0x80] sm:$0xff] }
0x1471   :  { %3454 = vmatpush3.msra.mxu1 %v4215_v52 }
0x1472   :  { %1389 = vrot.lane.b32.xlu1 %v4128_v14, %s3779_s22  ;;  %v41_v14 = vld [vmem:[#allocation3 + $0x68] sm:$0xff]  ;;  %3456 = vmatmul.mubr.f32.vlgmr.msra.gmra.mxu1 %v3775_v0 }
0x1473   :  { %3432 = vmatprep.subr.mxu0 %v41_v14  ;;  %3458 = vmatprep.subr.mxu1 %v3775_v0 }
0x1474   :  { %960 = vrot.lane.b32.xlu0 %v4033_v33, %s3779_s22  ;;  %v40_v33 = vld [vmem:[#allocation3 + $0x60] sm:$0xff]  ;;  %3433 = vmatpush3.msra.mxu0 %v41_v14 }
0x1475   :  { %3459 = vmatpush3.msra.mxu1 %v4201_v21  ;;  %3434 = vmatprep.subr.mxu0 %v40_v33 }
0x1476   :  { %3460 = vmatprep.subr.mxu1 %v3775_v0  ;;  %3435 = vmatpush3.msra.mxu0 %v40_v33 }
0x1477   :  { %3461 = vmatpush3.msra.mxu1 %v4203_v20  ;;  %3466 = vmatprep.mubr.msk.f32.mxu1 %vm3776_vm0, %v3775_v0 }
0x1478   :  { %1606 = vrot.lane.b32.xlu0 %v4163_v1, %s3779_s22  ;;  %3462 = vmatprep.subr.mxu1 %v3775_v0 }
0x1479   :  { %3463 = vmatpush3.msra.mxu1 %v4209_v25  ;;  %3436 = vmatprep.subr.mxu0 %v39_v50 }
0x147a   :  { %3464 = vmatprep.subr.mxu1 %v3775_v0  ;;  %3437 = vmatpush3.msra.mxu0 %v39_v50 }
0x147b   :  { %3465 = vmatpush3.msra.mxu1 %v4215_v52  ;;  %3438 = vmatprep.subr.mxu0 %v38_v51 }
0x147c   :  { %3480 = vmatprep.subr.mxu1 %v3775_v0  ;;  %3439 = vmatpush3.msra.mxu0 %v38_v51 }
0x147d   :  { %3440 = vmatprep.subr.mxu0 %v37_v53 }
0x147e   :  { %3441 = vmatpush3.msra.mxu0 %v37_v53 }
0x147f   :  { %3442 = vmatprep.subr.mxu0 %v36_v54 }
0x1480   :  { %3443 = vmatpush3.msra.mxu0 %v36_v54 }
0x1481   :  { %3469 = vmatprep.subr.mxu0 %v3775_v0 }
0x14de   :  { %v1709_v57 = vpop.permute.xlu0 %1708 }
0x14df   :  { %v1711_v59 = vmul.f32 %v1709_v57, %v1706_v55 }
0x14e0   :  { %v1813_v61 = vpop.permute.xlu1 %1812 }
0x14e1   :  { %v1715_v62 = vadd.f32 %v1714_v58, %v1711_v59  ;;  %v1815_v10 = vmul.f32 %v1813_v61, %v1810_v60 }
0x14e2   :  { %v526_v11 = vpop.permute.xlu0 %525 }
0x14e3   :  { %v1818_v12 = vadd.f32 %v1817_v63, %v1815_v10  ;;  %529 = vst.msk [vmem:[#allocation2] sm:$0xc] %vm528_vm8, %v526_v11  ;;  %1820 = vrot.lane.b32.xlu1 %v1715_v62, %s3779_s22 }
0x14e4   :  { %1610 = vst.msk [vmem:[#allocation2] sm:$0xc] %vm749_vm5, %v4167_v17  ;;  %v1390_v1 = vpop.permute.xlu1 %1389 }
0x14e5   :  { %1824 = vst.msk [vmem:[#allocation2] sm:$0x3] %vm965_vm6, %v1818_v12 }
0x14e6   :  { %1392 = vst.msk [vmem:[#allocation2 + $0x8] sm:$0xc] %vm528_vm8, %v1390_v1  ;;  %v961_v13 = vpop.permute.xlu0 %960 }
0x14e7   :  { %964 = vst.msk [vmem:[#allocation2] sm:$0xc0] %vm963_vm9, %v961_v13 }
0x14e8   :  { %1179 = vst.msk [vmem:[#allocation2] sm:$0xc0] %vm314_vm1, %v4086_v39  ;;  %v3077_v39 = vld [vmem:[#allocation3 + $0x106] ss:$0 sm:$0xff] }
0x14ea   :  { %v1607_v15 = vpop.permute.xlu0 %1606 }
0x14eb   :  { %1609 = vst.msk [vmem:[#allocation2 + $0x8] sm:$0x30] %vm747_vm7, %v1607_v15 }
0x14ef   :  { %v1825_v16 = vld [vmem:[#allocation2] sm:$0xff] }
0x14f0   :  { %3444 = vmatprep.mubr.msk.f32.mxu0 %vm1831_vm10, %v1825_v16 }
0x1532   :  { %v1983_v17 = vpop.f32.mrf.mxu1 }
0x1533   :  { %v1984_v19 = vadd.f32 %v4251_v18, %v1983_v17 }
0x1534   :  { %v3457_v24 = vpop.f32.mrf.mxu1 }
0x1535   :  { %1995 = vrot.lane.b32.xlu0 %v1984_v19, %s3778_s0 }
0x1555   :  { %v1821_v26 = vpop.permute.xlu1 %1820 }
0x1556   :  { %1823 = vst.msk [vmem:[#allocation2 + $0x8] sm:$0xc0] %vm963_vm9, %v1821_v26 }
0x155d   :  { %v4256_v27 = vld [vmem:[#allocation2 + $0x8] sm:$0xff] }
0x155e   :  { %3445 = vmatmul.mubr.msk.f32.vlgmr.msra.gmra.mxu0 %vm1831_vm10, %v4256_v27 }
0x155f   :  { %3470 = vmatpush3.msra.mxu0 %v4201_v21  ;;  %3477 = vmatprep.mubr.msk.f32.mxu0 %vm3776_vm0, %v3775_v0 }
0x1560   :  { %3471 = vmatprep.subr.mxu0 %v3775_v0 }
0x1561   :  { %3472 = vmatpush3.msra.mxu0 %v4203_v20 }
0x1562   :  { %3473 = vmatprep.subr.mxu0 %v3775_v0 }
0x1563   :  { %3474 = vmatpush3.msra.mxu0 %v4209_v25 }
0x1564   :  { %3475 = vmatprep.subr.mxu0 %v3775_v0 }
0x1565   :  { %3476 = vmatpush3.msra.mxu0 %v4215_v52 }
0x1566   :  { %3491 = vmatprep.subr.mxu0 %v3775_v0 }
0x15a7   :  { %v1996_v38 = vpop.permute.xlu0 %1995 }
0x161e   :  { %v3446_v28 = vpop.f32.mrf.mxu0 }
0x161f   :  { %v4270_v29 = vadd.f32 %v3446_v28, %v3077_v39 }
0x1620   :  { %v1904_v30 = vpop.f32.mrf.mxu0 }
0x1621   :  { %v4272_v31 = vadd.f32 %v3077_v39, %v1904_v30 }
0x1623   :  { %v1987_v32 = vadd.f32 %v1984_v19, %v4272_v31 }
0x1625   :  { %v3081_v35 = vmul.f32 -1.442695, %v1987_v32 }
0x1627   :  { %3682 = vpow2.f32 %v3081_v35 }
0x1634   :  { %v3683_v36 = vpop.eup %3682 }
0x1635   :  { %v1991_v37 = vadd.f32 1.0, %v3683_v36 }
0x1637   :  { %3684 = vrcp.f32 %v1991_v37 }
0x1644   :  { %v3685_v40 = vpop.eup %3684 }
0x1645   :  { %v1998_v41 = vmul.f32 %v3685_v40, %v1996_v38  ;;  %v2005_v4 = vsub.f32 1.0, %v3685_v40  ;;  %v2011_v6 = vmul.f32 0.0, %v3685_v40 }
0x1647   :  { %2000 = vrot.lane.b32.xlu1 %v1998_v41, %s3778_s0 }
0x16b9   :  { %v2001_v42 = vpop.permute.xlu1 %2000 }
0x16ba   :  { %v2003_v2 = vadd.f32 %v2001_v42, %v4272_v31 }
0x16bc   :  { %3686 = vtanh.f32 %v2003_v2 }
0x16c9   :  { %v3687_v3 = vpop.eup %3686 }
0x16ca   :  { %2007 = vrot.lane.b32.xlu0 %v3687_v3, %s3779_s22 }
0x173c   :  { %v2008_v5 = vpop.permute.xlu0 %2007 }
0x173d   :  { %v2010_v8 = vmul.f32 %v2008_v5, %v2005_v4 }
0x173f   :  { %v2012_v43 = vadd.f32 %v2011_v6, %v2010_v8 }
0x1741   :  { %2014 = vrot.lane.b32.xlu1 %v2012_v43, %s3779_s22  ;;  %v2114_v53 = vrot.slane %v2012_v43, 6 }
0x17b3   :  { %v2015_v7 = vpop.permute.xlu1 %2014 }
0x17b4   :  { %3467 = vmatmul.mubr.msk.f32.vlgmr.msra.gmra.mxu1 %vm106_vm3, %v2015_v7 }
0x17b5   :  { %3481 = vmatpush3.msra.mxu1 %v4201_v21  ;;  %3488 = vmatprep.mubr.msk.f32.mxu1 %vm3776_vm0, %v3775_v0 }
0x17b6   :  { %3482 = vmatprep.subr.mxu1 %v3775_v0 }
0x17b7   :  { %3483 = vmatpush3.msra.mxu1 %v4203_v20 }
0x17b8   :  { %3484 = vmatprep.subr.mxu1 %v3775_v0 }
0x17b9   :  { %3485 = vmatpush3.msra.mxu1 %v4209_v25 }
0x17ba   :  { %3486 = vmatprep.subr.mxu1 %v3775_v0 }
0x17bb   :  { %3487 = vmatpush3.msra.mxu1 %v4215_v52 }
0x17bc   :  { %3502 = vmatprep.subr.mxu1 %v3775_v0 }
0x1874   :  { %v2084_v34 = vpop.f32.mrf.mxu1 }
0x1875   :  { %v2085_v22 = vadd.f32 %v4251_v18, %v2084_v34 }
0x1876   :  { %v3468_v44 = vpop.f32.mrf.mxu1 }
0x1877   :  { %v2089_v9 = vrot.slane %v2085_v22, 6 }
0x1879   :  { %2098 = vrot.lane.b32.xlu0 %v2089_v9, %s3778_s0  ;;  %v2091_v45 = vadd.f32 %v2089_v9, %v4272_v31 }
0x187b   :  { %v3083_v23 = vmul.f32 -1.442695, %v2091_v45 }
0x187d   :  { %3688 = vpow2.f32 %v3083_v23 }
0x188a   :  { %v3689_v46 = vpop.eup %3688 }
0x188b   :  { %v2095_v48 = vadd.f32 1.0, %v3689_v46 }
0x188d   :  { %3690 = vrcp.f32 %v2095_v48 }
0x189a   :  { %v3691_v47 = vpop.eup %3690 }
0x189b   :  { %v2108_v54 = vsub.f32 1.0, %v3691_v47  ;;  %v2116_v57 = vmul.f32 %v3691_v47, %v2114_v53 }
0x18eb   :  { %v2099_v49 = vpop.permute.xlu0 %2098 }
0x18ec   :  { %v2101_v14 = vmul.f32 %v3691_v47, %v2099_v49 }
0x18ee   :  { %2103 = vrot.lane.b32.xlu1 %v2101_v14, %s3778_s0 }
0x1960   :  { %v2104_v33 = vpop.permute.xlu1 %2103 }
0x1961   :  { %v2106_v50 = vadd.f32 %v2104_v33, %v4272_v31 }
0x1963   :  { %3692 = vtanh.f32 %v2106_v50 }
0x1970   :  { %v3693_v51 = vpop.eup %3692 }
0x1971   :  { %2110 = vrot.lane.b32.xlu0 %v3693_v51, %s3779_s22 }
0x19e3   :  { %v2111_v55 = vpop.permute.xlu0 %2110 }
0x19e4   :  { %v2113_v56 = vmul.f32 %v2111_v55, %v2108_v54 }
0x19e6   :  { %v2117_v58 = vadd.f32 %v2116_v57, %v2113_v56 }
0x19e8   :  { %v2119_v59 = vrot.slane %v2117_v58, 2  ;;  %v2220_v39 = vrot.slane %v2117_v58, 6 }
0x19ea   :  { %2120 = vrot.lane.b32.xlu1 %v2119_v59, %s3779_s22 }
0x1a5c   :  { %v2121_v60 = vpop.permute.xlu1 %2120 }
0x1a5d   :  { %3478 = vmatmul.mubr.msk.f32.vlgmr.msra.gmra.mxu0 %vm106_vm3, %v2121_v60 }
0x1a5e   :  { %3492 = vmatpush3.msra.mxu0 %v4201_v21  ;;  %3499 = vmatprep.mubr.msk.f32.mxu0 %vm3776_vm0, %v3775_v0 }
0x1a5f   :  { %3493 = vmatprep.subr.mxu0 %v3775_v0 }
0x1a60   :  { %3494 = vmatpush3.msra.mxu0 %v4203_v20 }
0x1a61   :  { %3495 = vmatprep.subr.mxu0 %v3775_v0 }
0x1a62   :  { %3496 = vmatpush3.msra.mxu0 %v4209_v25 }
0x1a63   :  { %3497 = vmatprep.subr.mxu0 %v3775_v0 }
0x1a64   :  { %3498 = vmatpush3.msra.mxu0 %v4215_v52 }
0x1a65   :  { %3513 = vmatprep.subr.mxu0 %v3775_v0 }
0x1b1d   :  { %v2190_v61 = vpop.f32.mrf.mxu0 }
0x1b1e   :  { %v2191_v62 = vadd.f32 %v4251_v18, %v2190_v61 }
0x1b1f   :  { %v3479_v63 = vpop.f32.mrf.mxu0 }
0x1b20   :  { %v2195_v10 = vrot.slane %v2191_v62, 4 }
0x1b22   :  { %2204 = vrot.lane.b32.xlu0 %v2195_v10, %s3778_s0  ;;  %v2197_v11 = vadd.f32 %v2195_v10, %v4272_v31 }
0x1b24   :  { %v3085_v12 = vmul.f32 -1.442695, %v2197_v11 }
0x1b26   :  { %3694 = vpow2.f32 %v3085_v12 }
0x1b33   :  { %v3695_v1 = vpop.eup %3694 }
0x1b34   :  { %v2201_v13 = vadd.f32 1.0, %v3695_v1 }
0x1b36   :  { %3696 = vrcp.f32 %v2201_v13 }
0x1b43   :  { %v3697_v15 = vpop.eup %3696 }
0x1b44   :  { %v2214_v28 = vsub.f32 1.0, %v3697_v15  ;;  %v2222_v32 = vmul.f32 %v3697_v15, %v2220_v39 }
0x1b94   :  { %v2205_v16 = vpop.permute.xlu0 %2204 }
0x1b95   :  { %v2207_v17 = vmul.f32 %v3697_v15, %v2205_v16 }
0x1b97   :  { %2209 = vrot.lane.b32.xlu1 %v2207_v17, %s3778_s0 }
0x1c09   :  { %v2210_v19 = vpop.permute.xlu1 %2209 }
0x1c0a   :  { %v2212_v24 = vadd.f32 %v2210_v19, %v4272_v31 }
0x1c0c   :  { %3698 = vtanh.f32 %v2212_v24 }
0x1c19   :  { %v3699_v26 = vpop.eup %3698 }
0x1c1a   :  { %2216 = vrot.lane.b32.xlu0 %v3699_v26, %s3779_s22 }
0x1c8c   :  { %v2217_v30 = vpop.permute.xlu0 %2216 }
0x1c8d   :  { %v2219_v35 = vmul.f32 %v2217_v30, %v2214_v28 }
0x1c8f   :  { %v2223_v36 = vadd.f32 %v2222_v32, %v2219_v35 }
0x1c91   :  { %v2225_v37 = vrot.slane %v2223_v36, 4  ;;  %v2326_v9 = vrot.slane %v2223_v36, 6 }
0x1c93   :  { %2226 = vrot.lane.b32.xlu1 %v2225_v37, %s3779_s22 }
0x1d05   :  { %v2227_v38 = vpop.permute.xlu1 %2226 }
0x1d06   :  { %3489 = vmatmul.mubr.msk.f32.vlgmr.msra.gmra.mxu1 %vm106_vm3, %v2227_v38 }
0x1d07   :  { %3503 = vmatpush3.msra.mxu1 %v4201_v21  ;;  %3510 = vmatprep.mubr.msk.f32.mxu1 %vm3776_vm0, %v3775_v0 }
0x1d08   :  { %3504 = vmatprep.subr.mxu1 %v3775_v0 }
0x1d09   :  { %3505 = vmatpush3.msra.mxu1 %v4203_v20 }
0x1d0a   :  { %3506 = vmatprep.subr.mxu1 %v3775_v0 }
0x1d0b   :  { %3507 = vmatpush3.msra.mxu1 %v4209_v25 }
0x1d0c   :  { %3508 = vmatprep.subr.mxu1 %v3775_v0 }
0x1d0d   :  { %3509 = vmatpush3.msra.mxu1 %v4215_v52 }
0x1d0e   :  { %3524 = vmatprep.subr.mxu1 %v3775_v0 }
0x1dc6   :  { %v2296_v40 = vpop.f32.mrf.mxu1 }
0x1dc7   :  { %v2297_v41 = vadd.f32 %v4251_v18, %v2296_v40 }
0x1dc8   :  { %v3490_v42 = vpop.f32.mrf.mxu1 }
0x1dc9   :  { %v2301_v2 = vrot.slane %v2297_v41, 2  ;;  %v55_v42 = vld [vmem:[#allocation3 + $0xd8] sm:$0xff] }
0x1dcb   :  { %2310 = vrot.lane.b32.xlu0 %v2301_v2, %s3778_s0  ;;  %v2303_v3 = vadd.f32 %v2301_v2, %v4272_v31 }
0x1dcd   :  { %v3087_v4 = vmul.f32 -1.442695, %v2303_v3  ;;  %v54_v3 = vld [vmem:[#allocation3 + $0xd0] sm:$0xff] }
0x1dcf   :  { %3700 = vpow2.f32 %v3087_v4  ;;  %v53_v4 = vld [vmem:[#allocation3 + $0xc8] sm:$0xff] }
0x1ddc   :  { %v3701_v5 = vpop.eup %3700 }
0x1ddd   :  { %v2307_v6 = vadd.f32 1.0, %v3701_v5  ;;  %v52_v5 = vld [vmem:[#allocation3 + $0xc0] sm:$0xff] }
0x1ddf   :  { %3702 = vrcp.f32 %v2307_v6  ;;  %v51_v6 = vld [vmem:[#allocation3 + $0xb8] sm:$0xff] }
0x1dec   :  { %v3703_v8 = vpop.eup %3702 }
0x1ded   :  { %v2320_v45 = vsub.f32 1.0, %v3703_v8  ;;  %v2328_v46 = vmul.f32 %v3703_v8, %v2326_v9 }
0x1e3d   :  { %v2311_v43 = vpop.permute.xlu0 %2310 }
0x1e3e   :  { %v2313_v7 = vmul.f32 %v3703_v8, %v2311_v43  ;;  %v50_v8 = vld [vmem:[#allocation3 + $0xb0] sm:$0xff]  ;;  %v49_v43 = vld [vmem:[#allocation3 + $0xa8] sm:$0xff] }
0x1e40   :  { %2315 = vrot.lane.b32.xlu1 %v2313_v7, %s3778_s0  ;;  %v48_v7 = vld [vmem:[#allocation3 + $0xa0] sm:$0xff] }
0x1eb2   :  { %v2316_v34 = vpop.permute.xlu1 %2315 }
0x1eb3   :  { %v2318_v22 = vadd.f32 %v2316_v34, %v4272_v31  ;;  %v2754_v34 = vrot.slane %v4256_v27, 6 }
0x1eb5   :  { %3704 = vtanh.f32 %v2318_v22 }
0x1ec2   :  { %v3705_v44 = vpop.eup %3704 }
0x1ec3   :  { %2322 = vrot.lane.b32.xlu0 %v3705_v44, %s3779_s22 }
0x1f35   :  { %v2323_v23 = vpop.permute.xlu0 %2322 }
0x1f36   :  { %v2325_v48 = vmul.f32 %v2323_v23, %v2320_v45 }
0x1f38   :  { %v2329_v47 = vadd.f32 %v2328_v46, %v2325_v48 }
0x1f3a   :  { %v2331_v49 = vrot.slane %v2329_v47, 6 }
0x1f3c   :  { %2332 = vrot.lane.b32.xlu1 %v2331_v49, %s3779_s22 }
0x1fae   :  { %v2333_v14 = vpop.permute.xlu1 %2332 }
0x1faf   :  { %3500 = vmatmul.mubr.msk.f32.vlgmr.msra.gmra.mxu0 %vm106_vm3, %v2333_v14 }
0x1fb0   :  { %3514 = vmatpush3.msra.mxu0 %v4201_v21  ;;  %3521 = vmatprep.mubr.msk.f32.mxu0 %vm3776_vm0, %v3775_v0 }
0x1fb1   :  { %3515 = vmatprep.subr.mxu0 %v3775_v0 }
0x1fb2   :  { %3516 = vmatpush3.msra.mxu0 %v4203_v20 }
0x1fb3   :  { %3517 = vmatprep.subr.mxu0 %v3775_v0 }
0x1fb4   :  { %3518 = vmatpush3.msra.mxu0 %v4209_v25 }
0x1fb5   :  { %3519 = vmatprep.subr.mxu0 %v3775_v0 }
0x1fb6   :  { %3520 = vmatpush3.msra.mxu0 %v4215_v52 }
0x1fb7   :  { %3535 = vmatprep.subr.mxu0 %v3775_v0 }
0x206f   :  { %v2402_v31 = vpop.f32.mrf.mxu0 }
0x2070   :  { %v2403_v33 = vadd.f32 %v4251_v18, %v2402_v31 }
0x2071   :  { %v3501_v50 = vpop.f32.mrf.mxu0 }
0x2072   :  { %2414 = vrot.lane.b32.xlu0 %v2403_v33, %s3778_s0  ;;  %v2406_v51 = vadd.f32 %v2403_v33, %v4270_v29 }
0x2074   :  { %v3089_v53 = vmul.f32 -1.442695, %v2406_v51 }
0x2076   :  { %3706 = vpow2.f32 %v3089_v53 }
0x2083   :  { %v3707_v54 = vpop.eup %3706 }
0x2084   :  { %v2410_v55 = vadd.f32 1.0, %v3707_v54  ;;  %v3099_v54 = vld [vmem:[#allocation3 + $0x109] ss:$0 sm:$0xff] }
0x2086   :  { %3708 = vrcp.f32 %v2410_v55  ;;  %v3096_v55 = vld [vmem:[#allocation3 + $0x107] ss:$0 sm:$0xff] }
0x2093   :  { %v3709_v56 = vpop.eup %3708 }
0x2094   :  { %v2424_v62 = vsub.f32 1.0, %v3709_v56  ;;  %v2431_v10 = vmul.f32 %v3709_v56, %v2331_v49 }
0x20e4   :  { %v2415_v57 = vpop.permute.xlu0 %2414 }
0x20e5   :  { %v2417_v58 = vmul.f32 %v3709_v56, %v2415_v57 }
0x20e7   :  { %2419 = vrot.lane.b32.xlu1 %v2417_v58, %s3778_s0 }
0x2159   :  { %v2420_v59 = vpop.permute.xlu1 %2419 }
0x215a   :  { %v2422_v60 = vadd.f32 %v2420_v59, %v4270_v29 }
0x215c   :  { %3710 = vtanh.f32 %v2422_v60 }
0x2169   :  { %v3711_v61 = vpop.eup %3710 }
0x216a   :  { %2426 = vrot.lane.b32.xlu0 %v3711_v61, %s3779_s22 }
0x21dc   :  { %v2427_v63 = vpop.permute.xlu0 %2426 }
0x21dd   :  { %v2429_v11 = vmul.f32 %v2427_v63, %v2424_v62 }
0x21df   :  { %v2432_v12 = vadd.f32 %v2431_v10, %v2429_v11 }
0x21e1   :  { %2434 = vrot.lane.b32.xlu1 %v2432_v12, %s3779_s22  ;;  %v2534_v32 = vrot.slane %v2432_v12, 6 }
0x2253   :  { %v2435_v1 = vpop.permute.xlu1 %2434 }
0x2254   :  { %3511 = vmatmul.mubr.msk.f32.vlgmr.msra.gmra.mxu1 %vm106_vm3, %v2435_v1 }
0x2255   :  { %3525 = vmatpush3.msra.mxu1 %v4201_v21  ;;  %3532 = vmatprep.mubr.msk.f32.mxu1 %vm3776_vm0, %v3775_v0 }
0x2256   :  { %3526 = vmatprep.subr.mxu1 %v3775_v0 }
0x2257   :  { %3527 = vmatpush3.msra.mxu1 %v4203_v20 }
0x2258   :  { %3528 = vmatprep.subr.mxu1 %v3775_v0 }
0x2259   :  { %3529 = vmatpush3.msra.mxu1 %v4209_v25 }
0x225a   :  { %3530 = vmatprep.subr.mxu1 %v3775_v0 }
0x225b   :  { %3531 = vmatpush3.msra.mxu1 %v4215_v52 }
0x225c   :  { %3554 = vmatprep.subr.mxu1 %v3775_v0 }
0x2314   :  { %v2504_v13 = vpop.f32.mrf.mxu1 }
0x2315   :  { %v2505_v21 = vadd.f32 %v4251_v18, %v2504_v13 }
0x2316   :  { %v3512_v15 = vpop.f32.mrf.mxu1 }
0x2317   :  { %v2509_v16 = vrot.slane %v2505_v21, 6 }
0x2319   :  { %2518 = vrot.lane.b32.xlu0 %v2509_v16, %s3778_s0  ;;  %v2511_v17 = vadd.f32 %v2509_v16, %v4270_v29 }
0x231b   :  { %v3091_v20 = vmul.f32 -1.442695, %v2511_v17 }
0x231d   :  { %3712 = vpow2.f32 %v3091_v20 }
0x232a   :  { %v3713_v19 = vpop.eup %3712 }
0x232b   :  { %v2515_v24 = vadd.f32 1.0, %v3713_v19  ;;  %v2861_v19 = vld [vmem:[%s4453_s2 + $0x38] sm:$0xff] }
0x232d   :  { %3714 = vrcp.f32 %v2515_v24  ;;  %v2860_v24 = vld [vmem:[%s4453_s2 + $0x30] sm:$0xff] }
0x233a   :  { %v3715_v25 = vpop.eup %3714 }
0x233b   :  { %v2528_v35 = vsub.f32 1.0, %v3715_v25  ;;  %v2536_v38 = vmul.f32 %v3715_v25, %v2534_v32 }
0x238b   :  { %v2519_v26 = vpop.permute.xlu0 %2518 }
0x238c   :  { %v2521_v39 = vmul.f32 %v3715_v25, %v2519_v26  ;;  %v2859_v25 = vld [vmem:[%s4453_s2 + $0x28] sm:$0xff]  ;;  %v2858_v26 = vld [vmem:[%s4453_s2 + $0x20] sm:$0xff] }
0x238e   :  { %2523 = vrot.lane.b32.xlu1 %v2521_v39, %s3778_s0 }
0x2400   :  { %v2524_v52 = vpop.permute.xlu1 %2523 }
0x2401   :  { %v2526_v28 = vadd.f32 %v2524_v52, %v4270_v29 }
0x2403   :  { %3716 = vtanh.f32 %v2526_v28 }
0x2410   :  { %v3717_v30 = vpop.eup %3716 }
0x2411   :  { %2530 = vrot.lane.b32.xlu0 %v3717_v30, %s3779_s22 }
0x2483   :  { %v2531_v36 = vpop.permute.xlu0 %2530 }
0x2484   :  { %v2533_v37 = vmul.f32 %v2531_v36, %v2528_v35 }
0x2486   :  { %v4368_v40 = vadd.f32 %v2536_v38, %v2533_v37 }
0x2488   :  { %v2539_v41 = vrot.slane %v4368_v40, 2  ;;  %v2640_v60 = vrot.slane %v4368_v40, 6 }
0x248a   :  { %2540 = vrot.lane.b32.xlu1 %v2539_v41, %s3779_s22 }
0x24fc   :  { %v2541_v2 = vpop.permute.xlu1 %2540 }
0x24fd   :  { %3522 = vmatmul.mubr.msk.f32.vlgmr.msra.gmra.mxu0 %vm106_vm3, %v2541_v2 }
0x24fe   :  { %3536 = vmatpush3.msra.mxu0 %v55_v42  ;;  %3551 = vmatprep.mubr.msk.f32.mxu0 %vm3776_vm0, %v3775_v0 }
0x24ff   :  { %3537 = vmatprep.subr.mxu0 %v3775_v0 }
0x2500   :  { %3538 = vmatpush3.msra.mxu0 %v54_v3 }
0x2501   :  { %3539 = vmatprep.subr.mxu0 %v3775_v0 }
0x2502   :  { %3540 = vmatpush3.msra.mxu0 %v53_v4 }
0x2503   :  { %3541 = vmatprep.subr.mxu0 %v3775_v0 }
0x2504   :  { %3542 = vmatpush3.msra.mxu0 %v52_v5 }
0x2505   :  { %3543 = vmatprep.subr.mxu0 %v3775_v0 }
0x2506   :  { %3544 = vmatpush3.msra.mxu0 %v51_v6  ;;  %v2857_v6 = vld [vmem:[%s4453_s2 + $0x18] sm:$0xff] }
0x2507   :  { %3545 = vmatprep.subr.mxu0 %v3775_v0 }
0x2508   :  { %3546 = vmatpush3.msra.mxu0 %v50_v8  ;;  %v2856_v8 = vld [vmem:[%s4453_s2 + $0x10] sm:$0xff] }
0x2509   :  { %3547 = vmatprep.subr.mxu0 %v3775_v0 }
0x250a   :  { %3548 = vmatpush3.msra.mxu0 %v49_v43 }
0x250b   :  { %3549 = vmatprep.subr.mxu0 %v3775_v0 }
0x250c   :  { %3550 = vmatpush3.msra.mxu0 %v48_v7  ;;  %v2855_v7 = vld [vmem:[%s4453_s2 + $0x8] sm:$0xff] }
0x250d   :  { %3552 = vmatmul.mubr.msk.f32.vlgmr.msra.gmra.mxu0 %vm1831_vm10, %v2754_v34 }
0x25bd   :  { %v2610_v22 = vpop.f32.mrf.mxu0 }
0x25be   :  { %v2611_v44 = vadd.f32 %v4251_v18, %v2610_v22  ;;  %v2854_v22 = vld [vmem:[%s4453_s2] sm:$0xff] }
0x25bf   :  { %v3523_v9 = vpop.f32.mrf.mxu0 }
0x25c0   :  { %v2615_v45 = vrot.slane %v2611_v44, 4 }
0x25c2   :  { %2624 = vrot.lane.b32.xlu0 %v2615_v45, %s3778_s0  ;;  %v2617_v48 = vadd.f32 %v2615_v45, %v4270_v29 }
0x25c4   :  { %v3093_v47 = vmul.f32 -1.442695, %v2617_v48 }
0x25c6   :  { %3718 = vpow2.f32 %v3093_v47 }
0x25cd   :  { %v2823_v23 = vpop.f32.mrf.mxu0 }
0x25ce   :  { %v2824_v56 = vadd.f32 %v3096_v55, %v2823_v23 }
0x25cf   :  { %v3553_v46 = vpop.f32.mrf.mxu0 }
0x25d0   :  { %v3098_v57 = vmul.f32 -1.442695, %v2824_v56 }
0x25d3   :  { %v3719_v49 = vpop.eup %3718 }
0x25d4   :  { %v2621_v27 = vadd.f32 1.0, %v3719_v49 }
0x25d6   :  { %3720 = vrcp.f32 %v2621_v27 }
0x25e3   :  { %v3721_v14 = vpop.eup %3720 }
0x25e4   :  { %v2634_v61 = vsub.f32 1.0, %v3721_v14  ;;  %v2642_v63 = vmul.f32 %v3721_v14, %v2640_v60 }
0x2634   :  { %v2625_v31 = vpop.permute.xlu0 %2624 }
0x2635   :  { %v2627_v33 = vmul.f32 %v3721_v14, %v2625_v31 }
0x2637   :  { %2629 = vrot.lane.b32.xlu1 %v2627_v33, %s3778_s0 }
0x26a9   :  { %v2630_v50 = vpop.permute.xlu1 %2629 }
0x26aa   :  { %v2632_v51 = vadd.f32 %v2630_v50, %v4270_v29 }
0x26ac   :  { %3722 = vtanh.f32 %v2632_v51 }
0x26ad   :  { %3724 = vpow2.f32 %v3098_v57 }
0x26b9   :  { %v3723_v53 = vpop.eup %3722 }
0x26ba   :  { %2636 = vrot.lane.b32.xlu0 %v3723_v53, %s3779_s22  ;;  %v3725_v58 = vpop.eup %3724 }
0x26bb   :  { %v2830_v59 = vadd.f32 1.0, %v3725_v58 }
0x26bd   :  { %3726 = vrcp.f32 %v2830_v59 }
0x26be   :  { %2838 = vrot.lane.b32.xlu0 %v3099_v54, %s3778_s0 }
0x26ca   :  { %v3727_v12 = vpop.eup %3726 }
0x26cb   :  { %v2848_v39 = vsub.f32 1.0, %v3727_v12 }
0x272c   :  { %v2637_v62 = vpop.permute.xlu0 %2636 }
0x272d   :  { %v2639_v10 = vmul.f32 %v2637_v62, %v2634_v61 }
0x272f   :  { %v4392_v11 = vadd.f32 %v2642_v63, %v2639_v10 }
0x2730   :  { %v2839_v1 = vpop.permute.xlu0 %2838 }
0x2731   :  { %v2841_v13 = vmul.f32 %v3727_v12, %v2839_v1  ;;  %v2645_v21 = vrot.slane %v4392_v11, 4  ;;  %v2746_v44 = vrot.slane %v4392_v11, 6 }
0x2733   :  { %2646 = vrot.lane.b32.xlu1 %v2645_v21, %s3779_s22  ;;  %2843 = vrot.lane.b32.xlu0 %v2841_v13, %s3778_s0 }
0x27a5   :  { %v2647_v15 = vpop.permute.xlu1 %2646  ;;  %v2844_v16 = vpop.permute.xlu0 %2843 }
0x27a6   :  { %v2846_v17 = vadd.f32 %v2844_v16, %v2824_v56  ;;  %3533 = vmatmul.mubr.msk.f32.vlgmr.msra.gmra.mxu1 %vm106_vm3, %v2647_v15  ;;  %v3030_v56 = vlaneseq }
0x27a7   :  { %3562 = vmatprep.mubr.msk.f32.mxu1 %vm3776_vm0, %v3775_v0  ;;  %3555 = vmatpush3.msra.mxu1 %v2861_v19 }
0x27a8   :  { %3728 = vtanh.f32 %v2846_v17  ;;  %3556 = vmatprep.subr.mxu1 %v3775_v0  ;;  %v3031_v57 = vand.u32 127, %v3030_v56 }
0x27a9   :  { %3557 = vmatpush3.msra.mxu1 %v2860_v24 }
0x27aa   :  { %3558 = vmatprep.subr.mxu1 %v3775_v0  ;;  %vm3032_vm11 = vcmp.ge.s32.totalorder %v3031_v57, 1 }
0x27ab   :  { %3559 = vmatpush3.msra.mxu1 %v2859_v25 }
0x27ac   :  { %3560 = vmatprep.subr.mxu1 %v3775_v0 }
0x27ad   :  { %3561 = vmatpush3.msra.mxu1 %v2858_v26 }
0x27ae   :  { %3565 = vmatprep.subr.mxu1 %v3775_v0 }
0x27b5   :  { %v3729_v20 = vpop.eup %3728 }
0x27b6   :  { %2850 = vrot.lane.b32.xlu0 %v3729_v20, %s3779_s22 }
0x2828   :  { %v2851_v52 = vpop.permute.xlu0 %2850 }
0x2829   :  { %v2853_v28 = vmul.f32 %v2851_v52, %v2848_v39 }
0x282b   :  { %2864 = vrot.lane.b32.xlu0 %v2853_v28, %s3779_s22 }
0x2866   :  { %v2716_v30 = vpop.f32.mrf.mxu1 }
0x2867   :  { %v2717_v32 = vadd.f32 %v4251_v18, %v2716_v30 }
0x2868   :  { %v3534_v35 = vpop.f32.mrf.mxu1 }
0x2869   :  { %v2721_v36 = vrot.slane %v2717_v32, 2 }
0x286b   :  { %2730 = vrot.lane.b32.xlu1 %v2721_v36, %s3778_s0  ;;  %v2723_v38 = vadd.f32 %v2721_v36, %v4270_v29 }
0x286d   :  { %v3095_v40 = vmul.f32 -1.442695, %v2723_v38 }
0x286f   :  { %3730 = vpow2.f32 %v3095_v40 }
0x287c   :  { %v3731_v41 = vpop.eup %3730 }
0x287d   :  { %v2727_v42 = vadd.f32 1.0, %v3731_v41 }
0x287f   :  { %3732 = vrcp.f32 %v2727_v42 }
0x288c   :  { %v3733_v2 = vpop.eup %3732 }
0x288d   :  { %v2740_v9 = vsub.f32 1.0, %v3733_v2  ;;  %v2748_v23 = vmul.f32 %v3733_v2, %v2746_v44 }
0x289d   :  { %v2865_v37 = vpop.permute.xlu0 %2864 }
0x289e   :  { %3563 = vmatmul.mubr.msk.f32.vlgmr.msra.gmra.mxu1 %vm106_vm3, %v2865_v37 }
0x289f   :  { %3573 = vmatprep.mubr.msk.f32.mxu1 %vm3776_vm0, %v3775_v0  ;;  %3566 = vmatpush3.msra.mxu1 %v2857_v6 }
0x28a0   :  { %3567 = vmatprep.subr.mxu1 %v3775_v0 }
0x28a1   :  { %3568 = vmatpush3.msra.mxu1 %v2856_v8 }
0x28a2   :  { %3569 = vmatprep.subr.mxu1 %v3775_v0 }
0x28a3   :  { %3570 = vmatpush3.msra.mxu1 %v2855_v7 }
0x28a4   :  { %3571 = vmatprep.subr.mxu1 %v3775_v0  ;;  %v3102_v0 = vld [vmem:[%s4453_s2 + $0x40] ss:$0 sm:$0xff] }
0x28a5   :  { %3572 = vmatpush3.msra.mxu1 %v2854_v22 }
0x28dd   :  { %v2731_v3 = vpop.permute.xlu1 %2730 }
0x28de   :  { %v2733_v18 = vmul.f32 %v3733_v2, %v2731_v3 }
0x28e0   :  { %2735 = vrot.lane.b32.xlu1 %v2733_v18, %s3778_s0 }
0x2952   :  { %v2736_v4 = vpop.permute.xlu1 %2735 }
0x2953   :  { %v2738_v5 = vadd.f32 %v2736_v4, %v4270_v29 }
0x2955   :  { %3734 = vtanh.f32 %v2738_v5 }
0x295e   :  { %v2934_v43 = vpop.f32.mrf.mxu1 }
0x2960   :  { %v3564_v34 = vpop.f32.mrf.mxu1 }
0x2962   :  { %v3735_v29 = vpop.eup %3734 }
0x2963   :  { %2742 = vrot.lane.b32.xlu1 %v3735_v29, %s3779_s22 }
0x29d5   :  { %v2743_v45 = vpop.permute.xlu1 %2742 }
0x29d6   :  { %v2745_v46 = vmul.f32 %v2743_v45, %v2740_v9 }
0x29d8   :  { %v2749_v48 = vadd.f32 %v2748_v23, %v2745_v46 }
0x29da   :  { %v2939_v47 = vrot.slane %v2749_v48, 6 }
0x29dc   :  { %2940 = vrot.lane.b32.xlu1 %v2939_v47, %s3779_s22 }
0x2a4e   :  { %v2941_v49 = vpop.permute.xlu1 %2940 }
0x2a4f   :  { %3574 = vmatmul.mubr.msk.f32.vlgmr.msra.gmra.mxu1 %vm106_vm3, %v2941_v49 }
0x2b0f   :  { %v3010_v27 = vpop.f32.mrf.mxu1 }
0x2b10   :  { %v3011_v14 = vadd.f32 %v3010_v27, %v2934_v43 }
0x2b11   :  { %v3575_v31 = vpop.f32.mrf.mxu1 }
0x2b12   :  { %v3018_v33 = vadd.f32 %v3102_v0, %v3011_v14 }
0x2b14   :  { %v3020_v50 = vand.u32 2147483647, %v3018_v33  ;;  %v3019_v59 = vmax.f32 %v3018_v33, 0.0  ;;  %vm3028_vm12 = vcmp.gt.f32.partialorder %v3018_v33, 20.0 }
0x2b16   :  { %v3021_v51 = vsub.f32 0.0, %v3020_v50 }
0x2b18   :  { %v3022_v53 = vmul.f32 1.442695, %v3021_v51 }
0x2b1a   :  { %3736 = vpow2.f32 %v3022_v53 }
0x2b27   :  { %v3737_v54 = vpop.eup %3736 }
0x2b28   :  { %v3024_v55 = vadd.f32 1.0, %v3737_v54 }
0x2b2a   :  { %3738 = vlog2.f32 %v3024_v55 }
0x2b37   :  { %v3739_v58 = vpop.eup %3738 }
0x2b38   :  { %v3026_v60 = vmul.f32 0.6931472, %v3739_v58 }
0x2b3a   :  { %v3027_v61 = vadd.f32 %v3026_v60, %v3019_v59 }
0x2b3c   :  { %v3029_v62 = vsel %vm3028_vm12, %v3018_v33, %v3027_v61 }
0x2b3d   :  { %v3033_v63 = vsel %vm3032_vm11, %v3029_v62, %v3018_v33 }
0x2b3e   :  { %3035 = vst.msk [vmem:[%s4454_s3] sm:$0x3] %vm3034_vm13, %v3033_v63 }
0x2b3f   :  { %3040 = vsyncpa [#allocation4], 1 }

</bundles_post_ra>
